<compile_context>
chip_gen: v5e
topology: v5e:2x2
jax: 0.10.0
libtpu: 0.0.40
codegen_flags: <defaults>
</compile_context>

<pallas_src>
import functools
import math

import jax
import jax.numpy as jnp
from jax.experimental import pallas as pl


_EPS = 1e-6


# ----------------------------------------------------------------------------
# small helpers used inside kernels
# ----------------------------------------------------------------------------
def _full_spec(arr):
    """BlockSpec for a single full-array block (grid=(1,))."""
    nd = arr.ndim
    return pl.BlockSpec(arr.shape, lambda i, nd=nd: (0,) * nd)


def _ln(x, g, b, eps=_EPS):
    mu = jnp.mean(x, axis=-1, keepdims=True)
    d = x - mu
    var = jnp.mean(d * d, axis=-1, keepdims=True)
    return d * jax.lax.rsqrt(var + eps) * g + b


def _bf16_dot(a, w):
    """f32/bf16 activation x bf16 weight -> f32 accumulation on the MXU."""
    return jnp.dot(a.astype(jnp.bfloat16), w.astype(jnp.bfloat16),
                   preferred_element_type=jnp.float32)


# ----------------------------------------------------------------------------
# Kernel: hypergraph adjacency mask  (H @ H^T > 0), computed once per forward
# ----------------------------------------------------------------------------
def _adjacency_kernel(h_ref, o_ref):
    h = h_ref[...]
    a = jax.lax.dot_general(h, h, (((1,), (1,)), ((), ())),
                            preferred_element_type=jnp.float32)
    o_ref[...] = (a > 0.0).astype(jnp.float32)


def pallas_adjacency(h):
    n = h.shape[0]
    return pl.pallas_call(
        _adjacency_kernel,
        out_shape=jax.ShapeDtypeStruct((n, n), jnp.float32),
        grid=(1,),
        in_specs=[_full_spec(h)],
        out_specs=pl.BlockSpec((n, n), lambda i: (0, 0)),
    )(h.astype(jnp.float32))


# ----------------------------------------------------------------------------
# Kernel: fused Fusion block
#   down = LayerNorm(Linear(x_down))   (levels 1..3; identity for level 0)
#   up   = Linear(x_up)                (levels 0..2 when not first)
#   out  = up + gamma * down           (gamma only for levels 1,2 when not first)
# ----------------------------------------------------------------------------
def _fusion_kernel(*refs, has_down, has_up, has_gamma):
    out_ref = refs[-1]
    refs = refs[:-1]
    i = 0
    xd = refs[i][...]
    i += 1
    if has_down:
        w, b = refs[i][...], refs[i + 1][...]
        g, beta = refs[i + 2][...], refs[i + 3][...]
        i += 4
        z = _bf16_dot(xd, w) + b
        z = _ln(z, g, beta)
    else:
        z = xd
    if has_up:
        xu = refs[i][...]
        uw, ub = refs[i + 1][...], refs[i + 2][...]
        i += 3
        up = _bf16_dot(xu, uw) + ub
        if has_gamma:
            gamma = refs[i][...]          # [1, 1] broadcast
            z = up + gamma * z
        else:
            z = up + z
    out_ref[...] = z


def pallas_fusion(fp, level, is_first, dims, x_down, x_up):
    has_down = level in (1, 2, 3)
    has_up = (not is_first) and (level != 3)
    has_gamma = (not is_first) and level in (1, 2)
    if not has_down and not has_up:
        return x_down                     # Identity fusion (level 0, first subnet)

    n = x_down.shape[0]
    dout = dims[level]
    arrays = [x_down.astype(jnp.float32)]
    if has_down:
        arrays += [fp["down_lin"]["w"], fp["down_lin"]["b"],
                   fp["down_ln"]["g"], fp["down_ln"]["b"]]
    if has_up:
        arrays += [x_up.astype(jnp.float32), fp["up_lin"]["w"], fp["up_lin"]["b"]]
        if has_gamma:
            arrays += [fp["gamma"]]

    return pl.pallas_call(
        functools.partial(_fusion_kernel, has_down=has_down, has_up=has_up,
                          has_gamma=has_gamma),
        out_shape=jax.ShapeDtypeStruct((n, dout), jnp.float32),
        grid=(1,),
        in_specs=[_full_spec(a) for a in arrays],
        out_specs=pl.BlockSpec((n, dout), lambda i: (0, 0)),
    )(*arrays)


# ----------------------------------------------------------------------------
# Kernel: fully fused AttBlock
#   x = x + gamma1 * Proj(MHSA(LN1(x), adj_mask))
#   x = x + gamma2 * FC2(GELU(FC1(LN2(x))))
# Heads are selected with lane masks so the [N, C] layout stays lane-dense.
# ----------------------------------------------------------------------------
def _attblock_kernel(x_ref, adj_ref, ln1g_ref, ln1b_ref, qkvw_ref, qkvb_ref,
                     projw_ref, projb_ref, g1_ref, ln2g_ref, ln2b_ref,
                     f1w_ref, f1b_ref, f2w_ref, f2b_ref, g2_ref, o_ref,
                     *, num_heads, scale):
    x = x_ref[...]                                        # [N, C] f32
    adj = adj_ref[...]                                    # [N, N] f32 mask
    n, c = x.shape
    dh = c // num_heads

    # --- attention branch (pre-LN) ---
    y = _ln(x, ln1g_ref[...], ln1b_ref[...])
    qkv = _bf16_dot(y, qkvw_ref[...]) + qkvb_ref[...]     # [N, 3C] f32
    q = qkv[:, 0 * c:1 * c]
    k = qkv[:, 1 * c:2 * c]
    v = qkv[:, 2 * c:3 * c]
    k_b = k.astype(jnp.bfloat16)
    v_b = v.astype(jnp.bfloat16)

    lane = jax.lax.broadcasted_iota(jnp.int32, (1, c), 1)
    attn = jnp.zeros((n, c), jnp.float32)
    for hh in range(num_heads):
        lo, hi = hh * dh, (hh + 1) * dh
        m = jnp.logical_and(lane >= lo, lane < hi)        # [1, C] head lane mask
        # masked q keeps only head-hh channels -> contraction == Q_h @ K_h^T
        qh = jnp.where(m, q, 0.0).astype(jnp.bfloat16)
        s = jax.lax.dot_general(qh, k_b, (((1,), (1,)), ((), ())),
                                preferred_element_type=jnp.float32) * scale
        s = jnp.where(adj > 0.0, s, jnp.float32(-1e30))
        s = s - jnp.max(s, axis=-1, keepdims=True)
        p = jnp.exp(s)
        p = p * pl.reciprocal(jnp.sum(p, axis=-1, keepdims=True), approx=True)
        # masked v places the head output in its own lane range of [N, C]
        vh = jnp.where(m, v_b, jnp.bfloat16(0.0))
        attn = attn + jnp.dot(p.astype(jnp.bfloat16), vh,
                              preferred_element_type=jnp.float32)

    attn = _bf16_dot(attn, projw_ref[...]) + projb_ref[...]
    x = x + g1_ref[...] * attn                            # layer-scale residual
    # TODO(synk): drop_path omitted (dp_rate defaults to 0.0 -> identity in eval).

    # --- MLP branch (pre-LN) ---
    y = _ln(x, ln2g_ref[...], ln2b_ref[...])
    hdn = _bf16_dot(y, f1w_ref[...]) + f1b_ref[...]
    # TODO(synk): PyTorch nn.GELU default is exact erf-GELU; tanh approximation used.
    hdn = jax.nn.gelu(hdn, approximate=True)
    hdn = _bf16_dot(hdn, f2w_ref[...]) + f2b_ref[...]
    o_ref[...] = x + g2_ref[...] * hdn                    # layer-scale residual


def pallas_att_block(x, adj, p, num_heads=4):
    n, c = x.shape
    dh = c // num_heads
    scale = 1.0 / math.sqrt(dh)
    arrays = [
        x.astype(jnp.float32), adj.astype(jnp.float32),
        p["ln1"]["g"], p["ln1"]["b"],
        p["qkv"]["w"], p["qkv"]["b"],
        p["proj"]["w"], p["proj"]["b"],
        p["gamma1"],
        p["ln2"]["g"], p["ln2"]["b"],
        p["fc1"]["w"], p["fc1"]["b"],
        p["fc2"]["w"], p["fc2"]["b"],
        p["gamma2"],
    ]
    return pl.pallas_call(
        functools.partial(_attblock_kernel, num_heads=num_heads, scale=scale),
        out_shape=jax.ShapeDtypeStruct((n, c), jnp.float32),
        grid=(1,),
        in_specs=[_full_spec(a) for a in arrays],
        out_specs=pl.BlockSpec((n, c), lambda i: (0, 0)),
    )(*arrays)


# ----------------------------------------------------------------------------
# Parameter initialization (deterministic, in-script).  MXU weights in bf16,
# biases / LN params / layer-scale gammas in f32.
# ----------------------------------------------------------------------------
class PInit:
    def __init__(self, seed=0):
        self.key = jax.random.PRNGKey(seed)
        self.count = 0

    def _next(self):
        self.count += 1
        return jax.random.fold_in(self.key, self.count)

    def trunc_normal(self, shape, std=0.02):
        return std * jax.random.truncated_normal(self._next(), -2.0, 2.0, shape,
                                                 jnp.float32)

    def zeros(self, shape):
        return jnp.zeros(shape, jnp.float32)

    def ones(self, shape):
        return jnp.ones(shape, jnp.float32)


def init_linear(pg, din, dout):
    return {"w": pg.trunc_normal((din, dout)).astype(jnp.bfloat16),
            "b": pg.zeros((1, dout))}


def init_ln(pg, d):
    return {"g": pg.ones((1, d)), "b": pg.zeros((1, d))}


def init_attblock(pg, dim, hidden, ls_init=1e-6):
    return {"ln1": init_ln(pg, dim),
            "qkv": init_linear(pg, dim, 3 * dim),
            "proj": init_linear(pg, dim, dim),
            "gamma1": jnp.full((1, dim), ls_init, jnp.float32),
            "ln2": init_ln(pg, dim),
            "fc1": init_linear(pg, dim, hidden),
            "fc2": init_linear(pg, hidden, dim),
            "gamma2": jnp.full((1, dim), ls_init, jnp.float32)}


def init_level(pg, level, dims, layers, is_first):
    fusion = {}
    if level in (1, 2, 3):
        fusion["down_lin"] = init_linear(pg, dims[level - 1], dims[level])
        fusion["down_ln"] = init_ln(pg, dims[level])
    if (not is_first) and level in (0, 1, 2):
        fusion["up_lin"] = init_linear(pg, dims[level + 1], dims[level])
    if (not is_first) and level in (1, 2):
        fusion["gamma"] = pg.ones((1, 1))
    return {"fusion": fusion,
            "blocks": [init_attblock(pg, dims[level], 4 * dims[level])
                       for _ in range(layers[level])]}


# ----------------------------------------------------------------------------
# Level forward (mirrors Level.forward(x_down, x_up, hg))
# ----------------------------------------------------------------------------
def level_forward(params, level, is_first, dims, x_down, x_up, hg_adj,
                  num_heads=4):
    x = pallas_fusion(params["fusion"], level, is_first, dims, x_down, x_up)
    for bp in params["blocks"]:
        x = pallas_att_block(x, hg_adj, bp, num_heads)
    return x


# ----------------------------------------------------------------------------
# Main
# ----------------------------------------------------------------------------
if __name__ == "__main__":
    N, E = 24, 8                        # hypergraph nodes / hyperedges
    dims = [32, 64, 96, 128]
    layers = [1, 1, 2, 1]
    level = 2
    is_first = False
    num_heads = 4

    key = jax.random.PRNGKey(0)
    kd, ku, kh = jax.random.split(key, 3)
    x_down = jax.random.normal(kd, (N, dims[level - 1]), jnp.float32)
    x_up = jax.random.normal(ku, (N, dims[level + 1]), jnp.float32)
    H = (jax.random.uniform(kh, (N, E)) < 0.3).astype(jnp.float32)
    # guarantee every node belongs to at least one hyperedge
    H = jnp.maximum(H, jax.nn.one_hot(jnp.arange(N) % E, E, dtype=jnp.float32))

    pg = PInit(0)
    params = init_level(pg, level, dims, layers, is_first)

    @jax.jit
    def fwd(params, x_down, x_up, H):
        adj = pallas_adjacency(H)        # (H @ H^T > 0) attention mask
        return level_forward(params, level, is_first, dims, x_down, x_up, adj,
                             num_heads)

    out = jax.block_until_ready(fwd(params, x_down, x_up, H))
    assert out.shape == (N, dims[level]), out.shape
    assert bool(jnp.all(jnp.isfinite(out)))
    print("KERNEL_OK")
</pallas_src>

<mosaic_0001>
module attributes {stable_mosaic.version = 11 : i64} {
  func.func @_fusion_kernel(%arg0: i32, %arg1: memref<24x64xf32, #tpu.memory_space<vmem>>, %arg2: memref<64x96xbf16, #tpu.memory_space<vmem>>, %arg3: memref<1x96xf32, #tpu.memory_space<vmem>>, %arg4: memref<1x96xf32, #tpu.memory_space<vmem>>, %arg5: memref<1x96xf32, #tpu.memory_space<vmem>>, %arg6: memref<24x128xf32, #tpu.memory_space<vmem>>, %arg7: memref<128x96xbf16, #tpu.memory_space<vmem>>, %arg8: memref<1x96xf32, #tpu.memory_space<vmem>>, %arg9: memref<1x1xf32, #tpu.memory_space<vmem>>, %arg10: memref<24x96xf32, #tpu.memory_space<vmem>>) attributes {dimension_semantics = [#tpu.dimension_semantics<arbitrary>], iteration_bounds = array<i64: 1>, scalar_prefetch = 0 : i64, scratch_operands = 0 : i64, tpu.core_type = #tpu.core_type<tc>, window_params = [{pipeline_mode = #tpu.pipeline_mode<synchronous>, transform_indices = @transform_0, window_bounds = array<i64: 24, 64>}, {pipeline_mode = #tpu.pipeline_mode<synchronous>, transform_indices = @transform_1, window_bounds = array<i64: 64, 96>}, {pipeline_mode = #tpu.pipeline_mode<synchronous>, transform_indices = @transform_2, window_bounds = array<i64: 1, 96>}, {pipeline_mode = #tpu.pipeline_mode<synchronous>, transform_indices = @transform_3, window_bounds = array<i64: 1, 96>}, {pipeline_mode = #tpu.pipeline_mode<synchronous>, transform_indices = @transform_4, window_bounds = array<i64: 1, 96>}, {pipeline_mode = #tpu.pipeline_mode<synchronous>, transform_indices = @transform_5, window_bounds = array<i64: 24, 128>}, {pipeline_mode = #tpu.pipeline_mode<synchronous>, transform_indices = @transform_6, window_bounds = array<i64: 128, 96>}, {pipeline_mode = #tpu.pipeline_mode<synchronous>, transform_indices = @transform_7, window_bounds = array<i64: 1, 96>}, {pipeline_mode = #tpu.pipeline_mode<synchronous>, transform_indices = @transform_8, window_bounds = array<i64: 1, 1>}, {pipeline_mode = #tpu.pipeline_mode<synchronous>, transform_indices = @transform_9, window_bounds = array<i64: 24, 96>}]} {
    %c0 = arith.constant 0 : index
    %c0_0 = arith.constant 0 : index
    %0 = vector.load %arg1[%c0, %c0_0] : memref<24x64xf32, #tpu.memory_space<vmem>>, vector<24x64xf32>
    %c0_1 = arith.constant 0 : index
    %c0_2 = arith.constant 0 : index
    %1 = vector.load %arg2[%c0_1, %c0_2] : memref<64x96xbf16, #tpu.memory_space<vmem>>, vector<64x96xbf16>
    %c0_3 = arith.constant 0 : index
    %c0_4 = arith.constant 0 : index
    %2 = vector.load %arg3[%c0_3, %c0_4] : memref<1x96xf32, #tpu.memory_space<vmem>>, vector<1x96xf32>
    %c0_5 = arith.constant 0 : index
    %c0_6 = arith.constant 0 : index
    %3 = vector.load %arg4[%c0_5, %c0_6] : memref<1x96xf32, #tpu.memory_space<vmem>>, vector<1x96xf32>
    %c0_7 = arith.constant 0 : index
    %c0_8 = arith.constant 0 : index
    %4 = vector.load %arg5[%c0_7, %c0_8] : memref<1x96xf32, #tpu.memory_space<vmem>>, vector<1x96xf32>
    %5 = arith.truncf %0 : vector<24x64xf32> to vector<24x64xbf16>
    %cst = arith.constant dense<0.000000e+00> : vector<24x96xf32>
    %6 = tpu.matmul %5, %1, %cst {dimension_numbers = #tpu.dot_dimension_numbers<[1], [0], [0], [1], [0, 0, 1, 1], [], []>} : vector<24x64xbf16>, vector<64x96xbf16>, vector<24x96xf32> -> vector<24x96xf32>
    %7 = vector.broadcast %2 : vector<1x96xf32> to vector<24x96xf32>
    %8 = arith.addf %6, %7 : vector<24x96xf32>
    %cst_9 = arith.constant dense<0.000000e+00> : vector<24xf32>
    %9 = vector.multi_reduction <add>, %8, %cst_9 [1] : vector<24x96xf32> to vector<24xf32>
    %10 = vector.shape_cast %9 : vector<24xf32> to vector<24x1xf32>
    %cst_10 = arith.constant 9.600000e+01 : f32
    %11 = vector.broadcast %cst_10 : f32 to vector<24x1xf32>
    %12 = arith.divf %10, %11 : vector<24x1xf32>
    %13 = vector.broadcast %12 : vector<24x1xf32> to vector<24x96xf32>
    %14 = arith.subf %8, %13 : vector<24x96xf32>
    %15 = arith.mulf %14, %14 : vector<24x96xf32>
    %cst_11 = arith.constant dense<0.000000e+00> : vector<24xf32>
    %16 = vector.multi_reduction <add>, %15, %cst_11 [1] : vector<24x96xf32> to vector<24xf32>
    %17 = vector.shape_cast %16 : vector<24xf32> to vector<24x1xf32>
    %cst_12 = arith.constant 9.600000e+01 : f32
    %18 = vector.broadcast %cst_12 : f32 to vector<24x1xf32>
    %19 = arith.divf %17, %18 : vector<24x1xf32>
    %cst_13 = arith.constant 9.99999997E-7 : f32
    %20 = vector.broadcast %cst_13 : f32 to vector<24x1xf32>
    %21 = arith.addf %19, %20 : vector<24x1xf32>
    %22 = math.rsqrt %21 : vector<24x1xf32>
    %23 = vector.broadcast %22 : vector<24x1xf32> to vector<24x96xf32>
    %24 = arith.mulf %14, %23 : vector<24x96xf32>
    %25 = vector.broadcast %3 : vector<1x96xf32> to vector<24x96xf32>
    %26 = arith.mulf %24, %25 : vector<24x96xf32>
    %27 = vector.broadcast %4 : vector<1x96xf32> to vector<24x96xf32>
    %28 = arith.addf %26, %27 : vector<24x96xf32>
    %c0_14 = arith.constant 0 : index
    %c0_15 = arith.constant 0 : index
    %29 = vector.load %arg6[%c0_14, %c0_15] : memref<24x128xf32, #tpu.memory_space<vmem>>, vector<24x128xf32>
    %c0_16 = arith.constant 0 : index
    %c0_17 = arith.constant 0 : index
    %30 = vector.load %arg7[%c0_16, %c0_17] : memref<128x96xbf16, #tpu.memory_space<vmem>>, vector<128x96xbf16>
    %c0_18 = arith.constant 0 : index
    %c0_19 = arith.constant 0 : index
    %31 = vector.load %arg8[%c0_18, %c0_19] : memref<1x96xf32, #tpu.memory_space<vmem>>, vector<1x96xf32>
    %32 = arith.truncf %29 : vector<24x128xf32> to vector<24x128xbf16>
    %cst_20 = arith.constant dense<0.000000e+00> : vector<24x96xf32>
    %33 = tpu.matmul %32, %30, %cst_20 {dimension_numbers = #tpu.dot_dimension_numbers<[1], [0], [0], [1], [0, 0, 1, 1], [], []>} : vector<24x128xbf16>, vector<128x96xbf16>, vector<24x96xf32> -> vector<24x96xf32>
    %34 = vector.broadcast %31 : vector<1x96xf32> to vector<24x96xf32>
    %35 = arith.addf %33, %34 : vector<24x96xf32>
    %c0_21 = arith.constant 0 : index
    %c0_22 = arith.constant 0 : index
    %36 = vector.load %arg9[%c0_21, %c0_22] : memref<1x1xf32, #tpu.memory_space<vmem>>, vector<1x1xf32>
    %37 = vector.broadcast %36 : vector<1x1xf32> to vector<24x96xf32>
    %38 = arith.mulf %37, %28 : vector<24x96xf32>
    %39 = arith.addf %35, %38 : vector<24x96xf32>
    %c0_23 = arith.constant 0 : index
    %c0_24 = arith.constant 0 : index
    %40 = vector.load %arg10[%c0_23, %c0_24] : memref<24x96xf32, #tpu.memory_space<vmem>>, vector<24x96xf32>
    tpu.vector_store %arg10[%c0_23, %c0_24], %39 {strides = array<i32>} : memref<24x96xf32, #tpu.memory_space<vmem>>, vector<24x96xf32>,
    return
  }
  func.func @transform_0(%arg0: i32) -> (i32, i32) {
    %c0_i32 = arith.constant 0 : i32
    %c0_i32_0 = arith.constant 0 : i32
    %c0_i32_1 = arith.constant 0 : i32
    return %c0_i32, %c0_i32_0 : i32, i32
  }
  func.func @transform_1(%arg0: i32) -> (i32, i32) {
    %c0_i32 = arith.constant 0 : i32
    %c0_i32_0 = arith.constant 0 : i32
    %c0_i32_1 = arith.constant 0 : i32
    return %c0_i32, %c0_i32_0 : i32, i32
  }
  func.func @transform_2(%arg0: i32) -> (i32, i32) {
    %c0_i32 = arith.constant 0 : i32
    %c0_i32_0 = arith.constant 0 : i32
    %c0_i32_1 = arith.constant 0 : i32
    return %c0_i32, %c0_i32_0 : i32, i32
  }
  func.func @transform_3(%arg0: i32) -> (i32, i32) {
    %c0_i32 = arith.constant 0 : i32
    %c0_i32_0 = arith.constant 0 : i32
    %c0_i32_1 = arith.constant 0 : i32
    return %c0_i32, %c0_i32_0 : i32, i32
  }
  func.func @transform_4(%arg0: i32) -> (i32, i32) {
    %c0_i32 = arith.constant 0 : i32
    %c0_i32_0 = arith.constant 0 : i32
    %c0_i32_1 = arith.constant 0 : i32
    return %c0_i32, %c0_i32_0 : i32, i32
  }
  func.func @transform_5(%arg0: i32) -> (i32, i32) {
    %c0_i32 = arith.constant 0 : i32
    %c0_i32_0 = arith.constant 0 : i32
    %c0_i32_1 = arith.constant 0 : i32
    return %c0_i32, %c0_i32_0 : i32, i32
  }
  func.func @transform_6(%arg0: i32) -> (i32, i32) {
    %c0_i32 = arith.constant 0 : i32
    %c0_i32_0 = arith.constant 0 : i32
    %c0_i32_1 = arith.constant 0 : i32
    return %c0_i32, %c0_i32_0 : i32, i32
  }
  func.func @transform_7(%arg0: i32) -> (i32, i32) {
    %c0_i32 = arith.constant 0 : i32
    %c0_i32_0 = arith.constant 0 : i32
    %c0_i32_1 = arith.constant 0 : i32
    return %c0_i32, %c0_i32_0 : i32, i32
  }
  func.func @transform_8(%arg0: i32) -> (i32, i32) {
    %c0_i32 = arith.constant 0 : i32
    %c0_i32_0 = arith.constant 0 : i32
    %c0_i32_1 = arith.constant 0 : i32
    return %c0_i32, %c0_i32_0 : i32, i32
  }
  func.func @transform_9(%arg0: i32) -> (i32, i32) {
    %c0_i32 = arith.constant 0 : i32
    %c0_i32_0 = arith.constant 0 : i32
    %c0_i32_1 = arith.constant 0 : i32
    return %c0_i32, %c0_i32_0 : i32, i32
  }
}

module attributes {stable_mosaic.version = 11 : i64} {
  func.func @_adjacency_kernel(%arg0: i32, %arg1: memref<24x8xf32, #tpu.memory_space<vmem>>, %arg2: memref<24x24xf32, #tpu.memory_space<vmem>>) attributes {dimension_semantics = [#tpu.dimension_semantics<arbitrary>], iteration_bounds = array<i64: 1>, scalar_prefetch = 0 : i64, scratch_operands = 0 : i64, tpu.core_type = #tpu.core_type<tc>, window_params = [{pipeline_mode = #tpu.pipeline_mode<synchronous>, transform_indices = @transform_0, window_bounds = array<i64: 24, 8>}, {pipeline_mode = #tpu.pipeline_mode<synchronous>, transform_indices = @transform_1, window_bounds = array<i64: 24, 24>}]} {
    %c0 = arith.constant 0 : index
    %c0_0 = arith.constant 0 : index
    %0 = vector.load %arg1[%c0, %c0_0] : memref<24x8xf32, #tpu.memory_space<vmem>>, vector<24x8xf32>
    %cst = arith.constant dense<0.000000e+00> : vector<24x24xf32>
    %1 = tpu.matmul %0, %0, %cst {dimension_numbers = #tpu.dot_dimension_numbers<[1], [1], [0], [0], [0, 0, 1, 0], [], []>} : vector<24x8xf32>, vector<24x8xf32>, vector<24x24xf32> -> vector<24x24xf32>
    %cst_1 = arith.constant 0.000000e+00 : f32
    %2 = vector.broadcast %cst_1 : f32 to vector<24x24xf32>
    %3 = arith.cmpf ogt, %1, %2 : vector<24x24xf32>
    %4 = arith.extui %3 : vector<24x24xi1> to vector<24x24xi32>
    %5 = arith.sitofp %4 : vector<24x24xi32> to vector<24x24xf32>
    %c0_2 = arith.constant 0 : index
    %c0_3 = arith.constant 0 : index
    %6 = vector.load %arg2[%c0_2, %c0_3] : memref<24x24xf32, #tpu.memory_space<vmem>>, vector<24x24xf32>
    tpu.vector_store %arg2[%c0_2, %c0_3], %5 {strides = array<i32>} : memref<24x24xf32, #tpu.memory_space<vmem>>, vector<24x24xf32>,
    return
  }
  func.func @transform_0(%arg0: i32) -> (i32, i32) {
    %c0_i32 = arith.constant 0 : i32
    %c0_i32_0 = arith.constant 0 : i32
    %c0_i32_1 = arith.constant 0 : i32
    return %c0_i32, %c0_i32_0 : i32, i32
  }
  func.func @transform_1(%arg0: i32) -> (i32, i32) {
    %c0_i32 = arith.constant 0 : i32
    %c0_i32_0 = arith.constant 0 : i32
    %c0_i32_1 = arith.constant 0 : i32
    return %c0_i32, %c0_i32_0 : i32, i32
  }
}

module attributes {stable_mosaic.version = 11 : i64} {
  func.func @_attblock_kernel(%arg0: i32, %arg1: memref<24x96xf32, #tpu.memory_space<vmem>>, %arg2: memref<24x24xf32, #tpu.memory_space<vmem>>, %arg3: memref<1x96xf32, #tpu.memory_space<vmem>>, %arg4: memref<1x96xf32, #tpu.memory_space<vmem>>, %arg5: memref<96x288xbf16, #tpu.memory_space<vmem>>, %arg6: memref<1x288xf32, #tpu.memory_space<vmem>>, %arg7: memref<96x96xbf16, #tpu.memory_space<vmem>>, %arg8: memref<1x96xf32, #tpu.memory_space<vmem>>, %arg9: memref<1x96xf32, #tpu.memory_space<vmem>>, %arg10: memref<1x96xf32, #tpu.memory_space<vmem>>, %arg11: memref<1x96xf32, #tpu.memory_space<vmem>>, %arg12: memref<96x384xbf16, #tpu.memory_space<vmem>>, %arg13: memref<1x384xf32, #tpu.memory_space<vmem>>, %arg14: memref<384x96xbf16, #tpu.memory_space<vmem>>, %arg15: memref<1x96xf32, #tpu.memory_space<vmem>>, %arg16: memref<1x96xf32, #tpu.memory_space<vmem>>, %arg17: memref<24x96xf32, #tpu.memory_space<vmem>>) attributes {dimension_semantics = [#tpu.dimension_semantics<arbitrary>], iteration_bounds = array<i64: 1>, scalar_prefetch = 0 : i64, scratch_operands = 0 : i64, tpu.core_type = #tpu.core_type<tc>, window_params = [{pipeline_mode = #tpu.pipeline_mode<synchronous>, transform_indices = @transform_0, window_bounds = array<i64: 24, 96>}, {pipeline_mode = #tpu.pipeline_mode<synchronous>, transform_indices = @transform_1, window_bounds = array<i64: 24, 24>}, {pipeline_mode = #tpu.pipeline_mode<synchronous>, transform_indices = @transform_2, window_bounds = array<i64: 1, 96>}, {pipeline_mode = #tpu.pipeline_mode<synchronous>, transform_indices = @transform_3, window_bounds = array<i64: 1, 96>}, {pipeline_mode = #tpu.pipeline_mode<synchronous>, transform_indices = @transform_4, window_bounds = array<i64: 96, 288>}, {pipeline_mode = #tpu.pipeline_mode<synchronous>, transform_indices = @transform_5, window_bounds = array<i64: 1, 288>}, {pipeline_mode = #tpu.pipeline_mode<synchronous>, transform_indices = @transform_6, window_bounds = array<i64: 96, 96>}, {pipeline_mode = #tpu.pipeline_mode<synchronous>, transform_indices = @transform_7, window_bounds = array<i64: 1, 96>}, {pipeline_mode = #tpu.pipeline_mode<synchronous>, transform_indices = @transform_8, window_bounds = array<i64: 1, 96>}, {pipeline_mode = #tpu.pipeline_mode<synchronous>, transform_indices = @transform_9, window_bounds = array<i64: 1, 96>}, {pipeline_mode = #tpu.pipeline_mode<synchronous>, transform_indices = @transform_10, window_bounds = array<i64: 1, 96>}, {pipeline_mode = #tpu.pipeline_mode<synchronous>, transform_indices = @transform_11, window_bounds = array<i64: 96, 384>}, {pipeline_mode = #tpu.pipeline_mode<synchronous>, transform_indices = @transform_12, window_bounds = array<i64: 1, 384>}, {pipeline_mode = #tpu.pipeline_mode<synchronous>, transform_indices = @transform_13, window_bounds = array<i64: 384, 96>}, {pipeline_mode = #tpu.pipeline_mode<synchronous>, transform_indices = @transform_14, window_bounds = array<i64: 1, 96>}, {pipeline_mode = #tpu.pipeline_mode<synchronous>, transform_indices = @transform_15, window_bounds = array<i64: 1, 96>}, {pipeline_mode = #tpu.pipeline_mode<synchronous>, transform_indices = @transform_16, window_bounds = array<i64: 24, 96>}]} {
    %c0 = arith.constant 0 : index
    %c0_0 = arith.constant 0 : index
    %0 = vector.load %arg1[%c0, %c0_0] : memref<24x96xf32, #tpu.memory_space<vmem>>, vector<24x96xf32>
    %c0_1 = arith.constant 0 : index
    %c0_2 = arith.constant 0 : index
    %1 = vector.load %arg2[%c0_1, %c0_2] : memref<24x24xf32, #tpu.memory_space<vmem>>, vector<24x24xf32>
    %c0_3 = arith.constant 0 : index
    %c0_4 = arith.constant 0 : index
    %2 = vector.load %arg3[%c0_3, %c0_4] : memref<1x96xf32, #tpu.memory_space<vmem>>, vector<1x96xf32>
    %c0_5 = arith.constant 0 : index
    %c0_6 = arith.constant 0 : index
    %3 = vector.load %arg4[%c0_5, %c0_6] : memref<1x96xf32, #tpu.memory_space<vmem>>, vector<1x96xf32>
    %cst = arith.constant dense<0.000000e+00> : vector<24xf32>
    %4 = vector.multi_reduction <add>, %0, %cst [1] : vector<24x96xf32> to vector<24xf32>
    %5 = vector.shape_cast %4 : vector<24xf32> to vector<24x1xf32>
    %cst_7 = arith.constant 9.600000e+01 : f32
    %6 = vector.broadcast %cst_7 : f32 to vector<24x1xf32>
    %7 = arith.divf %5, %6 : vector<24x1xf32>
    %8 = vector.broadcast %7 : vector<24x1xf32> to vector<24x96xf32>
    %9 = arith.subf %0, %8 : vector<24x96xf32>
    %10 = arith.mulf %9, %9 : vector<24x96xf32>
    %cst_8 = arith.constant dense<0.000000e+00> : vector<24xf32>
    %11 = vector.multi_reduction <add>, %10, %cst_8 [1] : vector<24x96xf32> to vector<24xf32>
    %12 = vector.shape_cast %11 : vector<24xf32> to vector<24x1xf32>
    %cst_9 = arith.constant 9.600000e+01 : f32
    %13 = vector.broadcast %cst_9 : f32 to vector<24x1xf32>
    %14 = arith.divf %12, %13 : vector<24x1xf32>
    %cst_10 = arith.constant 9.99999997E-7 : f32
    %15 = vector.broadcast %cst_10 : f32 to vector<24x1xf32>
    %16 = arith.addf %14, %15 : vector<24x1xf32>
    %17 = math.rsqrt %16 : vector<24x1xf32>
    %18 = vector.broadcast %17 : vector<24x1xf32> to vector<24x96xf32>
    %19 = arith.mulf %9, %18 : vector<24x96xf32>
    %20 = vector.broadcast %2 : vector<1x96xf32> to vector<24x96xf32>
    %21 = arith.mulf %19, %20 : vector<24x96xf32>
    %22 = vector.broadcast %3 : vector<1x96xf32> to vector<24x96xf32>
    %23 = arith.addf %21, %22 : vector<24x96xf32>
    %c0_11 = arith.constant 0 : index
    %c0_12 = arith.constant 0 : index
    %24 = vector.load %arg5[%c0_11, %c0_12] : memref<96x288xbf16, #tpu.memory_space<vmem>>, vector<96x288xbf16>
    %25 = arith.truncf %23 : vector<24x96xf32> to vector<24x96xbf16>
    %cst_13 = arith.constant dense<0.000000e+00> : vector<24x288xf32>
    %26 = tpu.matmul %25, %24, %cst_13 {dimension_numbers = #tpu.dot_dimension_numbers<[1], [0], [0], [1], [0, 0, 1, 1], [], []>} : vector<24x96xbf16>, vector<96x288xbf16>, vector<24x288xf32> -> vector<24x288xf32>
    %c0_14 = arith.constant 0 : index
    %c0_15 = arith.constant 0 : index
    %27 = vector.load %arg6[%c0_14, %c0_15] : memref<1x288xf32, #tpu.memory_space<vmem>>, vector<1x288xf32>
    %28 = vector.broadcast %27 : vector<1x288xf32> to vector<24x288xf32>
    %29 = arith.addf %26, %28 : vector<24x288xf32>
    %30 = vector.extract_strided_slice %29 {offsets = [0, 0], sizes = [24, 96], strides = [1, 1]} : vector<24x288xf32> to vector<24x96xf32>
    %31 = vector.extract_strided_slice %29 {offsets = [0, 96], sizes = [24, 96], strides = [1, 1]} : vector<24x288xf32> to vector<24x96xf32>
    %32 = vector.extract_strided_slice %29 {offsets = [0, 192], sizes = [24, 96], strides = [1, 1]} : vector<24x288xf32> to vector<24x96xf32>
    %33 = arith.truncf %31 : vector<24x96xf32> to vector<24x96xbf16>
    %34 = arith.truncf %32 : vector<24x96xf32> to vector<24x96xbf16>
    %35 = tpu.iota {dimensions = array<i32: 1>} : vector<1x96xi32>
    %cst_16 = arith.constant 0.000000e+00 : f32
    %36 = vector.broadcast %cst_16 : f32 to vector<24x96xf32>
    %c0_i32 = arith.constant 0 : i32
    %37 = vector.broadcast %c0_i32 : i32 to vector<1x96xi32>
    %38 = arith.cmpi sge, %35, %37 : vector<1x96xi32>
    %c24_i32 = arith.constant 24 : i32
    %39 = vector.broadcast %c24_i32 : i32 to vector<1x96xi32>
    %40 = arith.cmpi slt, %35, %39 : vector<1x96xi32>
    %41 = arith.andi %38, %40 : vector<1x96xi1>
    %cst_17 = arith.constant 0.000000e+00 : f32
    %42 = vector.shape_cast %41 : vector<1x96xi1> to vector<1x96xi1>
    %43 = vector.broadcast %42 : vector<1x96xi1> to vector<24x96xi1>
    %44 = vector.broadcast %cst_17 : f32 to vector<24x96xf32>
    %45 = arith.select %43, %30, %44 : vector<24x96xi1>, vector<24x96xf32>
    %46 = arith.truncf %45 : vector<24x96xf32> to vector<24x96xbf16>
    %cst_18 = arith.constant dense<0.000000e+00> : vector<24x24xf32>
    %47 = tpu.matmul %46, %33, %cst_18 {dimension_numbers = #tpu.dot_dimension_numbers<[1], [1], [0], [0], [0, 0, 1, 0], [], []>} : vector<24x96xbf16>, vector<24x96xbf16>, vector<24x24xf32> -> vector<24x24xf32>
    %cst_19 = arith.constant 0.204124153 : f32
    %48 = vector.broadcast %cst_19 : f32 to vector<24x24xf32>
    %49 = arith.mulf %47, %48 : vector<24x24xf32>
    %cst_20 = arith.constant 0.000000e+00 : f32
    %50 = vector.broadcast %cst_20 : f32 to vector<24x24xf32>
    %51 = arith.cmpf ogt, %1, %50 : vector<24x24xf32>
    %cst_21 = arith.constant -1.000000e+30 : f32
    %52 = vector.broadcast %cst_21 : f32 to vector<24x24xf32>
    %53 = arith.select %51, %49, %52 : vector<24x24xi1>, vector<24x24xf32>
    %cst_22 = arith.constant dense<0xFF800000> : vector<24xf32>
    %54 = vector.multi_reduction <maximumf>, %53, %cst_22 [1] : vector<24x24xf32> to vector<24xf32>
    %55 = vector.shape_cast %54 : vector<24xf32> to vector<24x1xf32>
    %56 = vector.broadcast %55 : vector<24x1xf32> to vector<24x24xf32>
    %57 = arith.subf %53, %56 : vector<24x24xf32>
    %58 = math.exp %57 : vector<24x24xf32>
    %cst_23 = arith.constant dense<0.000000e+00> : vector<24xf32>
    %59 = vector.multi_reduction <add>, %58, %cst_23 [1] : vector<24x24xf32> to vector<24xf32>
    %60 = vector.shape_cast %59 : vector<24xf32> to vector<24x1xf32>
    %61 = tpu.reciprocal %60 {approx = true} : vector<24x1xf32> -> vector<24x1xf32>
    %62 = vector.broadcast %61 : vector<24x1xf32> to vector<24x24xf32>
    %63 = arith.mulf %58, %62 : vector<24x24xf32>
    %cst_24 = arith.constant 0.000000e+00 : bf16
    %64 = vector.shape_cast %41 : vector<1x96xi1> to vector<1x96xi1>
    %65 = vector.broadcast %64 : vector<1x96xi1> to vector<24x96xi1>
    %66 = vector.broadcast %cst_24 : bf16 to vector<24x96xbf16>
    %67 = arith.select %65, %34, %66 : vector<24x96xi1>, vector<24x96xbf16>
    %68 = arith.truncf %63 : vector<24x24xf32> to vector<24x24xbf16>
    %cst_25 = arith.constant dense<0.000000e+00> : vector<24x96xf32>
    %69 = tpu.matmul %68, %67, %cst_25 {dimension_numbers = #tpu.dot_dimension_numbers<[1], [0], [0], [1], [0, 0, 1, 1], [], []>} : vector<24x24xbf16>, vector<24x96xbf16>, vector<24x96xf32> -> vector<24x96xf32>
    %70 = arith.addf %36, %69 : vector<24x96xf32>
    %c24_i32_26 = arith.constant 24 : i32
    %71 = vector.broadcast %c24_i32_26 : i32 to vector<1x96xi32>
    %72 = arith.cmpi sge, %35, %71 : vector<1x96xi32>
    %c48_i32 = arith.constant 48 : i32
    %73 = vector.broadcast %c48_i32 : i32 to vector<1x96xi32>
    %74 = arith.cmpi slt, %35, %73 : vector<1x96xi32>
    %75 = arith.andi %72, %74 : vector<1x96xi1>
    %cst_27 = arith.constant 0.000000e+00 : f32
    %76 = vector.shape_cast %75 : vector<1x96xi1> to vector<1x96xi1>
    %77 = vector.broadcast %76 : vector<1x96xi1> to vector<24x96xi1>
    %78 = vector.broadcast %cst_27 : f32 to vector<24x96xf32>
    %79 = arith.select %77, %30, %78 : vector<24x96xi1>, vector<24x96xf32>
    %80 = arith.truncf %79 : vector<24x96xf32> to vector<24x96xbf16>
    %cst_28 = arith.constant dense<0.000000e+00> : vector<24x24xf32>
    %81 = tpu.matmul %80, %33, %cst_28 {dimension_numbers = #tpu.dot_dimension_numbers<[1], [1], [0], [0], [0, 0, 1, 0], [], []>} : vector<24x96xbf16>, vector<24x96xbf16>, vector<24x24xf32> -> vector<24x24xf32>
    %cst_29 = arith.constant 0.204124153 : f32
    %82 = vector.broadcast %cst_29 : f32 to vector<24x24xf32>
    %83 = arith.mulf %81, %82 : vector<24x24xf32>
    %cst_30 = arith.constant 0.000000e+00 : f32
    %84 = vector.broadcast %cst_30 : f32 to vector<24x24xf32>
    %85 = arith.cmpf ogt, %1, %84 : vector<24x24xf32>
    %cst_31 = arith.constant -1.000000e+30 : f32
    %86 = vector.broadcast %cst_31 : f32 to vector<24x24xf32>
    %87 = arith.select %85, %83, %86 : vector<24x24xi1>, vector<24x24xf32>
    %cst_32 = arith.constant dense<0xFF800000> : vector<24xf32>
    %88 = vector.multi_reduction <maximumf>, %87, %cst_32 [1] : vector<24x24xf32> to vector<24xf32>
    %89 = vector.shape_cast %88 : vector<24xf32> to vector<24x1xf32>
    %90 = vector.broadcast %89 : vector<24x1xf32> to vector<24x24xf32>
    %91 = arith.subf %87, %90 : vector<24x24xf32>
    %92 = math.exp %91 : vector<24x24xf32>
    %cst_33 = arith.constant dense<0.000000e+00> : vector<24xf32>
    %93 = vector.multi_reduction <add>, %92, %cst_33 [1] : vector<24x24xf32> to vector<24xf32>
    %94 = vector.shape_cast %93 : vector<24xf32> to vector<24x1xf32>
    %95 = tpu.reciprocal %94 {approx = true} : vector<24x1xf32> -> vector<24x1xf32>
    %96 = vector.broadcast %95 : vector<24x1xf32> to vector<24x24xf32>
    %97 = arith.mulf %92, %96 : vector<24x24xf32>
    %cst_34 = arith.constant 0.000000e+00 : bf16
    %98 = vector.shape_cast %75 : vector<1x96xi1> to vector<1x96xi1>
    %99 = vector.broadcast %98 : vector<1x96xi1> to vector<24x96xi1>
    %100 = vector.broadcast %cst_34 : bf16 to vector<24x96xbf16>
    %101 = arith.select %99, %34, %100 : vector<24x96xi1>, vector<24x96xbf16>
    %102 = arith.truncf %97 : vector<24x24xf32> to vector<24x24xbf16>
    %cst_35 = arith.constant dense<0.000000e+00> : vector<24x96xf32>
    %103 = tpu.matmul %102, %101, %cst_35 {dimension_numbers = #tpu.dot_dimension_numbers<[1], [0], [0], [1], [0, 0, 1, 1], [], []>} : vector<24x24xbf16>, vector<24x96xbf16>, vector<24x96xf32> -> vector<24x96xf32>
    %104 = arith.addf %70, %103 : vector<24x96xf32>
    %c48_i32_36 = arith.constant 48 : i32
    %105 = vector.broadcast %c48_i32_36 : i32 to vector<1x96xi32>
    %106 = arith.cmpi sge, %35, %105 : vector<1x96xi32>
    %c72_i32 = arith.constant 72 : i32
    %107 = vector.broadcast %c72_i32 : i32 to vector<1x96xi32>
    %108 = arith.cmpi slt, %35, %107 : vector<1x96xi32>
    %109 = arith.andi %106, %108 : vector<1x96xi1>
    %cst_37 = arith.constant 0.000000e+00 : f32
    %110 = vector.shape_cast %109 : vector<1x96xi1> to vector<1x96xi1>
    %111 = vector.broadcast %110 : vector<1x96xi1> to vector<24x96xi1>
    %112 = vector.broadcast %cst_37 : f32 to vector<24x96xf32>
    %113 = arith.select %111, %30, %112 : vector<24x96xi1>, vector<24x96xf32>
    %114 = arith.truncf %113 : vector<24x96xf32> to vector<24x96xbf16>
    %cst_38 = arith.constant dense<0.000000e+00> : vector<24x24xf32>
    %115 = tpu.matmul %114, %33, %cst_38 {dimension_numbers = #tpu.dot_dimension_numbers<[1], [1], [0], [0], [0, 0, 1, 0], [], []>} : vector<24x96xbf16>, vector<24x96xbf16>, vector<24x24xf32> -> vector<24x24xf32>
    %cst_39 = arith.constant 0.204124153 : f32
    %116 = vector.broadcast %cst_39 : f32 to vector<24x24xf32>
    %117 = arith.mulf %115, %116 : vector<24x24xf32>
    %cst_40 = arith.constant 0.000000e+00 : f32
    %118 = vector.broadcast %cst_40 : f32 to vector<24x24xf32>
    %119 = arith.cmpf ogt, %1, %118 : vector<24x24xf32>
    %cst_41 = arith.constant -1.000000e+30 : f32
    %120 = vector.broadcast %cst_41 : f32 to vector<24x24xf32>
    %121 = arith.select %119, %117, %120 : vector<24x24xi1>, vector<24x24xf32>
    %cst_42 = arith.constant dense<0xFF800000> : vector<24xf32>
    %122 = vector.multi_reduction <maximumf>, %121, %cst_42 [1] : vector<24x24xf32> to vector<24xf32>
    %123 = vector.shape_cast %122 : vector<24xf32> to vector<24x1xf32>
    %124 = vector.broadcast %123 : vector<24x1xf32> to vector<24x24xf32>
    %125 = arith.subf %121, %124 : vector<24x24xf32>
    %126 = math.exp %125 : vector<24x24xf32>
    %cst_43 = arith.constant dense<0.000000e+00> : vector<24xf32>
    %127 = vector.multi_reduction <add>, %126, %cst_43 [1] : vector<24x24xf32> to vector<24xf32>
    %128 = vector.shape_cast %127 : vector<24xf32> to vector<24x1xf32>
    %129 = tpu.reciprocal %128 {approx = true} : vector<24x1xf32> -> vector<24x1xf32>
    %130 = vector.broadcast %129 : vector<24x1xf32> to vector<24x24xf32>
    %131 = arith.mulf %126, %130 : vector<24x24xf32>
    %cst_44 = arith.constant 0.000000e+00 : bf16
    %132 = vector.shape_cast %109 : vector<1x96xi1> to vector<1x96xi1>
    %133 = vector.broadcast %132 : vector<1x96xi1> to vector<24x96xi1>
    %134 = vector.broadcast %cst_44 : bf16 to vector<24x96xbf16>
    %135 = arith.select %133, %34, %134 : vector<24x96xi1>, vector<24x96xbf16>
    %136 = arith.truncf %131 : vector<24x24xf32> to vector<24x24xbf16>
    %cst_45 = arith.constant dense<0.000000e+00> : vector<24x96xf32>
    %137 = tpu.matmul %136, %135, %cst_45 {dimension_numbers = #tpu.dot_dimension_numbers<[1], [0], [0], [1], [0, 0, 1, 1], [], []>} : vector<24x24xbf16>, vector<24x96xbf16>, vector<24x96xf32> -> vector<24x96xf32>
    %138 = arith.addf %104, %137 : vector<24x96xf32>
    %c72_i32_46 = arith.constant 72 : i32
    %139 = vector.broadcast %c72_i32_46 : i32 to vector<1x96xi32>
    %140 = arith.cmpi sge, %35, %139 : vector<1x96xi32>
    %c96_i32 = arith.constant 96 : i32
    %141 = vector.broadcast %c96_i32 : i32 to vector<1x96xi32>
    %142 = arith.cmpi slt, %35, %141 : vector<1x96xi32>
    %143 = arith.andi %140, %142 : vector<1x96xi1>
    %cst_47 = arith.constant 0.000000e+00 : f32
    %144 = vector.shape_cast %143 : vector<1x96xi1> to vector<1x96xi1>
    %145 = vector.broadcast %144 : vector<1x96xi1> to vector<24x96xi1>
    %146 = vector.broadcast %cst_47 : f32 to vector<24x96xf32>
    %147 = arith.select %145, %30, %146 : vector<24x96xi1>, vector<24x96xf32>
    %148 = arith.truncf %147 : vector<24x96xf32> to vector<24x96xbf16>
    %cst_48 = arith.constant dense<0.000000e+00> : vector<24x24xf32>
    %149 = tpu.matmul %148, %33, %cst_48 {dimension_numbers = #tpu.dot_dimension_numbers<[1], [1], [0], [0], [0, 0, 1, 0], [], []>} : vector<24x96xbf16>, vector<24x96xbf16>, vector<24x24xf32> -> vector<24x24xf32>
    %cst_49 = arith.constant 0.204124153 : f32
    %150 = vector.broadcast %cst_49 : f32 to vector<24x24xf32>
    %151 = arith.mulf %149, %150 : vector<24x24xf32>
    %cst_50 = arith.constant 0.000000e+00 : f32
    %152 = vector.broadcast %cst_50 : f32 to vector<24x24xf32>
    %153 = arith.cmpf ogt, %1, %152 : vector<24x24xf32>
    %cst_51 = arith.constant -1.000000e+30 : f32
    %154 = vector.broadcast %cst_51 : f32 to vector<24x24xf32>
    %155 = arith.select %153, %151, %154 : vector<24x24xi1>, vector<24x24xf32>
    %cst_52 = arith.constant dense<0xFF800000> : vector<24xf32>
    %156 = vector.multi_reduction <maximumf>, %155, %cst_52 [1] : vector<24x24xf32> to vector<24xf32>
    %157 = vector.shape_cast %156 : vector<24xf32> to vector<24x1xf32>
    %158 = vector.broadcast %157 : vector<24x1xf32> to vector<24x24xf32>
    %159 = arith.subf %155, %158 : vector<24x24xf32>
    %160 = math.exp %159 : vector<24x24xf32>
    %cst_53 = arith.constant dense<0.000000e+00> : vector<24xf32>
    %161 = vector.multi_reduction <add>, %160, %cst_53 [1] : vector<24x24xf32> to vector<24xf32>
    %162 = vector.shape_cast %161 : vector<24xf32> to vector<24x1xf32>
    %163 = tpu.reciprocal %162 {approx = true} : vector<24x1xf32> -> vector<24x1xf32>
    %164 = vector.broadcast %163 : vector<24x1xf32> to vector<24x24xf32>
    %165 = arith.mulf %160, %164 : vector<24x24xf32>
    %cst_54 = arith.constant 0.000000e+00 : bf16
    %166 = vector.shape_cast %143 : vector<1x96xi1> to vector<1x96xi1>
    %167 = vector.broadcast %166 : vector<1x96xi1> to vector<24x96xi1>
    %168 = vector.broadcast %cst_54 : bf16 to vector<24x96xbf16>
    %169 = arith.select %167, %34, %168 : vector<24x96xi1>, vector<24x96xbf16>
    %170 = arith.truncf %165 : vector<24x24xf32> to vector<24x24xbf16>
    %cst_55 = arith.constant dense<0.000000e+00> : vector<24x96xf32>
    %171 = tpu.matmul %170, %169, %cst_55 {dimension_numbers = #tpu.dot_dimension_numbers<[1], [0], [0], [1], [0, 0, 1, 1], [], []>} : vector<24x24xbf16>, vector<24x96xbf16>, vector<24x96xf32> -> vector<24x96xf32>
    %172 = arith.addf %138, %171 : vector<24x96xf32>
    %c0_56 = arith.constant 0 : index
    %c0_57 = arith.constant 0 : index
    %173 = vector.load %arg7[%c0_56, %c0_57] : memref<96x96xbf16, #tpu.memory_space<vmem>>, vector<96x96xbf16>
    %174 = arith.truncf %172 : vector<24x96xf32> to vector<24x96xbf16>
    %cst_58 = arith.constant dense<0.000000e+00> : vector<24x96xf32>
    %175 = tpu.matmul %174, %173, %cst_58 {dimension_numbers = #tpu.dot_dimension_numbers<[1], [0], [0], [1], [0, 0, 1, 1], [], []>} : vector<24x96xbf16>, vector<96x96xbf16>, vector<24x96xf32> -> vector<24x96xf32>
    %c0_59 = arith.constant 0 : index
    %c0_60 = arith.constant 0 : index
    %176 = vector.load %arg8[%c0_59, %c0_60] : memref<1x96xf32, #tpu.memory_space<vmem>>, vector<1x96xf32>
    %177 = vector.broadcast %176 : vector<1x96xf32> to vector<24x96xf32>
    %178 = arith.addf %175, %177 : vector<24x96xf32>
    %c0_61 = arith.constant 0 : index
    %c0_62 = arith.constant 0 : index
    %179 = vector.load %arg9[%c0_61, %c0_62] : memref<1x96xf32, #tpu.memory_space<vmem>>, vector<1x96xf32>
    %180 = vector.broadcast %179 : vector<1x96xf32> to vector<24x96xf32>
    %181 = arith.mulf %180, %178 : vector<24x96xf32>
    %182 = arith.addf %0, %181 : vector<24x96xf32>
    %c0_63 = arith.constant 0 : index
    %c0_64 = arith.constant 0 : index
    %183 = vector.load %arg10[%c0_63, %c0_64] : memref<1x96xf32, #tpu.memory_space<vmem>>, vector<1x96xf32>
    %c0_65 = arith.constant 0 : index
    %c0_66 = arith.constant 0 : index
    %184 = vector.load %arg11[%c0_65, %c0_66] : memref<1x96xf32, #tpu.memory_space<vmem>>, vector<1x96xf32>
    %cst_67 = arith.constant dense<0.000000e+00> : vector<24xf32>
    %185 = vector.multi_reduction <add>, %182, %cst_67 [1] : vector<24x96xf32> to vector<24xf32>
    %186 = vector.shape_cast %185 : vector<24xf32> to vector<24x1xf32>
    %cst_68 = arith.constant 9.600000e+01 : f32
    %187 = vector.broadcast %cst_68 : f32 to vector<24x1xf32>
    %188 = arith.divf %186, %187 : vector<24x1xf32>
    %189 = vector.broadcast %188 : vector<24x1xf32> to vector<24x96xf32>
    %190 = arith.subf %182, %189 : vector<24x96xf32>
    %191 = arith.mulf %190, %190 : vector<24x96xf32>
    %cst_69 = arith.constant dense<0.000000e+00> : vector<24xf32>
    %192 = vector.multi_reduction <add>, %191, %cst_69 [1] : vector<24x96xf32> to vector<24xf32>
    %193 = vector.shape_cast %192 : vector<24xf32> to vector<24x1xf32>
    %cst_70 = arith.constant 9.600000e+01 : f32
    %194 = vector.broadcast %cst_70 : f32 to vector<24x1xf32>
    %195 = arith.divf %193, %194 : vector<24x1xf32>
    %cst_71 = arith.constant 9.99999997E-7 : f32
    %196 = vector.broadcast %cst_71 : f32 to vector<24x1xf32>
    %197 = arith.addf %195, %196 : vector<24x1xf32>
    %198 = math.rsqrt %197 : vector<24x1xf32>
    %199 = vector.broadcast %198 : vector<24x1xf32> to vector<24x96xf32>
    %200 = arith.mulf %190, %199 : vector<24x96xf32>
    %201 = vector.broadcast %183 : vector<1x96xf32> to vector<24x96xf32>
    %202 = arith.mulf %200, %201 : vector<24x96xf32>
    %203 = vector.broadcast %184 : vector<1x96xf32> to vector<24x96xf32>
    %204 = arith.addf %202, %203 : vector<24x96xf32>
    %c0_72 = arith.constant 0 : index
    %c0_73 = arith.constant 0 : index
    %205 = vector.load %arg12[%c0_72, %c0_73] : memref<96x384xbf16, #tpu.memory_space<vmem>>, vector<96x384xbf16>
    %206 = arith.truncf %204 : vector<24x96xf32> to vector<24x96xbf16>
    %cst_74 = arith.constant dense<0.000000e+00> : vector<24x384xf32>
    %207 = tpu.matmul %206, %205, %cst_74 {dimension_numbers = #tpu.dot_dimension_numbers<[1], [0], [0], [1], [0, 0, 1, 1], [], []>} : vector<24x96xbf16>, vector<96x384xbf16>, vector<24x384xf32> -> vector<24x384xf32>
    %c0_75 = arith.constant 0 : index
    %c0_76 = arith.constant 0 : index
    %208 = vector.load %arg13[%c0_75, %c0_76] : memref<1x384xf32, #tpu.memory_space<vmem>>, vector<1x384xf32>
    %209 = vector.broadcast %208 : vector<1x384xf32> to vector<24x384xf32>
    %210 = arith.addf %207, %209 : vector<24x384xf32>
    %211 = arith.mulf %210, %210 : vector<24x384xf32>
    %212 = arith.mulf %210, %211 : vector<24x384xf32>
    %cst_77 = arith.constant 4.471500e-02 : f32
    %213 = vector.broadcast %cst_77 : f32 to vector<24x384xf32>
    %214 = arith.mulf %213, %212 : vector<24x384xf32>
    %215 = arith.addf %210, %214 : vector<24x384xf32>
    %cst_78 = arith.constant 0.797884583 : f32
    %216 = vector.broadcast %cst_78 : f32 to vector<24x384xf32>
    %217 = arith.mulf %216, %215 : vector<24x384xf32>
    %218 = math.tanh %217 : vector<24x384xf32>
    %cst_79 = arith.constant 1.000000e+00 : f32
    %219 = vector.broadcast %cst_79 : f32 to vector<24x384xf32>
    %220 = arith.addf %219, %218 : vector<24x384xf32>
    %cst_80 = arith.constant 5.000000e-01 : f32
    %221 = vector.broadcast %cst_80 : f32 to vector<24x384xf32>
    %222 = arith.mulf %221, %220 : vector<24x384xf32>
    %223 = arith.mulf %210, %222 : vector<24x384xf32>
    %c0_81 = arith.constant 0 : index
    %c0_82 = arith.constant 0 : index
    %224 = vector.load %arg14[%c0_81, %c0_82] : memref<384x96xbf16, #tpu.memory_space<vmem>>, vector<384x96xbf16>
    %225 = arith.truncf %223 : vector<24x384xf32> to vector<24x384xbf16>
    %cst_83 = arith.constant dense<0.000000e+00> : vector<24x96xf32>
    %226 = tpu.matmul %225, %224, %cst_83 {dimension_numbers = #tpu.dot_dimension_numbers<[1], [0], [0], [1], [0, 0, 1, 1], [], []>} : vector<24x384xbf16>, vector<384x96xbf16>, vector<24x96xf32> -> vector<24x96xf32>
    %c0_84 = arith.constant 0 : index
    %c0_85 = arith.constant 0 : index
    %227 = vector.load %arg15[%c0_84, %c0_85] : memref<1x96xf32, #tpu.memory_space<vmem>>, vector<1x96xf32>
    %228 = vector.broadcast %227 : vector<1x96xf32> to vector<24x96xf32>
    %229 = arith.addf %226, %228 : vector<24x96xf32>
    %c0_86 = arith.constant 0 : index
    %c0_87 = arith.constant 0 : index
    %230 = vector.load %arg16[%c0_86, %c0_87] : memref<1x96xf32, #tpu.memory_space<vmem>>, vector<1x96xf32>
    %231 = vector.broadcast %230 : vector<1x96xf32> to vector<24x96xf32>
    %232 = arith.mulf %231, %229 : vector<24x96xf32>
    %233 = arith.addf %182, %232 : vector<24x96xf32>
    %c0_88 = arith.constant 0 : index
    %c0_89 = arith.constant 0 : index
    %234 = vector.load %arg17[%c0_88, %c0_89] : memref<24x96xf32, #tpu.memory_space<vmem>>, vector<24x96xf32>
    tpu.vector_store %arg17[%c0_88, %c0_89], %233 {strides = array<i32>} : memref<24x96xf32, #tpu.memory_space<vmem>>, vector<24x96xf32>,
    return
  }
  func.func @transform_0(%arg0: i32) -> (i32, i32) {
    %c0_i32 = arith.constant 0 : i32
    %c0_i32_0 = arith.constant 0 : i32
    %c0_i32_1 = arith.constant 0 : i32
    return %c0_i32, %c0_i32_0 : i32, i32
  }
  func.func @transform_1(%arg0: i32) -> (i32, i32) {
    %c0_i32 = arith.constant 0 : i32
    %c0_i32_0 = arith.constant 0 : i32
    %c0_i32_1 = arith.constant 0 : i32
    return %c0_i32, %c0_i32_0 : i32, i32
  }
  func.func @transform_2(%arg0: i32) -> (i32, i32) {
    %c0_i32 = arith.constant 0 : i32
    %c0_i32_0 = arith.constant 0 : i32
    %c0_i32_1 = arith.constant 0 : i32
    return %c0_i32, %c0_i32_0 : i32, i32
  }
  func.func @transform_3(%arg0: i32) -> (i32, i32) {
    %c0_i32 = arith.constant 0 : i32
    %c0_i32_0 = arith.constant 0 : i32
    %c0_i32_1 = arith.constant 0 : i32
    return %c0_i32, %c0_i32_0 : i32, i32
  }
  func.func @transform_4(%arg0: i32) -> (i32, i32) {
    %c0_i32 = arith.constant 0 : i32
    %c0_i32_0 = arith.constant 0 : i32
    %c0_i32_1 = arith.constant 0 : i32
    return %c0_i32, %c0_i32_0 : i32, i32
  }
  func.func @transform_5(%arg0: i32) -> (i32, i32) {
    %c0_i32 = arith.constant 0 : i32
    %c0_i32_0 = arith.constant 0 : i32
    %c0_i32_1 = arith.constant 0 : i32
    return %c0_i32, %c0_i32_0 : i32, i32
  }
  func.func @transform_6(%arg0: i32) -> (i32, i32) {
    %c0_i32 = arith.constant 0 : i32
    %c0_i32_0 = arith.constant 0 : i32
    %c0_i32_1 = arith.constant 0 : i32
    return %c0_i32, %c0_i32_0 : i32, i32
  }
  func.func @transform_7(%arg0: i32) -> (i32, i32) {
    %c0_i32 = arith.constant 0 : i32
    %c0_i32_0 = arith.constant 0 : i32
    %c0_i32_1 = arith.constant 0 : i32
    return %c0_i32, %c0_i32_0 : i32, i32
  }
  func.func @transform_8(%arg0: i32) -> (i32, i32) {
    %c0_i32 = arith.constant 0 : i32
    %c0_i32_0 = arith.constant 0 : i32
    %c0_i32_1 = arith.constant 0 : i32
    return %c0_i32, %c0_i32_0 : i32, i32
  }
  func.func @transform_9(%arg0: i32) -> (i32, i32) {
    %c0_i32 = arith.constant 0 : i32
    %c0_i32_0 = arith.constant 0 : i32
    %c0_i32_1 = arith.constant 0 : i32
    return %c0_i32, %c0_i32_0 : i32, i32
  }
  func.func @transform_10(%arg0: i32) -> (i32, i32) {
    %c0_i32 = arith.constant 0 : i32
    %c0_i32_0 = arith.constant 0 : i32
    %c0_i32_1 = arith.constant 0 : i32
    return %c0_i32, %c0_i32_0 : i32, i32
  }
  func.func @transform_11(%arg0: i32) -> (i32, i32) {
    %c0_i32 = arith.constant 0 : i32
    %c0_i32_0 = arith.constant 0 : i32
    %c0_i32_1 = arith.constant 0 : i32
    return %c0_i32, %c0_i32_0 : i32, i32
  }
  func.func @transform_12(%arg0: i32) -> (i32, i32) {
    %c0_i32 = arith.constant 0 : i32
    %c0_i32_0 = arith.constant 0 : i32
    %c0_i32_1 = arith.constant 0 : i32
    return %c0_i32, %c0_i32_0 : i32, i32
  }
  func.func @transform_13(%arg0: i32) -> (i32, i32) {
    %c0_i32 = arith.constant 0 : i32
    %c0_i32_0 = arith.constant 0 : i32
    %c0_i32_1 = arith.constant 0 : i32
    return %c0_i32, %c0_i32_0 : i32, i32
  }
  func.func @transform_14(%arg0: i32) -> (i32, i32) {
    %c0_i32 = arith.constant 0 : i32
    %c0_i32_0 = arith.constant 0 : i32
    %c0_i32_1 = arith.constant 0 : i32
    return %c0_i32, %c0_i32_0 : i32, i32
  }
  func.func @transform_15(%arg0: i32) -> (i32, i32) {
    %c0_i32 = arith.constant 0 : i32
    %c0_i32_0 = arith.constant 0 : i32
    %c0_i32_1 = arith.constant 0 : i32
    return %c0_i32, %c0_i32_0 : i32, i32
  }
  func.func @transform_16(%arg0: i32) -> (i32, i32) {
    %c0_i32 = arith.constant 0 : i32
    %c0_i32_0 = arith.constant 0 : i32
    %c0_i32_1 = arith.constant 0 : i32
    return %c0_i32, %c0_i32_0 : i32, i32
  }
}

module attributes {stable_mosaic.version = 11 : i64} {
  func.func @_attblock_kernel(%arg0: i32, %arg1: memref<24x96xf32, #tpu.memory_space<vmem>>, %arg2: memref<24x24xf32, #tpu.memory_space<vmem>>, %arg3: memref<1x96xf32, #tpu.memory_space<vmem>>, %arg4: memref<1x96xf32, #tpu.memory_space<vmem>>, %arg5: memref<96x288xbf16, #tpu.memory_space<vmem>>, %arg6: memref<1x288xf32, #tpu.memory_space<vmem>>, %arg7: memref<96x96xbf16, #tpu.memory_space<vmem>>, %arg8: memref<1x96xf32, #tpu.memory_space<vmem>>, %arg9: memref<1x96xf32, #tpu.memory_space<vmem>>, %arg10: memref<1x96xf32, #tpu.memory_space<vmem>>, %arg11: memref<1x96xf32, #tpu.memory_space<vmem>>, %arg12: memref<96x384xbf16, #tpu.memory_space<vmem>>, %arg13: memref<1x384xf32, #tpu.memory_space<vmem>>, %arg14: memref<384x96xbf16, #tpu.memory_space<vmem>>, %arg15: memref<1x96xf32, #tpu.memory_space<vmem>>, %arg16: memref<1x96xf32, #tpu.memory_space<vmem>>, %arg17: memref<24x96xf32, #tpu.memory_space<vmem>>) attributes {dimension_semantics = [#tpu.dimension_semantics<arbitrary>], iteration_bounds = array<i64: 1>, scalar_prefetch = 0 : i64, scratch_operands = 0 : i64, tpu.core_type = #tpu.core_type<tc>, window_params = [{pipeline_mode = #tpu.pipeline_mode<synchronous>, transform_indices = @transform_0, window_bounds = array<i64: 24, 96>}, {pipeline_mode = #tpu.pipeline_mode<synchronous>, transform_indices = @transform_1, window_bounds = array<i64: 24, 24>}, {pipeline_mode = #tpu.pipeline_mode<synchronous>, transform_indices = @transform_2, window_bounds = array<i64: 1, 96>}, {pipeline_mode = #tpu.pipeline_mode<synchronous>, transform_indices = @transform_3, window_bounds = array<i64: 1, 96>}, {pipeline_mode = #tpu.pipeline_mode<synchronous>, transform_indices = @transform_4, window_bounds = array<i64: 96, 288>}, {pipeline_mode = #tpu.pipeline_mode<synchronous>, transform_indices = @transform_5, window_bounds = array<i64: 1, 288>}, {pipeline_mode = #tpu.pipeline_mode<synchronous>, transform_indices = @transform_6, window_bounds = array<i64: 96, 96>}, {pipeline_mode = #tpu.pipeline_mode<synchronous>, transform_indices = @transform_7, window_bounds = array<i64: 1, 96>}, {pipeline_mode = #tpu.pipeline_mode<synchronous>, transform_indices = @transform_8, window_bounds = array<i64: 1, 96>}, {pipeline_mode = #tpu.pipeline_mode<synchronous>, transform_indices = @transform_9, window_bounds = array<i64: 1, 96>}, {pipeline_mode = #tpu.pipeline_mode<synchronous>, transform_indices = @transform_10, window_bounds = array<i64: 1, 96>}, {pipeline_mode = #tpu.pipeline_mode<synchronous>, transform_indices = @transform_11, window_bounds = array<i64: 96, 384>}, {pipeline_mode = #tpu.pipeline_mode<synchronous>, transform_indices = @transform_12, window_bounds = array<i64: 1, 384>}, {pipeline_mode = #tpu.pipeline_mode<synchronous>, transform_indices = @transform_13, window_bounds = array<i64: 384, 96>}, {pipeline_mode = #tpu.pipeline_mode<synchronous>, transform_indices = @transform_14, window_bounds = array<i64: 1, 96>}, {pipeline_mode = #tpu.pipeline_mode<synchronous>, transform_indices = @transform_15, window_bounds = array<i64: 1, 96>}, {pipeline_mode = #tpu.pipeline_mode<synchronous>, transform_indices = @transform_16, window_bounds = array<i64: 24, 96>}]} {
    %c0 = arith.constant 0 : index
    %c0_0 = arith.constant 0 : index
    %0 = vector.load %arg1[%c0, %c0_0] : memref<24x96xf32, #tpu.memory_space<vmem>>, vector<24x96xf32>
    %c0_1 = arith.constant 0 : index
    %c0_2 = arith.constant 0 : index
    %1 = vector.load %arg2[%c0_1, %c0_2] : memref<24x24xf32, #tpu.memory_space<vmem>>, vector<24x24xf32>
    %c0_3 = arith.constant 0 : index
    %c0_4 = arith.constant 0 : index
    %2 = vector.load %arg3[%c0_3, %c0_4] : memref<1x96xf32, #tpu.memory_space<vmem>>, vector<1x96xf32>
    %c0_5 = arith.constant 0 : index
    %c0_6 = arith.constant 0 : index
    %3 = vector.load %arg4[%c0_5, %c0_6] : memref<1x96xf32, #tpu.memory_space<vmem>>, vector<1x96xf32>
    %cst = arith.constant dense<0.000000e+00> : vector<24xf32>
    %4 = vector.multi_reduction <add>, %0, %cst [1] : vector<24x96xf32> to vector<24xf32>
    %5 = vector.shape_cast %4 : vector<24xf32> to vector<24x1xf32>
    %cst_7 = arith.constant 9.600000e+01 : f32
    %6 = vector.broadcast %cst_7 : f32 to vector<24x1xf32>
    %7 = arith.divf %5, %6 : vector<24x1xf32>
    %8 = vector.broadcast %7 : vector<24x1xf32> to vector<24x96xf32>
    %9 = arith.subf %0, %8 : vector<24x96xf32>
    %10 = arith.mulf %9, %9 : vector<24x96xf32>
    %cst_8 = arith.constant dense<0.000000e+00> : vector<24xf32>
    %11 = vector.multi_reduction <add>, %10, %cst_8 [1] : vector<24x96xf32> to vector<24xf32>
    %12 = vector.shape_cast %11 : vector<24xf32> to vector<24x1xf32>
    %cst_9 = arith.constant 9.600000e+01 : f32
    %13 = vector.broadcast %cst_9 : f32 to vector<24x1xf32>
    %14 = arith.divf %12, %13 : vector<24x1xf32>
    %cst_10 = arith.constant 9.99999997E-7 : f32
    %15 = vector.broadcast %cst_10 : f32 to vector<24x1xf32>
    %16 = arith.addf %14, %15 : vector<24x1xf32>
    %17 = math.rsqrt %16 : vector<24x1xf32>
    %18 = vector.broadcast %17 : vector<24x1xf32> to vector<24x96xf32>
    %19 = arith.mulf %9, %18 : vector<24x96xf32>
    %20 = vector.broadcast %2 : vector<1x96xf32> to vector<24x96xf32>
    %21 = arith.mulf %19, %20 : vector<24x96xf32>
    %22 = vector.broadcast %3 : vector<1x96xf32> to vector<24x96xf32>
    %23 = arith.addf %21, %22 : vector<24x96xf32>
    %c0_11 = arith.constant 0 : index
    %c0_12 = arith.constant 0 : index
    %24 = vector.load %arg5[%c0_11, %c0_12] : memref<96x288xbf16, #tpu.memory_space<vmem>>, vector<96x288xbf16>
    %25 = arith.truncf %23 : vector<24x96xf32> to vector<24x96xbf16>
    %cst_13 = arith.constant dense<0.000000e+00> : vector<24x288xf32>
    %26 = tpu.matmul %25, %24, %cst_13 {dimension_numbers = #tpu.dot_dimension_numbers<[1], [0], [0], [1], [0, 0, 1, 1], [], []>} : vector<24x96xbf16>, vector<96x288xbf16>, vector<24x288xf32> -> vector<24x288xf32>
    %c0_14 = arith.constant 0 : index
    %c0_15 = arith.constant 0 : index
    %27 = vector.load %arg6[%c0_14, %c0_15] : memref<1x288xf32, #tpu.memory_space<vmem>>, vector<1x288xf32>
    %28 = vector.broadcast %27 : vector<1x288xf32> to vector<24x288xf32>
    %29 = arith.addf %26, %28 : vector<24x288xf32>
    %30 = vector.extract_strided_slice %29 {offsets = [0, 0], sizes = [24, 96], strides = [1, 1]} : vector<24x288xf32> to vector<24x96xf32>
    %31 = vector.extract_strided_slice %29 {offsets = [0, 96], sizes = [24, 96], strides = [1, 1]} : vector<24x288xf32> to vector<24x96xf32>
    %32 = vector.extract_strided_slice %29 {offsets = [0, 192], sizes = [24, 96], strides = [1, 1]} : vector<24x288xf32> to vector<24x96xf32>
    %33 = arith.truncf %31 : vector<24x96xf32> to vector<24x96xbf16>
    %34 = arith.truncf %32 : vector<24x96xf32> to vector<24x96xbf16>
    %35 = tpu.iota {dimensions = array<i32: 1>} : vector<1x96xi32>
    %cst_16 = arith.constant 0.000000e+00 : f32
    %36 = vector.broadcast %cst_16 : f32 to vector<24x96xf32>
    %c0_i32 = arith.constant 0 : i32
    %37 = vector.broadcast %c0_i32 : i32 to vector<1x96xi32>
    %38 = arith.cmpi sge, %35, %37 : vector<1x96xi32>
    %c24_i32 = arith.constant 24 : i32
    %39 = vector.broadcast %c24_i32 : i32 to vector<1x96xi32>
    %40 = arith.cmpi slt, %35, %39 : vector<1x96xi32>
    %41 = arith.andi %38, %40 : vector<1x96xi1>
    %cst_17 = arith.constant 0.000000e+00 : f32
    %42 = vector.shape_cast %41 : vector<1x96xi1> to vector<1x96xi1>
    %43 = vector.broadcast %42 : vector<1x96xi1> to vector<24x96xi1>
    %44 = vector.broadcast %cst_17 : f32 to vector<24x96xf32>
    %45 = arith.select %43, %30, %44 : vector<24x96xi1>, vector<24x96xf32>
    %46 = arith.truncf %45 : vector<24x96xf32> to vector<24x96xbf16>
    %cst_18 = arith.constant dense<0.000000e+00> : vector<24x24xf32>
    %47 = tpu.matmul %46, %33, %cst_18 {dimension_numbers = #tpu.dot_dimension_numbers<[1], [1], [0], [0], [0, 0, 1, 0], [], []>} : vector<24x96xbf16>, vector<24x96xbf16>, vector<24x24xf32> -> vector<24x24xf32>
    %cst_19 = arith.constant 0.204124153 : f32
    %48 = vector.broadcast %cst_19 : f32 to vector<24x24xf32>
    %49 = arith.mulf %47, %48 : vector<24x24xf32>
    %cst_20 = arith.constant 0.000000e+00 : f32
    %50 = vector.broadcast %cst_20 : f32 to vector<24x24xf32>
    %51 = arith.cmpf ogt, %1, %50 : vector<24x24xf32>
    %cst_21 = arith.constant -1.000000e+30 : f32
    %52 = vector.broadcast %cst_21 : f32 to vector<24x24xf32>
    %53 = arith.select %51, %49, %52 : vector<24x24xi1>, vector<24x24xf32>
    %cst_22 = arith.constant dense<0xFF800000> : vector<24xf32>
    %54 = vector.multi_reduction <maximumf>, %53, %cst_22 [1] : vector<24x24xf32> to vector<24xf32>
    %55 = vector.shape_cast %54 : vector<24xf32> to vector<24x1xf32>
    %56 = vector.broadcast %55 : vector<24x1xf32> to vector<24x24xf32>
    %57 = arith.subf %53, %56 : vector<24x24xf32>
    %58 = math.exp %57 : vector<24x24xf32>
    %cst_23 = arith.constant dense<0.000000e+00> : vector<24xf32>
    %59 = vector.multi_reduction <add>, %58, %cst_23 [1] : vector<24x24xf32> to vector<24xf32>
    %60 = vector.shape_cast %59 : vector<24xf32> to vector<24x1xf32>
    %61 = tpu.reciprocal %60 {approx = true} : vector<24x1xf32> -> vector<24x1xf32>
    %62 = vector.broadcast %61 : vector<24x1xf32> to vector<24x24xf32>
    %63 = arith.mulf %58, %62 : vector<24x24xf32>
    %cst_24 = arith.constant 0.000000e+00 : bf16
    %64 = vector.shape_cast %41 : vector<1x96xi1> to vector<1x96xi1>
    %65 = vector.broadcast %64 : vector<1x96xi1> to vector<24x96xi1>
    %66 = vector.broadcast %cst_24 : bf16 to vector<24x96xbf16>
    %67 = arith.select %65, %34, %66 : vector<24x96xi1>, vector<24x96xbf16>
    %68 = arith.truncf %63 : vector<24x24xf32> to vector<24x24xbf16>
    %cst_25 = arith.constant dense<0.000000e+00> : vector<24x96xf32>
    %69 = tpu.matmul %68, %67, %cst_25 {dimension_numbers = #tpu.dot_dimension_numbers<[1], [0], [0], [1], [0, 0, 1, 1], [], []>} : vector<24x24xbf16>, vector<24x96xbf16>, vector<24x96xf32> -> vector<24x96xf32>
    %70 = arith.addf %36, %69 : vector<24x96xf32>
    %c24_i32_26 = arith.constant 24 : i32
    %71 = vector.broadcast %c24_i32_26 : i32 to vector<1x96xi32>
    %72 = arith.cmpi sge, %35, %71 : vector<1x96xi32>
    %c48_i32 = arith.constant 48 : i32
    %73 = vector.broadcast %c48_i32 : i32 to vector<1x96xi32>
    %74 = arith.cmpi slt, %35, %73 : vector<1x96xi32>
    %75 = arith.andi %72, %74 : vector<1x96xi1>
    %cst_27 = arith.constant 0.000000e+00 : f32
    %76 = vector.shape_cast %75 : vector<1x96xi1> to vector<1x96xi1>
    %77 = vector.broadcast %76 : vector<1x96xi1> to vector<24x96xi1>
    %78 = vector.broadcast %cst_27 : f32 to vector<24x96xf32>
    %79 = arith.select %77, %30, %78 : vector<24x96xi1>, vector<24x96xf32>
    %80 = arith.truncf %79 : vector<24x96xf32> to vector<24x96xbf16>
    %cst_28 = arith.constant dense<0.000000e+00> : vector<24x24xf32>
    %81 = tpu.matmul %80, %33, %cst_28 {dimension_numbers = #tpu.dot_dimension_numbers<[1], [1], [0], [0], [0, 0, 1, 0], [], []>} : vector<24x96xbf16>, vector<24x96xbf16>, vector<24x24xf32> -> vector<24x24xf32>
    %cst_29 = arith.constant 0.204124153 : f32
    %82 = vector.broadcast %cst_29 : f32 to vector<24x24xf32>
    %83 = arith.mulf %81, %82 : vector<24x24xf32>
    %cst_30 = arith.constant 0.000000e+00 : f32
    %84 = vector.broadcast %cst_30 : f32 to vector<24x24xf32>
    %85 = arith.cmpf ogt, %1, %84 : vector<24x24xf32>
    %cst_31 = arith.constant -1.000000e+30 : f32
    %86 = vector.broadcast %cst_31 : f32 to vector<24x24xf32>
    %87 = arith.select %85, %83, %86 : vector<24x24xi1>, vector<24x24xf32>
    %cst_32 = arith.constant dense<0xFF800000> : vector<24xf32>
    %88 = vector.multi_reduction <maximumf>, %87, %cst_32 [1] : vector<24x24xf32> to vector<24xf32>
    %89 = vector.shape_cast %88 : vector<24xf32> to vector<24x1xf32>
    %90 = vector.broadcast %89 : vector<24x1xf32> to vector<24x24xf32>
    %91 = arith.subf %87, %90 : vector<24x24xf32>
    %92 = math.exp %91 : vector<24x24xf32>
    %cst_33 = arith.constant dense<0.000000e+00> : vector<24xf32>
    %93 = vector.multi_reduction <add>, %92, %cst_33 [1] : vector<24x24xf32> to vector<24xf32>
    %94 = vector.shape_cast %93 : vector<24xf32> to vector<24x1xf32>
    %95 = tpu.reciprocal %94 {approx = true} : vector<24x1xf32> -> vector<24x1xf32>
    %96 = vector.broadcast %95 : vector<24x1xf32> to vector<24x24xf32>
    %97 = arith.mulf %92, %96 : vector<24x24xf32>
    %cst_34 = arith.constant 0.000000e+00 : bf16
    %98 = vector.shape_cast %75 : vector<1x96xi1> to vector<1x96xi1>
    %99 = vector.broadcast %98 : vector<1x96xi1> to vector<24x96xi1>
    %100 = vector.broadcast %cst_34 : bf16 to vector<24x96xbf16>
    %101 = arith.select %99, %34, %100 : vector<24x96xi1>, vector<24x96xbf16>
    %102 = arith.truncf %97 : vector<24x24xf32> to vector<24x24xbf16>
    %cst_35 = arith.constant dense<0.000000e+00> : vector<24x96xf32>
    %103 = tpu.matmul %102, %101, %cst_35 {dimension_numbers = #tpu.dot_dimension_numbers<[1], [0], [0], [1], [0, 0, 1, 1], [], []>} : vector<24x24xbf16>, vector<24x96xbf16>, vector<24x96xf32> -> vector<24x96xf32>
    %104 = arith.addf %70, %103 : vector<24x96xf32>
    %c48_i32_36 = arith.constant 48 : i32
    %105 = vector.broadcast %c48_i32_36 : i32 to vector<1x96xi32>
    %106 = arith.cmpi sge, %35, %105 : vector<1x96xi32>
    %c72_i32 = arith.constant 72 : i32
    %107 = vector.broadcast %c72_i32 : i32 to vector<1x96xi32>
    %108 = arith.cmpi slt, %35, %107 : vector<1x96xi32>
    %109 = arith.andi %106, %108 : vector<1x96xi1>
    %cst_37 = arith.constant 0.000000e+00 : f32
    %110 = vector.shape_cast %109 : vector<1x96xi1> to vector<1x96xi1>
    %111 = vector.broadcast %110 : vector<1x96xi1> to vector<24x96xi1>
    %112 = vector.broadcast %cst_37 : f32 to vector<24x96xf32>
    %113 = arith.select %111, %30, %112 : vector<24x96xi1>, vector<24x96xf32>
    %114 = arith.truncf %113 : vector<24x96xf32> to vector<24x96xbf16>
    %cst_38 = arith.constant dense<0.000000e+00> : vector<24x24xf32>
    %115 = tpu.matmul %114, %33, %cst_38 {dimension_numbers = #tpu.dot_dimension_numbers<[1], [1], [0], [0], [0, 0, 1, 0], [], []>} : vector<24x96xbf16>, vector<24x96xbf16>, vector<24x24xf32> -> vector<24x24xf32>
    %cst_39 = arith.constant 0.204124153 : f32
    %116 = vector.broadcast %cst_39 : f32 to vector<24x24xf32>
    %117 = arith.mulf %115, %116 : vector<24x24xf32>
    %cst_40 = arith.constant 0.000000e+00 : f32
    %118 = vector.broadcast %cst_40 : f32 to vector<24x24xf32>
    %119 = arith.cmpf ogt, %1, %118 : vector<24x24xf32>
    %cst_41 = arith.constant -1.000000e+30 : f32
    %120 = vector.broadcast %cst_41 : f32 to vector<24x24xf32>
    %121 = arith.select %119, %117, %120 : vector<24x24xi1>, vector<24x24xf32>
    %cst_42 = arith.constant dense<0xFF800000> : vector<24xf32>
    %122 = vector.multi_reduction <maximumf>, %121, %cst_42 [1] : vector<24x24xf32> to vector<24xf32>
    %123 = vector.shape_cast %122 : vector<24xf32> to vector<24x1xf32>
    %124 = vector.broadcast %123 : vector<24x1xf32> to vector<24x24xf32>
    %125 = arith.subf %121, %124 : vector<24x24xf32>
    %126 = math.exp %125 : vector<24x24xf32>
    %cst_43 = arith.constant dense<0.000000e+00> : vector<24xf32>
    %127 = vector.multi_reduction <add>, %126, %cst_43 [1] : vector<24x24xf32> to vector<24xf32>
    %128 = vector.shape_cast %127 : vector<24xf32> to vector<24x1xf32>
    %129 = tpu.reciprocal %128 {approx = true} : vector<24x1xf32> -> vector<24x1xf32>
    %130 = vector.broadcast %129 : vector<24x1xf32> to vector<24x24xf32>
    %131 = arith.mulf %126, %130 : vector<24x24xf32>
    %cst_44 = arith.constant 0.000000e+00 : bf16
    %132 = vector.shape_cast %109 : vector<1x96xi1> to vector<1x96xi1>
    %133 = vector.broadcast %132 : vector<1x96xi1> to vector<24x96xi1>
    %134 = vector.broadcast %cst_44 : bf16 to vector<24x96xbf16>
    %135 = arith.select %133, %34, %134 : vector<24x96xi1>, vector<24x96xbf16>
    %136 = arith.truncf %131 : vector<24x24xf32> to vector<24x24xbf16>
    %cst_45 = arith.constant dense<0.000000e+00> : vector<24x96xf32>
    %137 = tpu.matmul %136, %135, %cst_45 {dimension_numbers = #tpu.dot_dimension_numbers<[1], [0], [0], [1], [0, 0, 1, 1], [], []>} : vector<24x24xbf16>, vector<24x96xbf16>, vector<24x96xf32> -> vector<24x96xf32>
    %138 = arith.addf %104, %137 : vector<24x96xf32>
    %c72_i32_46 = arith.constant 72 : i32
    %139 = vector.broadcast %c72_i32_46 : i32 to vector<1x96xi32>
    %140 = arith.cmpi sge, %35, %139 : vector<1x96xi32>
    %c96_i32 = arith.constant 96 : i32
    %141 = vector.broadcast %c96_i32 : i32 to vector<1x96xi32>
    %142 = arith.cmpi slt, %35, %141 : vector<1x96xi32>
    %143 = arith.andi %140, %142 : vector<1x96xi1>
    %cst_47 = arith.constant 0.000000e+00 : f32
    %144 = vector.shape_cast %143 : vector<1x96xi1> to vector<1x96xi1>
    %145 = vector.broadcast %144 : vector<1x96xi1> to vector<24x96xi1>
    %146 = vector.broadcast %cst_47 : f32 to vector<24x96xf32>
    %147 = arith.select %145, %30, %146 : vector<24x96xi1>, vector<24x96xf32>
    %148 = arith.truncf %147 : vector<24x96xf32> to vector<24x96xbf16>
    %cst_48 = arith.constant dense<0.000000e+00> : vector<24x24xf32>
    %149 = tpu.matmul %148, %33, %cst_48 {dimension_numbers = #tpu.dot_dimension_numbers<[1], [1], [0], [0], [0, 0, 1, 0], [], []>} : vector<24x96xbf16>, vector<24x96xbf16>, vector<24x24xf32> -> vector<24x24xf32>
    %cst_49 = arith.constant 0.204124153 : f32
    %150 = vector.broadcast %cst_49 : f32 to vector<24x24xf32>
    %151 = arith.mulf %149, %150 : vector<24x24xf32>
    %cst_50 = arith.constant 0.000000e+00 : f32
    %152 = vector.broadcast %cst_50 : f32 to vector<24x24xf32>
    %153 = arith.cmpf ogt, %1, %152 : vector<24x24xf32>
    %cst_51 = arith.constant -1.000000e+30 : f32
    %154 = vector.broadcast %cst_51 : f32 to vector<24x24xf32>
    %155 = arith.select %153, %151, %154 : vector<24x24xi1>, vector<24x24xf32>
    %cst_52 = arith.constant dense<0xFF800000> : vector<24xf32>
    %156 = vector.multi_reduction <maximumf>, %155, %cst_52 [1] : vector<24x24xf32> to vector<24xf32>
    %157 = vector.shape_cast %156 : vector<24xf32> to vector<24x1xf32>
    %158 = vector.broadcast %157 : vector<24x1xf32> to vector<24x24xf32>
    %159 = arith.subf %155, %158 : vector<24x24xf32>
    %160 = math.exp %159 : vector<24x24xf32>
    %cst_53 = arith.constant dense<0.000000e+00> : vector<24xf32>
    %161 = vector.multi_reduction <add>, %160, %cst_53 [1] : vector<24x24xf32> to vector<24xf32>
    %162 = vector.shape_cast %161 : vector<24xf32> to vector<24x1xf32>
    %163 = tpu.reciprocal %162 {approx = true} : vector<24x1xf32> -> vector<24x1xf32>
    %164 = vector.broadcast %163 : vector<24x1xf32> to vector<24x24xf32>
    %165 = arith.mulf %160, %164 : vector<24x24xf32>
    %cst_54 = arith.constant 0.000000e+00 : bf16
    %166 = vector.shape_cast %143 : vector<1x96xi1> to vector<1x96xi1>
    %167 = vector.broadcast %166 : vector<1x96xi1> to vector<24x96xi1>
    %168 = vector.broadcast %cst_54 : bf16 to vector<24x96xbf16>
    %169 = arith.select %167, %34, %168 : vector<24x96xi1>, vector<24x96xbf16>
    %170 = arith.truncf %165 : vector<24x24xf32> to vector<24x24xbf16>
    %cst_55 = arith.constant dense<0.000000e+00> : vector<24x96xf32>
    %171 = tpu.matmul %170, %169, %cst_55 {dimension_numbers = #tpu.dot_dimension_numbers<[1], [0], [0], [1], [0, 0, 1, 1], [], []>} : vector<24x24xbf16>, vector<24x96xbf16>, vector<24x96xf32> -> vector<24x96xf32>
    %172 = arith.addf %138, %171 : vector<24x96xf32>
    %c0_56 = arith.constant 0 : index
    %c0_57 = arith.constant 0 : index
    %173 = vector.load %arg7[%c0_56, %c0_57] : memref<96x96xbf16, #tpu.memory_space<vmem>>, vector<96x96xbf16>
    %174 = arith.truncf %172 : vector<24x96xf32> to vector<24x96xbf16>
    %cst_58 = arith.constant dense<0.000000e+00> : vector<24x96xf32>
    %175 = tpu.matmul %174, %173, %cst_58 {dimension_numbers = #tpu.dot_dimension_numbers<[1], [0], [0], [1], [0, 0, 1, 1], [], []>} : vector<24x96xbf16>, vector<96x96xbf16>, vector<24x96xf32> -> vector<24x96xf32>
    %c0_59 = arith.constant 0 : index
    %c0_60 = arith.constant 0 : index
    %176 = vector.load %arg8[%c0_59, %c0_60] : memref<1x96xf32, #tpu.memory_space<vmem>>, vector<1x96xf32>
    %177 = vector.broadcast %176 : vector<1x96xf32> to vector<24x96xf32>
    %178 = arith.addf %175, %177 : vector<24x96xf32>
    %c0_61 = arith.constant 0 : index
    %c0_62 = arith.constant 0 : index
    %179 = vector.load %arg9[%c0_61, %c0_62] : memref<1x96xf32, #tpu.memory_space<vmem>>, vector<1x96xf32>
    %180 = vector.broadcast %179 : vector<1x96xf32> to vector<24x96xf32>
    %181 = arith.mulf %180, %178 : vector<24x96xf32>
    %182 = arith.addf %0, %181 : vector<24x96xf32>
    %c0_63 = arith.constant 0 : index
    %c0_64 = arith.constant 0 : index
    %183 = vector.load %arg10[%c0_63, %c0_64] : memref<1x96xf32, #tpu.memory_space<vmem>>, vector<1x96xf32>
    %c0_65 = arith.constant 0 : index
    %c0_66 = arith.constant 0 : index
    %184 = vector.load %arg11[%c0_65, %c0_66] : memref<1x96xf32, #tpu.memory_space<vmem>>, vector<1x96xf32>
    %cst_67 = arith.constant dense<0.000000e+00> : vector<24xf32>
    %185 = vector.multi_reduction <add>, %182, %cst_67 [1] : vector<24x96xf32> to vector<24xf32>
    %186 = vector.shape_cast %185 : vector<24xf32> to vector<24x1xf32>
    %cst_68 = arith.constant 9.600000e+01 : f32
    %187 = vector.broadcast %cst_68 : f32 to vector<24x1xf32>
    %188 = arith.divf %186, %187 : vector<24x1xf32>
    %189 = vector.broadcast %188 : vector<24x1xf32> to vector<24x96xf32>
    %190 = arith.subf %182, %189 : vector<24x96xf32>
    %191 = arith.mulf %190, %190 : vector<24x96xf32>
    %cst_69 = arith.constant dense<0.000000e+00> : vector<24xf32>
    %192 = vector.multi_reduction <add>, %191, %cst_69 [1] : vector<24x96xf32> to vector<24xf32>
    %193 = vector.shape_cast %192 : vector<24xf32> to vector<24x1xf32>
    %cst_70 = arith.constant 9.600000e+01 : f32
    %194 = vector.broadcast %cst_70 : f32 to vector<24x1xf32>
    %195 = arith.divf %193, %194 : vector<24x1xf32>
    %cst_71 = arith.constant 9.99999997E-7 : f32
    %196 = vector.broadcast %cst_71 : f32 to vector<24x1xf32>
    %197 = arith.addf %195, %196 : vector<24x1xf32>
    %198 = math.rsqrt %197 : vector<24x1xf32>
    %199 = vector.broadcast %198 : vector<24x1xf32> to vector<24x96xf32>
    %200 = arith.mulf %190, %199 : vector<24x96xf32>
    %201 = vector.broadcast %183 : vector<1x96xf32> to vector<24x96xf32>
    %202 = arith.mulf %200, %201 : vector<24x96xf32>
    %203 = vector.broadcast %184 : vector<1x96xf32> to vector<24x96xf32>
    %204 = arith.addf %202, %203 : vector<24x96xf32>
    %c0_72 = arith.constant 0 : index
    %c0_73 = arith.constant 0 : index
    %205 = vector.load %arg12[%c0_72, %c0_73] : memref<96x384xbf16, #tpu.memory_space<vmem>>, vector<96x384xbf16>
    %206 = arith.truncf %204 : vector<24x96xf32> to vector<24x96xbf16>
    %cst_74 = arith.constant dense<0.000000e+00> : vector<24x384xf32>
    %207 = tpu.matmul %206, %205, %cst_74 {dimension_numbers = #tpu.dot_dimension_numbers<[1], [0], [0], [1], [0, 0, 1, 1], [], []>} : vector<24x96xbf16>, vector<96x384xbf16>, vector<24x384xf32> -> vector<24x384xf32>
    %c0_75 = arith.constant 0 : index
    %c0_76 = arith.constant 0 : index
    %208 = vector.load %arg13[%c0_75, %c0_76] : memref<1x384xf32, #tpu.memory_space<vmem>>, vector<1x384xf32>
    %209 = vector.broadcast %208 : vector<1x384xf32> to vector<24x384xf32>
    %210 = arith.addf %207, %209 : vector<24x384xf32>
    %211 = arith.mulf %210, %210 : vector<24x384xf32>
    %212 = arith.mulf %210, %211 : vector<24x384xf32>
    %cst_77 = arith.constant 4.471500e-02 : f32
    %213 = vector.broadcast %cst_77 : f32 to vector<24x384xf32>
    %214 = arith.mulf %213, %212 : vector<24x384xf32>
    %215 = arith.addf %210, %214 : vector<24x384xf32>
    %cst_78 = arith.constant 0.797884583 : f32
    %216 = vector.broadcast %cst_78 : f32 to vector<24x384xf32>
    %217 = arith.mulf %216, %215 : vector<24x384xf32>
    %218 = math.tanh %217 : vector<24x384xf32>
    %cst_79 = arith.constant 1.000000e+00 : f32
    %219 = vector.broadcast %cst_79 : f32 to vector<24x384xf32>
    %220 = arith.addf %219, %218 : vector<24x384xf32>
    %cst_80 = arith.constant 5.000000e-01 : f32
    %221 = vector.broadcast %cst_80 : f32 to vector<24x384xf32>
    %222 = arith.mulf %221, %220 : vector<24x384xf32>
    %223 = arith.mulf %210, %222 : vector<24x384xf32>
    %c0_81 = arith.constant 0 : index
    %c0_82 = arith.constant 0 : index
    %224 = vector.load %arg14[%c0_81, %c0_82] : memref<384x96xbf16, #tpu.memory_space<vmem>>, vector<384x96xbf16>
    %225 = arith.truncf %223 : vector<24x384xf32> to vector<24x384xbf16>
    %cst_83 = arith.constant dense<0.000000e+00> : vector<24x96xf32>
    %226 = tpu.matmul %225, %224, %cst_83 {dimension_numbers = #tpu.dot_dimension_numbers<[1], [0], [0], [1], [0, 0, 1, 1], [], []>} : vector<24x384xbf16>, vector<384x96xbf16>, vector<24x96xf32> -> vector<24x96xf32>
    %c0_84 = arith.constant 0 : index
    %c0_85 = arith.constant 0 : index
    %227 = vector.load %arg15[%c0_84, %c0_85] : memref<1x96xf32, #tpu.memory_space<vmem>>, vector<1x96xf32>
    %228 = vector.broadcast %227 : vector<1x96xf32> to vector<24x96xf32>
    %229 = arith.addf %226, %228 : vector<24x96xf32>
    %c0_86 = arith.constant 0 : index
    %c0_87 = arith.constant 0 : index
    %230 = vector.load %arg16[%c0_86, %c0_87] : memref<1x96xf32, #tpu.memory_space<vmem>>, vector<1x96xf32>
    %231 = vector.broadcast %230 : vector<1x96xf32> to vector<24x96xf32>
    %232 = arith.mulf %231, %229 : vector<24x96xf32>
    %233 = arith.addf %182, %232 : vector<24x96xf32>
    %c0_88 = arith.constant 0 : index
    %c0_89 = arith.constant 0 : index
    %234 = vector.load %arg17[%c0_88, %c0_89] : memref<24x96xf32, #tpu.memory_space<vmem>>, vector<24x96xf32>
    tpu.vector_store %arg17[%c0_88, %c0_89], %233 {strides = array<i32>} : memref<24x96xf32, #tpu.memory_space<vmem>>, vector<24x96xf32>,
    return
  }
  func.func @transform_0(%arg0: i32) -> (i32, i32) {
    %c0_i32 = arith.constant 0 : i32
    %c0_i32_0 = arith.constant 0 : i32
    %c0_i32_1 = arith.constant 0 : i32
    return %c0_i32, %c0_i32_0 : i32, i32
  }
  func.func @transform_1(%arg0: i32) -> (i32, i32) {
    %c0_i32 = arith.constant 0 : i32
    %c0_i32_0 = arith.constant 0 : i32
    %c0_i32_1 = arith.constant 0 : i32
    return %c0_i32, %c0_i32_0 : i32, i32
  }
  func.func @transform_2(%arg0: i32) -> (i32, i32) {
    %c0_i32 = arith.constant 0 : i32
    %c0_i32_0 = arith.constant 0 : i32
    %c0_i32_1 = arith.constant 0 : i32
    return %c0_i32, %c0_i32_0 : i32, i32
  }
  func.func @transform_3(%arg0: i32) -> (i32, i32) {
    %c0_i32 = arith.constant 0 : i32
    %c0_i32_0 = arith.constant 0 : i32
    %c0_i32_1 = arith.constant 0 : i32
    return %c0_i32, %c0_i32_0 : i32, i32
  }
  func.func @transform_4(%arg0: i32) -> (i32, i32) {
    %c0_i32 = arith.constant 0 : i32
    %c0_i32_0 = arith.constant 0 : i32
    %c0_i32_1 = arith.constant 0 : i32
    return %c0_i32, %c0_i32_0 : i32, i32
  }
  func.func @transform_5(%arg0: i32) -> (i32, i32) {
    %c0_i32 = arith.constant 0 : i32
    %c0_i32_0 = arith.constant 0 : i32
    %c0_i32_1 = arith.constant 0 : i32
    return %c0_i32, %c0_i32_0 : i32, i32
  }
  func.func @transform_6(%arg0: i32) -> (i32, i32) {
    %c0_i32 = arith.constant 0 : i32
    %c0_i32_0 = arith.constant 0 : i32
    %c0_i32_1 = arith.constant 0 : i32
    return %c0_i32, %c0_i32_0 : i32, i32
  }
  func.func @transform_7(%arg0: i32) -> (i32, i32) {
    %c0_i32 = arith.constant 0 : i32
    %c0_i32_0 = arith.constant 0 : i32
    %c0_i32_1 = arith.constant 0 : i32
    return %c0_i32, %c0_i32_0 : i32, i32
  }
  func.func @transform_8(%arg0: i32) -> (i32, i32) {
    %c0_i32 = arith.constant 0 : i32
    %c0_i32_0 = arith.constant 0 : i32
    %c0_i32_1 = arith.constant 0 : i32
    return %c0_i32, %c0_i32_0 : i32, i32
  }
  func.func @transform_9(%arg0: i32) -> (i32, i32) {
    %c0_i32 = arith.constant 0 : i32
    %c0_i32_0 = arith.constant 0 : i32
    %c0_i32_1 = arith.constant 0 : i32
    return %c0_i32, %c0_i32_0 : i32, i32
  }
  func.func @transform_10(%arg0: i32) -> (i32, i32) {
    %c0_i32 = arith.constant 0 : i32
    %c0_i32_0 = arith.constant 0 : i32
    %c0_i32_1 = arith.constant 0 : i32
    return %c0_i32, %c0_i32_0 : i32, i32
  }
  func.func @transform_11(%arg0: i32) -> (i32, i32) {
    %c0_i32 = arith.constant 0 : i32
    %c0_i32_0 = arith.constant 0 : i32
    %c0_i32_1 = arith.constant 0 : i32
    return %c0_i32, %c0_i32_0 : i32, i32
  }
  func.func @transform_12(%arg0: i32) -> (i32, i32) {
    %c0_i32 = arith.constant 0 : i32
    %c0_i32_0 = arith.constant 0 : i32
    %c0_i32_1 = arith.constant 0 : i32
    return %c0_i32, %c0_i32_0 : i32, i32
  }
  func.func @transform_13(%arg0: i32) -> (i32, i32) {
    %c0_i32 = arith.constant 0 : i32
    %c0_i32_0 = arith.constant 0 : i32
    %c0_i32_1 = arith.constant 0 : i32
    return %c0_i32, %c0_i32_0 : i32, i32
  }
  func.func @transform_14(%arg0: i32) -> (i32, i32) {
    %c0_i32 = arith.constant 0 : i32
    %c0_i32_0 = arith.constant 0 : i32
    %c0_i32_1 = arith.constant 0 : i32
    return %c0_i32, %c0_i32_0 : i32, i32
  }
  func.func @transform_15(%arg0: i32) -> (i32, i32) {
    %c0_i32 = arith.constant 0 : i32
    %c0_i32_0 = arith.constant 0 : i32
    %c0_i32_1 = arith.constant 0 : i32
    return %c0_i32, %c0_i32_0 : i32, i32
  }
  func.func @transform_16(%arg0: i32) -> (i32, i32) {
    %c0_i32 = arith.constant 0 : i32
    %c0_i32_0 = arith.constant 0 : i32
    %c0_i32_1 = arith.constant 0 : i32
    return %c0_i32, %c0_i32_0 : i32, i32
  }
}

</mosaic_0001>

<bundles_post_ra>
// kernel: fwd.4
= control target key start
LH: loop header
LB: loop body
LE: loop exit
PB: predicated region body
PF: predicated region fallthrough
CT: control target
= control target key end

     0   :  { %vm11_vm0 = vcmask 64512   ;;  %vm56_vm1 = vcmask 195584   ;;  %v80_v5 = vmov 0.0   ;;  %s109_s0 = inlined_call_operand.vmem [shape: f32[24,8], index: 0, kind: input, shape index: {}]   ;;  %s110_s1 = inlined_call_operand.vmem [shape: f32[24,24], index: 1, kind: output, shape index: {}]  }
   0x1   :  { %v10_v0 = vld [vmem:[%s109_s0 + $0x10] sm:$0xff]  ;;  %v9_v1 = vld [vmem:[%s109_s0 + $0x8] sm:$0xff]  ;;  %v8_v2 = vld [vmem:[%s109_s0] sm:$0xff] }
   0x2   :  { %74 = vmatpush.xpose.msk.msra.mxu2 %vm11_vm0, %v10_v0  ;;  %64 = vmatpush.xpose.msk.msra.mxu0 %vm11_vm0, %v10_v0 }
   0x3   :  { %73 = vmatpush.xpose.msk.msra.mxu1 %vm11_vm0, %v10_v0 }
   0x6   :  { %76 = vmatpush.xpose.msk.msra.mxu2 %vm11_vm0, %v9_v1  ;;  %65 = vmatpush.xpose.msk.msra.mxu0 %vm11_vm0, %v9_v1 }
   0x7   :  { %75 = vmatpush.xpose.msk.msra.mxu1 %vm11_vm0, %v9_v1 }
   0xa   :  { %78 = vmatpush.xpose.msk.msra.mxu2 %vm11_vm0, %v8_v2  ;;  %66 = vmatpush.xpose.msk.msra.mxu0 %vm11_vm0, %v8_v2 }
   0xb   :  { %77 = vmatpush.xpose.msk.msra.mxu1 %vm11_vm0, %v8_v2 }
   0xd   :  { %69 = vmatmul.msk.f32.vlgmr.msra.gmra.mxu2 %vm11_vm0, %v10_v0  ;;  %67 = vmatmul.msk.f32.vlgmr.msra.gmra.mxu0 %vm11_vm0, %v8_v2 }
   0xe   :  { %68 = vmatmul.msk.f32.vlgmr.msra.gmra.mxu1 %vm11_vm0, %v9_v1 }
  0x8a   :  { %v38_v3 = vpop.f32.mrf.mxu0 }
  0x8b   :  { %vm47_vm2 = vcmp.gt.f32.partialorder %v38_v3, 0.0  ;;  %v41_v4 = vpop.f32.mrf.mxu1 }
  0x8c   :  { %v70_v6 = vsel %vm47_vm2, 1.0, %v80_v5  ;;  %vm48_vm3 = vcmp.gt.f32.partialorder %v41_v4, 0.0 }
  0x8d   :  { %57 = vst.msk [vmem:[%s110_s1] sm:$0xff] %vm56_vm1, %v70_v6  ;;  %v71_v7 = vsel %vm48_vm3, 1.0, %v80_v5 }
  0x8e   :  { %58 = vst.msk [vmem:[%s110_s1 + $0x8] sm:$0xff] %vm56_vm1, %v71_v7 }
  0x90   :  { %v44_v8 = vpop.f32.mrf.mxu2 }
  0x91   :  { %vm49_vm4 = vcmp.gt.f32.partialorder %v44_v8, 0.0 }
  0x92   :  { %v72_v9 = vsel %vm49_vm4, 1.0, %v80_v5 }
  0x93   :  { %59 = vst.msk [vmem:[%s110_s1 + $0x10] sm:$0xff] %vm56_vm1, %v72_v9 }

// kernel: fwd.5
= control target key start
LH: loop header
LB: loop body
LE: loop exit
PB: predicated region body
PF: predicated region fallthrough
CT: control target
= control target key end

     0   :  { %s741_s0 = inlined_call_operand.vmem [shape: f32[24,64], index: 0, kind: input, shape index: {}]   ;;  %s742_s1 = inlined_call_operand.hbm [shape: bf16[64,96], index: 1, kind: input, shape index: {}]   ;;  %s743_s2 = inlined_call_operand.vmem [shape: f32[1,96], index: 2, kind: input, shape index: {}]   ;;  %s744_s3 = inlined_call_operand.hbm [shape: f32[1,96], index: 3, kind: input, shape index: {}]   ;;  %s745_s4 = inlined_call_operand.hbm [shape: f32[1,96], index: 4, kind: input, shape index: {}]   ;;  %s746_s5 = inlined_call_operand.hbm [shape: f32[24,128], index: 5, kind: input, shape index: {}]   ;;  %s747_s6 = inlined_call_operand.vmem [shape: bf16[128,96], index: 6, kind: input, shape index: {}]   ;;  %s748_s7 = inlined_call_operand.hbm [shape: f32[1,96], index: 7, kind: input, shape index: {}]   ;;  %s749_s8 = inlined_call_operand.<no memory space> [shape: f32[1,1], index: 8, kind: input, shape index: {}]   ;;  %s750_s9 = inlined_call_operand.vmem [shape: f32[24,96], index: 9, kind: output, shape index: {}]  }
   0x1   :  { %v14_v0 = vstv %s749_s8 }
   0x2   :  { %15 = vst [vmem:[#allocation2] sm:$0x1] %v14_v0 }
   0x3   :  { %16 = vsyncpa [#allocation4], 0 }
   0x4   :  { %17 = vsyncpa [#allocation6], 0  ;;  %s41_s13 = sshll.u32 %s744_s3, 4  ;;  %s42_s13 = int_to_ptr.hbm [resolvable:$true] %s41_s13 }
   0x5   :  { %18 = vsyncpa [#allocation9], 0  ;;  %s600_s14 = smov [#allocation5]   ;;  %s62_s18 = sshll.u32 %s746_s5, 4  ;;  %s63_s18 = int_to_ptr.hbm [resolvable:$true] %s62_s18 }
   0x6   :  { %s43_s15 = sshll.u32 %s600_s14, 4  ;;  %s601_s19 = smov [#allocation8]   ;;  %s44_s15 = int_to_ptr.vmem [resolvable:$true] %s43_s15 }
   0x7   :  { %46 = dma.hbm_to_vmem [thread:$0]  %s42_s13, 16, %s44_s15, [#allocation6]  }
   0x8   :  { %s64_s8 = sshll.u32 %s601_s19, 4  ;;  %s602_s20 = smov 128   ;;  %s65_s8 = int_to_ptr.vmem [resolvable:$true] %s64_s8 }
   0x9   :  { %s603_s21 = smov 8   ;;  %s25_s3 = sshll.u32 %s742_s1, 4  ;;  %s26_s3 = int_to_ptr.hbm [resolvable:$true] %s25_s3 }
   0xa   :  { %70 = dma.hbm_to_vmem [thread:$0]  %s63_s18, 384, %s65_s8, [#allocation9], %s602_s20, %s602_s20, %s603_s21  }
   0xb   :  { %s604_s24 = smov [#allocation3]   ;;  %s52_s5 = sshll.u32 %s745_s4, 4  ;;  %s53_s5 = int_to_ptr.hbm [resolvable:$true] %s52_s5 }
   0xc   :  { %s27_s25 = sshll.u32 %s604_s24, 4  ;;  %s605_s28 = smov 64   ;;  %s28_s25 = int_to_ptr.vmem [resolvable:$true] %s27_s25 }
   0xd   :  { %s606_s29 = smov 4   ;;  %s607_s30 = smov [#allocation7]  }
   0xe   :  { %33 = dma.hbm_to_vmem [thread:$0]  %s26_s3, 512, %s28_s25, [#allocation4], %s605_s28, %s605_s28, %s606_s29  }
   0xf   :  { %s54_s10 = sshll.u32 %s607_s30, 4  ;;  %s78_s13 = sshll.u32 %s748_s7, 4  ;;  %s55_s10 = int_to_ptr.vmem [resolvable:$true] %s54_s10  ;;  %s79_s13 = int_to_ptr.hbm [resolvable:$true] %s78_s13 }
  0x10   :  { %57 = dma.hbm_to_vmem [thread:$0]  %s53_s5, 16, %s55_s10, [#allocation6]  }
  0x11   :  { %s608_s1 = smov [#allocation10]  }
  0x12   :  { %s80_s14 = sshll.u32 %s608_s1, 4  ;;  %s81_s14 = int_to_ptr.vmem [resolvable:$true] %s80_s14 }
  0x13   :  { %83 = dma.hbm_to_vmem [thread:$0]  %s79_s13, 16, %s81_s14, [#allocation9]  }
  0x14   :  { %594 = dma.done.wait [#allocation4], 512  }
  0x15   :  { %595 = vsyncadd [#allocation4], 4294966784 }
  0x16   :  { %596 = dma.done.wait [#allocation6], 32  }
  0x17   :  { %597 = vsyncadd [#allocation6], 4294967264 }
  0x18   :  { %598 = dma.done.wait [#allocation9], 400  }
  0x19   :  { %599 = vsyncadd [#allocation9], 4294966896  ;;  %v428_v1 = vld [vmem:[#allocation3 + $0x18] sm:$0xff]  ;;  %v427_v2 = vld [vmem:[#allocation3 + $0x10] sm:$0xff]  ;;  %vm150_vm0 = vcmask 523264   ;;  %vm175_vm1 = vcmask 785408  }
  0x1a   :  { %161 = vmatpush.bf16.msra.mxu0 %v428_v1  ;;  %437 = vmatpush.bf16.msra.mxu3 %v428_v1  ;;  %v426_v3 = vld [vmem:[#allocation3 + $0x8] sm:$0xff]  ;;  %v425_v4 = vld [vmem:[#allocation3] sm:$0xff]  ;;  %v436_v10 = vld [vmem:[%s747_s6 + $0x38] sm:$0xff]  ;;  %v609_v25 = vmov 96.0   ;;  %v610_v40 = vmov 0  }
  0x1b   :  { %v107_v5 = vld [vmem:[%s741_s0] sm:$0xff]  ;;  %v108_v6 = vld [vmem:[%s741_s0 + $0x8] sm:$0xff]  ;;  %v109_v7 = vld [vmem:[%s741_s0 + $0x10] sm:$0xff]  ;;  %441 = vmatpush.bf16.msra.mxu2 %v436_v10  ;;  %334 = vmatpush.bf16.msra.mxu1 %v436_v10  ;;  %466 = vrcp.f32 %v609_v25 }
  0x1c   :  { %v121_v8 = vpack.c.bf16 %v108_v6, %v107_v5  ;;  %v122_v9 = vpack.c.bf16 %v109_v7, %v109_v7  ;;  %v435_v11 = vld [vmem:[%s747_s6 + $0x30] sm:$0xff]  ;;  %v461_v12 = vld [vmem:[%s743_s2] ss:$0 sm:$0xff]  ;;  %v434_v23 = vld [vmem:[%s747_s6 + $0x28] sm:$0xff]  ;;  %460 = vset.pattern.permute.xlu0 %v610_v40 }
  0x1d   :  { %v433_v24 = vld [vmem:[%s747_s6 + $0x20] sm:$0xff]  ;;  %v432_v26 = vld [vmem:[%s747_s6 + $0x18] sm:$0xff]  ;;  %v431_v28 = vld [vmem:[%s747_s6 + $0x10] sm:$0xff] }
  0x1e   :  { %162 = vmatpush.bf16.msra.mxu0 %v427_v2  ;;  %438 = vmatpush.bf16.msra.mxu3 %v427_v2  ;;  %v430_v30 = vld [vmem:[%s747_s6 + $0x8] sm:$0xff]  ;;  %v429_v32 = vld [vmem:[%s747_s6] sm:$0xff]  ;;  %v263_v34 = vld [vmem:[#allocation8 + $0x10] sm:$0xff] }
  0x1f   :  { %442 = vmatpush.bf16.msra.mxu2 %v435_v11  ;;  %335 = vmatpush.bf16.msra.mxu1 %v435_v11  ;;  %v282_v35 = vpack.c.bf16 %v263_v34, %v263_v34  ;;  %v261_v36 = vld [vmem:[#allocation8] sm:$0xff]  ;;  %v262_v37 = vld [vmem:[#allocation8 + $0x8] sm:$0xff]  ;;  %v462_v39 = vld [vmem:[#allocation2] ss:$0 sm:$0xff] }
  0x20   :  { %v281_v38 = vpack.c.bf16 %v262_v37, %v261_v36 }
  0x21   :  { %v467_v27 = vpop.eup %466 }
  0x22   :  { %163 = vmatpush.bf16.msra.mxu0 %v426_v3  ;;  %439 = vmatpush.bf16.msra.mxu3 %v426_v3  ;;  %v186_v29 = vmul.f32 96.0, %v467_v27  ;;  %vm190_vm2 = vweird.f32 %v467_v27 }
  0x23   :  { %443 = vmatpush.bf16.msra.mxu2 %v434_v23  ;;  %336 = vmatpush.bf16.msra.mxu1 %v434_v23 }
  0x24   :  { %v187_v31 = vsub.f32 1.0, %v186_v29 }
  0x26   :  { %164 = vmatpush.bf16.msra.mxu0 %v425_v4  ;;  %440 = vmatpush.bf16.msra.mxu3 %v425_v4  ;;  %v188_v33 = vmul.f32 %v467_v27, %v187_v31 }
  0x27   :  { %444 = vmatpush.bf16.msra.mxu2 %v433_v24  ;;  %337 = vmatpush.bf16.msra.mxu1 %v433_v24 }
  0x28   :  { %v189_v41 = vadd.f32 %v467_v27, %v188_v33 }
  0x29   :  { %391 = vmatmul.msk.bf16.vlgmr.msra.gmra.mxu0 %vm150_vm0, %v121_v8  ;;  %392 = vmatmul.msk.bf16.vlgmr.msra.gmra.mxu3 %vm150_vm0, %v122_v9 }
  0x2a   :  { %v191_v42 = vsel %vm190_vm2, %v467_v27, %v189_v41 }
  0x2b   :  { %445 = vmatpush.bf16.msra.mxu2 %v432_v26  ;;  %338 = vmatpush.bf16.msra.mxu1 %v432_v26 }
  0x2f   :  { %446 = vmatpush.bf16.msra.mxu2 %v431_v28  ;;  %339 = vmatpush.bf16.msra.mxu1 %v431_v28 }
  0x33   :  { %447 = vmatpush.bf16.msra.mxu2 %v430_v30  ;;  %340 = vmatpush.bf16.msra.mxu1 %v430_v30 }
  0x37   :  { %448 = vmatpush.bf16.msra.mxu2 %v429_v32  ;;  %341 = vmatpush.bf16.msra.mxu1 %v429_v32 }
  0x3a   :  { %347 = vmatmul.bf16.vlgmr.msra.gmra.mxu2 %v282_v35  ;;  %342 = vmatmul.bf16.vlgmr.msra.gmra.mxu1 %v281_v38 }
  0xa6   :  { %v166_v13 = vpop.f32.mrf.mxu0 }
  0xa7   :  { %v167_v14 = vadd.f32 %v461_v12, %v166_v13  ;;  %v464_v13 = vld [vmem:[#allocation5] ss:$0 sm:$0xff] }
  0xa9   :  { %v176_v15 = vsel %vm175_vm1, %v167_v14, 0.0 }
  0xaa   :  { %177 = vadd.xlane.f32.xlu0 %v176_v15 }
  0xac   :  { %v171_v16 = vpop.f32.mrf.mxu3 }
  0xad   :  { %v172_v17 = vadd.f32 %v461_v12, %v171_v16 }
  0xae   :  { %v168_v18 = vpop.f32.mrf.mxu0 }
  0xaf   :  { %v169_v19 = vadd.f32 %v461_v12, %v168_v18  ;;  %v182_v20 = vsel %vm175_vm1, %v172_v17, 0.0 }
  0xb0   :  { %183 = vadd.xlane.f32.xlu1 %v182_v20 }
  0xb1   :  { %v179_v21 = vsel %vm175_vm1, %v169_v19, 0.0 }
  0xb2   :  { %180 = vadd.xlane.f32.xlu0 %v179_v21 }
  0xb4   :  { %v173_v22 = vpop.f32.mrf.mxu3 }
  0xb7   :  { %v343_v15 = vpop.f32.mrf.mxu1 }
  0xbd   :  { %v725_v60 = vpop.f32.mrf.mxu2 }
  0xbf   :  { %v345_v35 = vpop.f32.mrf.mxu1 }
  0xc5   :  { %v350_v0 = vpop.f32.mrf.mxu2 }
  0xc6   :  { %356 = vperm.xlu0 %460, %v462_v39  }
 0x11d   :  { %v178_v43 = vpop.xlane.xlu0 %177 }
 0x11e   :  { %v192_v44 = vmul.f32 %v191_v42, %v178_v43 }
 0x120   :  { %v195_v45 = vsub.f32 %v167_v14, %v192_v44 }
 0x122   :  { %v198_v46 = vmul.f32 %v195_v45, %v195_v45 }
 0x123   :  { %v184_v48 = vpop.xlane.xlu1 %183 }
 0x124   :  { %v201_v47 = vsel %vm175_vm1, %v198_v46, 0.0  ;;  %v194_v51 = vmul.f32 %v191_v42, %v184_v48 }
 0x125   :  { %202 = vadd.xlane.f32.xlu1 %v201_v47  ;;  %v181_v49 = vpop.xlane.xlu0 %180 }
 0x126   :  { %v193_v50 = vmul.f32 %v191_v42, %v181_v49  ;;  %v719_v54 = vsub.f32 %v172_v17, %v194_v51  ;;  %v463_v17 = vld [vmem:[#allocation10] ss:$0 sm:$0xff] }
 0x127   :  { %v344_v25 = vadd.f32 %v463_v17, %v343_v15  ;;  %v346_v39 = vadd.f32 %v463_v17, %v345_v35  ;;  %v349_v48 = vadd.f32 %v463_v17, %v725_v60 }
 0x128   :  { %v196_v52 = vsub.f32 %v169_v19, %v193_v50  ;;  %v200_v56 = vmul.f32 %v719_v54, %v719_v54  ;;  %v465_v19 = vld [vmem:[#allocation7] ss:$0 sm:$0xff] }
 0x12a   :  { %v199_v53 = vmul.f32 %v196_v52, %v196_v52  ;;  %v207_v57 = vsel %vm175_vm1, %v200_v56, 0.0 }
 0x12c   :  { %v204_v55 = vsel %vm175_vm1, %v199_v53, 0.0 }
 0x12d   :  { %205 = vadd.xlane.f32.xlu2 %v204_v55 }
 0x135   :  { %208 = vadd.xlane.f32.xlu2 %v207_v57 }
 0x138   :  { %v357_v23 = vpop.permute.xlu0 %356 }
 0x198   :  { %v203_v58 = vpop.xlane.xlu1 %202 }
 0x199   :  { %v210_v59 = vmul.f32 %v203_v58, %v191_v42 }
 0x19b   :  { %v213_v61 = vadd.f32 1e-06, %v210_v59 }
 0x19d   :  { %468 = vrsqrt.f32 %v213_v61  ;;  %vm222_vm4 = vweird.f32 %v213_v61 }
 0x1a0   :  { %v206_v62 = vpop.xlane.xlu2 %205 }
 0x1a1   :  { %v211_v63 = vmul.f32 %v206_v62, %v191_v42 }
 0x1a3   :  { %v469_v1 = vpop.eup %468  ;;  %v214_v2 = vadd.f32 1e-06, %v211_v63 }
 0x1a4   :  { %v217_v3 = vmul.f32 %v469_v1, %v213_v61  ;;  %vm223_vm3 = vweird.f32 %v469_v1 }
 0x1a5   :  { %470 = vrsqrt.f32 %v214_v2  ;;  %vm224_vm5 = vmor %vm222_vm4, %vm223_vm3  ;;  %vm232_vm7 = vweird.f32 %v214_v2 }
 0x1a6   :  { %v218_v4 = vmul.f32 %v469_v1, %v217_v3 }
 0x1a8   :  { %v219_v5 = vmul.f32 0.5, %v218_v4  ;;  %v209_v6 = vpop.xlane.xlu2 %208 }
 0x1a9   :  { %v212_v7 = vmul.f32 %v209_v6, %v191_v42 }
 0x1aa   :  { %v220_v8 = vsub.f32 1.5, %v219_v5 }
 0x1ab   :  { %v471_v9 = vpop.eup %470  ;;  %v215_v10 = vadd.f32 1e-06, %v212_v7 }
 0x1ac   :  { %v221_v11 = vmul.f32 %v469_v1, %v220_v8  ;;  %v227_v12 = vmul.f32 %v471_v9, %v214_v2  ;;  %vm233_vm6 = vweird.f32 %v471_v9 }
 0x1ad   :  { %472 = vrsqrt.f32 %v215_v10  ;;  %vm234_vm8 = vmor %vm232_vm7, %vm233_vm6  ;;  %vm242_vm10 = vweird.f32 %v215_v10 }
 0x1ae   :  { %v228_v14 = vmul.f32 %v471_v9, %v227_v12  ;;  %v225_v16 = vsel %vm224_vm5, %v469_v1, %v221_v11 }
 0x1af   :  { %v246_v18 = vmul.f32 %v225_v16, %v195_v45 }
 0x1b0   :  { %v229_v20 = vmul.f32 0.5, %v228_v14 }
 0x1b1   :  { %v252_v21 = vmul.f32 %v464_v13, %v246_v18 }
 0x1b2   :  { %v230_v22 = vsub.f32 1.5, %v229_v20 }
 0x1b3   :  { %v473_v24 = vpop.eup %472  ;;  %v258_v26 = vadd.f32 %v465_v19, %v252_v21 }
 0x1b4   :  { %v231_v27 = vmul.f32 %v471_v9, %v230_v22  ;;  %v237_v28 = vmul.f32 %v473_v24, %v215_v10  ;;  %vm243_vm9 = vweird.f32 %v473_v24 }
 0x1b5   :  { %v359_v29 = vmul.f32 %v357_v23, %v258_v26  ;;  %vm244_vm11 = vmor %vm242_vm10, %vm243_vm9 }
 0x1b6   :  { %v238_v30 = vmul.f32 %v473_v24, %v237_v28  ;;  %v235_v31 = vsel %vm234_vm8, %v471_v9, %v231_v27 }
 0x1b7   :  { %v247_v32 = vmul.f32 %v235_v31, %v196_v52  ;;  %v362_v33 = vadd.f32 %v359_v29, %v344_v25 }
 0x1b8   :  { %v239_v34 = vmul.f32 0.5, %v238_v30 }
 0x1b9   :  { %v253_v36 = vmul.f32 %v464_v13, %v247_v32  ;;  %365 = vst.msk [vmem:[%s750_s9] sm:$0xff] %vm175_vm1, %v362_v33 }
 0x1ba   :  { %v240_v37 = vsub.f32 1.5, %v239_v34 }
 0x1bb   :  { %v259_v38 = vadd.f32 %v465_v19, %v253_v36 }
 0x1bc   :  { %v241_v40 = vmul.f32 %v473_v24, %v240_v37 }
 0x1bd   :  { %v360_v41 = vmul.f32 %v357_v23, %v259_v38 }
 0x1be   :  { %v245_v42 = vsel %vm244_vm11, %v473_v24, %v241_v40 }
 0x1bf   :  { %v248_v43 = vmul.f32 %v245_v42, %v719_v54  ;;  %v363_v44 = vadd.f32 %v360_v41, %v346_v39 }
 0x1c1   :  { %v254_v45 = vmul.f32 %v464_v13, %v248_v43  ;;  %366 = vst.msk [vmem:[%s750_s9 + $0x8] sm:$0xff] %vm175_vm1, %v363_v44 }
 0x1c3   :  { %v260_v46 = vadd.f32 %v465_v19, %v254_v45 }
 0x1c5   :  { %v361_v47 = vmul.f32 %v357_v23, %v260_v46 }
 0x1c7   :  { %v364_v49 = vadd.f32 %v361_v47, %v349_v48 }
 0x1c9   :  { %367 = vst.msk [vmem:[%s750_s9 + $0x10] sm:$0xff] %vm175_vm1, %v364_v49 }
 0x1ca   :  { %372 = vsyncpa [#allocation4], 1 }
 0x1cb   :  { %373 = vsyncpa [#allocation6], 1 }
 0x1cc   :  { %374 = vsyncpa [#allocation9], 1 }

// kernel: fwd.6
= control target key start
LH: loop header
LB: loop body
LE: loop exit
PB: predicated region body
PF: predicated region fallthrough
CT: control target
= control target key end

     0   :  { %s3365_s0 = inlined_call_operand.vmem [shape: f32[24,96], index: 0, kind: input, shape index: {}]   ;;  %s3366_s1 = inlined_call_operand.vmem [shape: f32[24,24], index: 1, kind: input, shape index: {}]   ;;  %s3367_s2 = inlined_call_operand.vmem [shape: f32[1,96], index: 2, kind: input, shape index: {}]   ;;  %s3368_s3 = inlined_call_operand.hbm [shape: f32[1,96], index: 3, kind: input, shape index: {}]   ;;  %s3369_s4 = inlined_call_operand.vmem [shape: bf16[96,288], index: 4, kind: input, shape index: {}]   ;;  %s3370_s5 = inlined_call_operand.hbm [shape: f32[1,288], index: 5, kind: input, shape index: {}]   ;;  %s3371_s6 = inlined_call_operand.vmem [shape: bf16[96,96], index: 6, kind: input, shape index: {}]   ;;  %s3372_s7 = inlined_call_operand.hbm [shape: f32[1,96], index: 7, kind: input, shape index: {}]   ;;  %s3373_s8 = inlined_call_operand.hbm [shape: f32[1,96], index: 8, kind: input, shape index: {}]   ;;  %s3374_s9 = inlined_call_operand.hbm [shape: f32[1,96], index: 9, kind: input, shape index: {}]   ;;  %s3375_s10 = inlined_call_operand.hbm [shape: f32[1,96], index: 10, kind: input, shape index: {}]   ;;  %s3376_s11 = inlined_call_operand.hbm [shape: bf16[96,384], index: 11, kind: input, shape index: {}]   ;;  %s3377_s12 = inlined_call_operand.hbm [shape: f32[1,384], index: 12, kind: input, shape index: {}]   ;;  %s3378_s13 = inlined_call_operand.vmem [shape: bf16[384,96], index: 13, kind: input, shape index: {}]   ;;  %s3379_s14 = inlined_call_operand.hbm [shape: f32[1,96], index: 14, kind: input, shape index: {}]   ;;  %s3380_s15 = inlined_call_operand.hbm [shape: f32[1,96], index: 15, kind: input, shape index: {}]   ;;  %s3381_s16 = inlined_call_operand.vmem [shape: f32[24,96], index: 16, kind: output, shape index: {}]  }
   0x1   :  { %3383 = sst [smem:[#allocation24_spill]] %s3365_s0 }
   0x2   :  { %21 = vsyncpa [#allocation3], 0 }
   0x3   :  { %22 = vsyncpa [#allocation5], 0 }
   0x4   :  { %23 = vsyncpa [#allocation8], 0 }
   0x5   :  { %24 = vsyncpa [#allocation11], 0 }
   0x6   :  { %25 = vsyncpa [#allocation14], 0  ;;  %s51_s23 = sshll.u32 %s3370_s5, 4  ;;  %s52_s23 = int_to_ptr.hbm [resolvable:$true] %s51_s23 }
   0x7   :  { %26 = vsyncpa [#allocation17], 0  ;;  %s2529_s24 = smov [#allocation4]   ;;  %s75_s28 = sshll.u32 %s3373_s8, 4  ;;  %s76_s28 = int_to_ptr.hbm [resolvable:$true] %s75_s28 }
   0x8   :  { %s53_s25 = sshll.u32 %s2529_s24, 4  ;;  %s2530_s29 = smov [#allocation7]   ;;  %s54_s25 = int_to_ptr.vmem [resolvable:$true] %s53_s25 }
   0x9   :  { %56 = dma.hbm_to_vmem [thread:$0]  %s52_s23, 48, %s54_s25, [#allocation5]  }
   0xa   :  { %s77_s30 = sshll.u32 %s2530_s29, 4  ;;  %s97_s18 = sshll.u32 %s3375_s10, 4  ;;  %s78_s30 = int_to_ptr.vmem [resolvable:$true] %s77_s30  ;;  %s98_s18 = int_to_ptr.hbm [resolvable:$true] %s97_s18 }
   0xb   :  { %80 = dma.hbm_to_vmem [thread:$0]  %s76_s28, 16, %s78_s30, [#allocation8]  }
   0xc   :  { %s121_s20 = sshll.u32 %s3377_s12, 4  ;;  %s2531_s21 = smov [#allocation10]   ;;  %s122_s20 = int_to_ptr.hbm [resolvable:$true] %s121_s20 }
   0xd   :  { %s99_s22 = sshll.u32 %s2531_s21, 4  ;;  %s2532_s8 = smov [#allocation13]   ;;  %s100_s22 = int_to_ptr.vmem [resolvable:$true] %s99_s22 }
   0xe   :  { %102 = dma.hbm_to_vmem [thread:$0]  %s98_s18, 16, %s100_s22, [#allocation11]  }
   0xf   :  { %s123_s23 = sshll.u32 %s2532_s8, 4  ;;  %s38_s26 = sshll.u32 %s3368_s3, 4  ;;  %s124_s23 = int_to_ptr.vmem [resolvable:$true] %s123_s23  ;;  %s39_s26 = int_to_ptr.hbm [resolvable:$true] %s38_s26 }
  0x10   :  { %126 = dma.hbm_to_vmem [thread:$0]  %s122_s20, 48, %s124_s23, [#allocation14]  }
  0x11   :  { %s64_s28 = sshll.u32 %s3372_s7, 4  ;;  %s2533_s29 = smov [#allocation2]   ;;  %s65_s28 = int_to_ptr.hbm [resolvable:$true] %s64_s28 }
  0x12   :  { %s40_s12 = sshll.u32 %s2533_s29, 4  ;;  %s2534_s30 = smov [#allocation6]   ;;  %s41_s12 = int_to_ptr.vmem [resolvable:$true] %s40_s12 }
  0x13   :  { %43 = dma.hbm_to_vmem [thread:$0]  %s39_s26, 16, %s41_s12, [#allocation3]  }
  0x14   :  { %s66_s0 = sshll.u32 %s2534_s30, 4  ;;  %s86_s5 = sshll.u32 %s3374_s9, 4  ;;  %s67_s0 = int_to_ptr.vmem [resolvable:$true] %s66_s0  ;;  %s87_s5 = int_to_ptr.hbm [resolvable:$true] %s86_s5 }
  0x15   :  { %69 = dma.hbm_to_vmem [thread:$0]  %s65_s28, 16, %s67_s0, [#allocation5]  }
  0x16   :  { %s107_s20 = sshll.u32 %s3376_s11, 4  ;;  %s2535_s21 = smov [#allocation9]   ;;  %s108_s20 = int_to_ptr.hbm [resolvable:$true] %s107_s20 }
  0x17   :  { %s88_s7 = sshll.u32 %s2535_s21, 4  ;;  %s2536_s22 = smov [#allocation12]   ;;  %s89_s7 = int_to_ptr.vmem [resolvable:$true] %s88_s7 }
  0x18   :  { %91 = dma.hbm_to_vmem [thread:$0]  %s87_s5, 16, %s89_s7, [#allocation8]  }
  0x19   :  { %s109_s8 = sshll.u32 %s2536_s22, 4  ;;  %s2537_s23 = smov 192   ;;  %s110_s8 = int_to_ptr.vmem [resolvable:$true] %s109_s8 }
  0x1a   :  { %s2538_s24 = smov 12   ;;  %s134_s26 = sshll.u32 %s3379_s14, 4  ;;  %s135_s26 = int_to_ptr.hbm [resolvable:$true] %s134_s26 }
  0x1b   :  { %115 = dma.hbm_to_vmem [thread:$0]  %s108_s20, 2304, %s110_s8, [#allocation11], %s2537_s23, %s2537_s23, %s2538_s24  }
  0x1c   :  { %s2539_s10 = smov [#allocation15]   ;;  %s145_s29 = sshll.u32 %s3380_s15, 4  ;;  %s146_s29 = int_to_ptr.hbm [resolvable:$true] %s145_s29 }
  0x1d   :  { %s136_s27 = sshll.u32 %s2539_s10, 4  ;;  %s2540_s12 = smov [#allocation16]   ;;  %s137_s27 = int_to_ptr.vmem [resolvable:$true] %s136_s27 }
  0x1e   :  { %139 = dma.hbm_to_vmem [thread:$0]  %s135_s26, 16, %s137_s27, [#allocation14]  }
  0x1f   :  { %s147_s30 = sshll.u32 %s2540_s12, 4  ;;  %s148_s30 = int_to_ptr.vmem [resolvable:$true] %s147_s30 }
  0x20   :  { %150 = dma.hbm_to_vmem [thread:$0]  %s146_s29, 16, %s148_s30, [#allocation17]  }
  0x21   :  { %2517 = dma.done.wait [#allocation3], 16  }
  0x22   :  { %2518 = vsyncadd [#allocation3], 4294967280 }
  0x23   :  { %2519 = dma.done.wait [#allocation5], 64  }
  0x24   :  { %2520 = vsyncadd [#allocation5], 4294967232 }
  0x25   :  { %2521 = dma.done.wait [#allocation8], 32  }
  0x26   :  { %2522 = vsyncadd [#allocation8], 4294967264 }
  0x27   :  { %2523 = dma.done.wait [#allocation11], 2320  }
  0x28   :  { %2524 = vsyncadd [#allocation11], 4294964976 }
  0x29   :  { %2525 = dma.done.wait [#allocation14], 64  }
  0x2a   :  { %2526 = vsyncadd [#allocation14], 4294967232 }
  0x2b   :  { %2527 = dma.done.wait [#allocation17], 16  }
  0x2c   :  { %2528 = vsyncadd [#allocation17], 4294967280  ;;  %vm202_vm0 = vcmask 785408   ;;  %s3384_s0 = sld [smem:[#allocation24_spill]]  ;;  %v2541_v6 = vmov 96.0   ;;  %s2544_s20 = smov 64  }
  0x2d   :  { %2194 = vrcp.f32 %v2541_v6  ;;  %v1868_v28 = vld [vmem:[%s3369_s4 + $0x78] sm:$0xf]  ;;  %v2116_v29 = vld [vmem:[%s3369_s4 + $0x80] sm:$0xf0]  ;;  %v2115_v30 = vld [vmem:[%s3369_s4 + $0x7c] sm:$0xf] }
  0x2e   :  { %v1869_v31 = vor.u32 %v2116_v29, %v1868_v28  ;;  %v1870_v32 = vld [vmem:[%s3369_s4 + $0x84] sm:$0xf0]  ;;  %v1876_v33 = vld [vmem:[%s3369_s4 + $0x80] sm:$0xf]  ;;  %v2117_v34 = vld [vmem:[%s3369_s4 + $0x88] sm:$0xf0] }
  0x2f   :  { %v1873_v35 = vor.u32 %v2115_v30, %v1870_v32  ;;  %v1877_v36 = vor.u32 %v2117_v34, %v1876_v33  ;;  %v1856_v37 = vld [vmem:[%s3369_s4 + $0x60] sm:$0xf]  ;;  %v2113_v38 = vld [vmem:[%s3369_s4 + $0x68] sm:$0xf0]  ;;  %v2112_v39 = vld [vmem:[%s3369_s4 + $0x64] sm:$0xf] }
  0x30   :  { %426 = vmatpush.bf16.msra.mxu0 %v1869_v31  ;;  %v1857_v40 = vor.u32 %v2113_v38, %v1856_v37  ;;  %v1858_v41 = vld [vmem:[%s3369_s4 + $0x6c] sm:$0xf0]  ;;  %v1864_v42 = vld [vmem:[%s3369_s4 + $0x68] sm:$0xf]  ;;  %v2114_v43 = vld [vmem:[%s3369_s4 + $0x70] sm:$0xf0] }
  0x31   :  { %444 = vmatpush.bf16.msra.mxu1 %v1873_v35  ;;  %462 = vmatpush.bf16.msra.mxu2 %v1877_v36  ;;  %v1861_v44 = vor.u32 %v2112_v39, %v1858_v41  ;;  %v1865_v45 = vor.u32 %v2114_v43, %v1864_v42  ;;  %v1844_v46 = vld [vmem:[%s3369_s4 + $0x48] sm:$0xf]  ;;  %v2110_v47 = vld [vmem:[%s3369_s4 + $0x50] sm:$0xf0]  ;;  %v2109_v48 = vld [vmem:[%s3369_s4 + $0x4c] sm:$0xf] }
  0x32   :  { %v194_v0 = vld [vmem:[%s3384_s0] sm:$0xff]  ;;  %v196_v1 = vld [vmem:[%s3384_s0 + $0x10] sm:$0xff]  ;;  %v195_v4 = vld [vmem:[%s3384_s0 + $0x8] sm:$0xff]  ;;  %v1845_v49 = vor.u32 %v2110_v47, %v1844_v46 }
  0x33   :  { %v203_v2 = vsel %vm202_vm0, %v194_v0, 0.0  ;;  %v209_v3 = vsel %vm202_vm0, %v196_v1, 0.0  ;;  %v206_v5 = vsel %vm202_vm0, %v195_v4, 0.0  ;;  %v2195_v7 = vpop.eup %2194  ;;  %v1846_v50 = vld [vmem:[%s3369_s4 + $0x54] sm:$0xf0] }
  0x34   :  { %204 = vadd.xlane.f32.xlu0 %v203_v2  ;;  %210 = vadd.xlane.f32.xlu1 %v209_v3  ;;  %v213_v8 = vmul.f32 96.0, %v2195_v7  ;;  %vm217_vm1 = vweird.f32 %v2195_v7  ;;  %v1852_v51 = vld [vmem:[%s3369_s4 + $0x50] sm:$0xf]  ;;  %v2111_v52 = vld [vmem:[%s3369_s4 + $0x58] sm:$0xf0]  ;;  %v1849_v53 = vor.u32 %v2109_v48, %v1846_v50 }
  0x35   :  { %427 = vmatpush.bf16.msra.mxu0 %v1857_v40  ;;  %445 = vmatpush.bf16.msra.mxu1 %v1861_v44  ;;  %v1853_v54 = vor.u32 %v2111_v52, %v1852_v51  ;;  %v1832_v55 = vld [vmem:[%s3369_s4 + $0x30] sm:$0xf]  ;;  %v2107_v56 = vld [vmem:[%s3369_s4 + $0x38] sm:$0xf0]  ;;  %v2106_v57 = vld [vmem:[%s3369_s4 + $0x34] sm:$0xf] }
  0x36   :  { %v214_v9 = vsub.f32 1.0, %v213_v8  ;;  %463 = vmatpush.bf16.msra.mxu2 %v1865_v45  ;;  %v1833_v58 = vor.u32 %v2107_v56, %v1832_v55  ;;  %v1834_v59 = vld [vmem:[%s3369_s4 + $0x3c] sm:$0xf0]  ;;  %v1840_v60 = vld [vmem:[%s3369_s4 + $0x38] sm:$0xf] }
  0x37   :  { %v2108_v61 = vld [vmem:[%s3369_s4 + $0x40] sm:$0xf0]  ;;  %v1837_v62 = vor.u32 %v2106_v57, %v1834_v59  ;;  %v2103_v2 = vld [vmem:[%s3369_s4 + $0x1c] sm:$0xf]  ;;  %v2105_v6 = vld [vmem:[%s3369_s4 + $0x28] sm:$0xf0] }
  0x38   :  { %v215_v10 = vmul.f32 %v2195_v7, %v214_v9  ;;  %v1841_v63 = vor.u32 %v2108_v61, %v1840_v60  ;;  %v2186_v45 = vld [vmem:[%s3367_s2] ss:$0 sm:$0xff]  ;;  %s2542_s2 = smov 32  }
  0x39   :  { %428 = vmatpush.bf16.msra.mxu0 %v1845_v49  ;;  %446 = vmatpush.bf16.msra.mxu1 %v1849_v53  ;;  %v2187_v52 = vld [vmem:[#allocation2] ss:$0 sm:$0xff] }
  0x3a   :  { %v216_v11 = vadd.f32 %v2195_v7, %v215_v10  ;;  %464 = vmatpush.bf16.msra.mxu2 %v1853_v54 }
  0x3c   :  { %207 = vadd.xlane.f32.xlu0 %v206_v5  ;;  %v2672_v12 = vsel %vm217_vm1, %v2195_v7, %v216_v11  ;;  %v1828_v5 = vld [vmem:[%s3369_s4 + $0x20] sm:$0xf] }
  0x3d   :  { %429 = vmatpush.bf16.msra.mxu0 %v1833_v58  ;;  %447 = vmatpush.bf16.msra.mxu1 %v1837_v62  ;;  %v1829_v8 = vor.u32 %v2105_v6, %v1828_v5  ;;  %v1808_v11 = vld [vmem:[%s3369_s4] sm:$0xf] }
  0x3e   :  { %465 = vmatpush.bf16.msra.mxu2 %v1841_v63  ;;  %v485_v63 = vlaneseq }
  0x42   :  { %466 = vmatpush.bf16.msra.mxu2 %v1829_v8 }
  0xa7   :  { %v205_v13 = vpop.xlane.xlu0 %204  ;;  %v211_v17 = vpop.xlane.xlu1 %210 }
  0xa8   :  { %v219_v14 = vmul.f32 %v2672_v12, %v205_v13  ;;  %v221_v21 = vmul.f32 %v2672_v12, %v211_v17  ;;  %v2101_v13 = vld [vmem:[%s3369_s4 + $0x8] sm:$0xf0]  ;;  %v1810_v17 = vld [vmem:[%s3369_s4 + $0xc] sm:$0xf0] }
  0xaa   :  { %v2675_v15 = vsub.f32 %v194_v0, %v219_v14  ;;  %v2684_v23 = vsub.f32 %v196_v1, %v221_v21  ;;  %v1820_v0 = vld [vmem:[%s3369_s4 + $0x18] sm:$0xf]  ;;  %v2104_v1 = vld [vmem:[%s3369_s4 + $0x20] sm:$0xf0] }
  0xab   :  { %v1821_v3 = vor.u32 %v2104_v1, %v1820_v0  ;;  %v2100_v14 = vld [vmem:[%s3369_s4 + $0x4] sm:$0xf]  ;;  %v2815_v0 = vand.u32 127, %v485_v63 }
  0xac   :  { %v225_v16 = vmul.f32 %v2675_v15, %v2675_v15  ;;  %v227_v26 = vmul.f32 %v2684_v23, %v2684_v23  ;;  %v1813_v21 = vor.u32 %v2100_v14, %v1810_v17  ;;  %v314_v1 = vld [vmem:[#allocation4] sm:$0x7] }
  0xad   :  { %430 = vmatpush.bf16.msra.mxu0 %v1821_v3  ;;  %vm604_vm11 = vcmp.ge.s32.totalorder %v2815_v0, 24  ;;  %vm605_vm12 = vcmp.lt.s32.totalorder %v2815_v0, 48  ;;  %v318_v8 = vperm.slane %v314_v1, 2  ;;  %vm798_vm14 = vcmp.ge.s32.totalorder %v2815_v0, 48 }
  0xae   :  { %v228_v18 = vsel %vm202_vm0, %v225_v16, 0.0  ;;  %v234_v27 = vsel %vm202_vm0, %v227_v26, 0.0  ;;  %v1809_v16 = vor.u32 %v2101_v13, %v1808_v11  ;;  %vm2819_vm13 = vmand %vm604_vm11, %vm605_vm12  ;;  %vm799_vm15 = vcmp.lt.s32.totalorder %v2815_v0, 72 }
  0xaf   :  { %229 = vadd.xlane.f32.xlu1 %v228_v18  ;;  %v208_v19 = vpop.xlane.xlu0 %207  ;;  %v1816_v18 = vld [vmem:[%s3369_s4 + $0x8] sm:$0xf]  ;;  %vm943_vm1 = vcmp.ge.s32.totalorder %v2815_v0, 72 }
  0xb0   :  { %v220_v20 = vmul.f32 %v2672_v12, %v208_v19  ;;  %v2102_v19 = vld [vmem:[%s3369_s4 + $0x10] sm:$0xf0] }
  0xb1   :  { %431 = vmatpush.bf16.msra.mxu0 %v1809_v16 }
  0xb2   :  { %v2682_v22 = vsub.f32 %v195_v4, %v220_v20  ;;  %v1822_v4 = vld [vmem:[%s3369_s4 + $0x24] sm:$0xf0] }
  0xb3   :  { %v1825_v7 = vor.u32 %v2103_v2, %v1822_v4  ;;  %v316_v2 = vperm.slane %v314_v1, 0 }
  0xb4   :  { %v226_v24 = vmul.f32 %v2682_v22, %v2682_v22 }
  0xb5   :  { %448 = vmatpush.bf16.msra.mxu1 %v1825_v7  ;;  %v317_v7 = vperm.slane %v314_v1, 1 }
  0xb6   :  { %v231_v25 = vsel %vm202_vm0, %v226_v24, 0.0  ;;  %v1817_v24 = vor.u32 %v2102_v19, %v1816_v18 }
  0xb7   :  { %232 = vadd.xlane.f32.xlu2 %v231_v25 }
  0xb8   :  { %467 = vmatpush.bf16.msra.mxu2 %v1817_v24 }
  0xb9   :  { %449 = vmatpush.bf16.msra.mxu1 %v1813_v21 }
  0xbf   :  { %235 = vadd.xlane.f32.xlu2 %v234_v27 }
 0x122   :  { %v230_v9 = vpop.xlane.xlu1 %229 }
 0x123   :  { %v237_v10 = vmul.f32 %v230_v9, %v2672_v12 }
 0x125   :  { %v240_v20 = vadd.f32 1e-06, %v237_v10 }
 0x127   :  { %2196 = vrsqrt.f32 %v240_v20  ;;  %vm249_vm3 = vweird.f32 %v240_v20 }
 0x12a   :  { %v233_v25 = vpop.xlane.xlu2 %232 }
 0x12b   :  { %v238_v26 = vmul.f32 %v233_v25, %v2672_v12 }
 0x12d   :  { %v2197_v27 = vpop.eup %2196  ;;  %v241_v28 = vadd.f32 1e-06, %v238_v26 }
 0x12e   :  { %v244_v29 = vmul.f32 %v2197_v27, %v240_v20  ;;  %vm250_vm2 = vweird.f32 %v2197_v27 }
 0x12f   :  { %2198 = vrsqrt.f32 %v241_v28  ;;  %vm251_vm4 = vmor %vm249_vm3, %vm250_vm2  ;;  %vm259_vm6 = vweird.f32 %v241_v28  ;;  %vm944_vm2 = vcmp.lt.s32.totalorder %v2815_v0, 96  ;;  %vm488_vm3 = vcmp.lt.s32.totalorder %v2815_v0, 24 }
 0x130   :  { %v245_v30 = vmul.f32 %v2197_v27, %v244_v29 }
 0x132   :  { %v246_v31 = vmul.f32 0.5, %v245_v30  ;;  %v236_v32 = vpop.xlane.xlu2 %235 }
 0x133   :  { %v239_v33 = vmul.f32 %v236_v32, %v2672_v12 }
 0x134   :  { %v247_v34 = vsub.f32 1.5, %v246_v31 }
 0x135   :  { %v2199_v35 = vpop.eup %2198  ;;  %v242_v36 = vadd.f32 1e-06, %v239_v33 }
 0x136   :  { %v248_v37 = vmul.f32 %v2197_v27, %v247_v34  ;;  %v254_v38 = vmul.f32 %v2199_v35, %v241_v28  ;;  %vm260_vm5 = vweird.f32 %v2199_v35 }
 0x137   :  { %2200 = vrsqrt.f32 %v242_v36  ;;  %vm261_vm7 = vmor %vm259_vm6, %vm260_vm5  ;;  %vm269_vm8 = vweird.f32 %v242_v36 }
 0x138   :  { %v255_v39 = vmul.f32 %v2199_v35, %v254_v38  ;;  %v252_v40 = vsel %vm251_vm4, %v2197_v27, %v248_v37  ;;  %vm2830_vm4 = vmand %vm798_vm14, %vm799_vm15 }
 0x139   :  { %v273_v44 = vmul.f32 %v252_v40, %v2675_v15  ;;  %vm2834_vm5 = vmand %vm943_vm1, %vm944_vm2 }
 0x13a   :  { %v256_v41 = vmul.f32 0.5, %v255_v39  ;;  %vm677_vm6 = vmpackc.low %vm2819_vm13, %vm2819_vm13 }
 0x13b   :  { %v279_v51 = vmul.f32 %v2186_v45, %v273_v44  ;;  %vm871_vm15 = vmpackc.low %vm2830_vm4, %vm2830_vm4 }
 0x13c   :  { %v257_v42 = vsub.f32 1.5, %v256_v41  ;;  %vm585_vm2 = vmpackc.low %vm488_vm3, %vm488_vm3 }
 0x13d   :  { %v2201_v43 = vpop.eup %2200  ;;  %v285_v15 = vadd.f32 %v2187_v52, %v279_v51 }
 0x13e   :  { %v258_v46 = vmul.f32 %v2199_v35, %v257_v42  ;;  %v264_v47 = vmul.f32 %v2201_v43, %v242_v36  ;;  %vm270_vm9 = vweird.f32 %v2201_v43 }
 0x13f   :  { %vm271_vm10 = vmor %vm269_vm8, %vm270_vm9  ;;  %vm590_vm8 = vcmask 523264  }
 0x140   :  { %v262_v48 = vsel %vm261_vm7, %v2199_v35, %v258_v46  ;;  %v265_v49 = vmul.f32 %v2201_v43, %v264_v47  ;;  %vm509_vm7 = vcmask 261120  }
 0x141   :  { %v274_v50 = vmul.f32 %v262_v48, %v2682_v22 }
 0x142   :  { %v266_v53 = vmul.f32 0.5, %v265_v49 }
 0x143   :  { %v280_v54 = vmul.f32 %v2186_v45, %v274_v50 }
 0x144   :  { %v267_v55 = vsub.f32 1.5, %v266_v53 }
 0x145   :  { %v286_v56 = vadd.f32 %v2187_v52, %v280_v54 }
 0x146   :  { %v268_v57 = vmul.f32 %v2201_v43, %v267_v55 }
 0x147   :  { %v312_v58 = vpack.c.bf16 %v286_v56, %v285_v15 }
 0x148   :  { %v272_v59 = vsel %vm271_vm10, %v2201_v43, %v268_v57 }
 0x149   :  { %1878 = vmatmul.msk.bf16.vlgmr.msra.gmra.mxu0 %vm202_vm0, %v312_v58  ;;  %1880 = vmatmul.msk.bf16.vlgmr.msra.gmra.mxu1 %vm202_vm0, %v312_v58  ;;  %v275_v22 = vmul.f32 %v272_v59, %v2684_v23 }
 0x14a   :  { %1882 = vmatmul.msk.bf16.vlgmr.msra.gmra.mxu2 %vm202_vm0, %v312_v58 }
 0x14b   :  { %v281_v60 = vmul.f32 %v2186_v45, %v275_v22 }
 0x14d   :  { %v287_v61 = vadd.f32 %v2187_v52, %v281_v60  ;;  %v2543_v52 = vmov 0  }
 0x14e   :  { %v678_v53 = vsel %vm677_vm6, 65537, %v2543_v52  ;;  %v2897_v1 = vunpack.c.l.b16 %v2543_v52 }
 0x14f   :  { %v313_v62 = vpack.c.bf16 %v287_v61, %v287_v61 }
 0x159   :  { %1879 = vmatmul.msk.bf16.gmra.mxu0 %vm202_vm0, %v313_v62  ;;  %1881 = vmatmul.msk.bf16.gmra.mxu1 %vm202_vm0, %v313_v62 }
 0x15a   :  { %1883 = vmatmul.msk.bf16.gmra.mxu2 %vm202_vm0, %v313_v62 }
 0x1c6   :  { %v433_v3 = vpop.f32.mrf.mxu0  ;;  %v451_v23 = vpop.f32.mrf.mxu1 }
 0x1c7   :  { %v434_v5 = vadd.f32 %v433_v3, %v316_v2  ;;  %v452_v11 = vadd.f32 %v451_v23, %v317_v7 }
 0x1c9   :  { %v609_v6 = vsel %vm2819_vm13, %v434_v5, 0.0  ;;  %v2842_v20 = vsel %vm488_vm3, %v434_v5, 0.0  ;;  %v803_v21 = vsel %vm2830_vm4, %v434_v5, 0.0  ;;  %v948_v27 = vsel %vm2834_vm5, %v434_v5, 0.0 }
 0x1cd   :  { %v469_v9 = vpop.f32.mrf.mxu2 }
 0x1ce   :  { %v470_v13 = vadd.f32 %v469_v9, %v318_v8  ;;  %v435_v14 = vpop.f32.mrf.mxu0  ;;  %v453_v16 = vpop.f32.mrf.mxu1 }
 0x1cf   :  { %v436_v18 = vadd.f32 %v435_v14, %v316_v2  ;;  %v454_v35 = vadd.f32 %v453_v16, %v317_v7 }
 0x1d0   :  { %v2838_v19 = vpack.c.bf16 %v470_v13, %v452_v11 }
 0x1d1   :  { %v478_v24 = vpack.c.bf16 %v436_v18, %v434_v5  ;;  %v493_v25 = vsel %vm488_vm3, %v436_v18, 0.0  ;;  %v610_v26 = vsel %vm2819_vm13, %v436_v18, 0.0  ;;  %v804_v30 = vsel %vm2830_vm4, %v436_v18, 0.0 }
 0x1d2   :  { %v495_v28 = vpack.c.bf16 %v493_v25, %v2842_v20  ;;  %v2853_v29 = vpack.c.bf16 %v610_v26, %v609_v6  ;;  %v949_v31 = vsel %vm2834_vm5, %v436_v18, 0.0  ;;  %v2859_v32 = vpack.c.bf16 %v804_v30, %v803_v21 }
 0x1d3   :  { %501 = vrot.lane.b32.xlu2 %v478_v24, %s2542_s2  ;;  %v2861_v33 = vpack.c.bf16 %v949_v31, %v948_v27  ;;  %v479_v50 = vpack.c.bf16 %v454_v35, %v452_v11  ;;  %v2932_v27 = vld [vmem:[%s3366_s1] sm:$0xff] }
 0x1d4   :  { %vm545_vm12 = vcmp.gt.f32.partialorder %v2932_v27, 0.0 }
 0x1d5   :  { %v471_v34 = vpop.f32.mrf.mxu2 }
 0x1d6   :  { %v472_v36 = vadd.f32 %v471_v34, %v318_v8  ;;  %v438_v37 = vpop.f32.mrf.mxu0  ;;  %v456_v38 = vpop.f32.mrf.mxu1  ;;  %v2941_v34 = vld [vmem:[%s3366_s1 + $0x8] sm:$0xff] }
 0x1d7   :  { %v2863_v39 = vadd.f32 %v438_v37, %v316_v2  ;;  %v457_v40 = vadd.f32 %v456_v38, %v317_v7  ;;  %v2900_v2 = vunpack.c.h.b16 %v2543_v52  ;;  %vm546_vm14 = vcmp.gt.f32.partialorder %v2941_v34, 0.0 }
 0x1d8   :  { %v2865_v41 = vpack.c.bf16 %v472_v36, %v454_v35 }
 0x1d9   :  { %v481_v42 = vpack.c.bf16 %v457_v40, %v457_v40  ;;  %v480_v43 = vpack.c.bf16 %v2863_v39, %v2863_v39  ;;  %v2872_v44 = vsel %vm2819_vm13, %v2863_v39, 0.0  ;;  %v494_v60 = vsel %vm488_vm3, %v2863_v39, 0.0 }
 0x1da   :  { %v496_v62 = vpack.c.bf16 %v494_v60, %v494_v60  ;;  %v805_v16 = vsel %vm2830_vm4, %v2863_v39, 0.0  ;;  %v613_v18 = vpack.c.bf16 %v2872_v44, %v2872_v44  ;;  %vm551_vm13 = vcmask 195584   ;;  %vm1016_vm4 = vmpackc.low %vm2834_vm5, %vm2834_vm5 }
 0x1db   :  { %507 = vrot.lane.b32.xlu1 %v481_v42, %s2542_s2  ;;  %505 = vrot.lane.b32.xlu0 %v480_v43, %s2542_s2  ;;  %v807_v20 = vpack.c.bf16 %v805_v16, %v805_v16  ;;  %vm725_vm3 = vcmask 1043456  }
 0x1dd   :  { %v474_v45 = vpop.f32.mrf.mxu2 }
 0x1de   :  { %v475_v46 = vadd.f32 %v474_v45, %v318_v8  ;;  %v440_v47 = vpop.f32.mrf.mxu0  ;;  %v458_v48 = vpop.f32.mrf.mxu1 }
 0x1e0   :  { %v2874_v49 = vpack.c.bf16 %v475_v46, %v457_v40 }
 0x1e3   :  { %503 = vrot.lane.b32.xlu0 %v479_v50, %s2542_s2 }
 0x1e5   :  { %v476_v51 = vpop.f32.mrf.mxu2 }
 0x1eb   :  { %679 = vrot.lane.b32.xlu0 %v678_v53, %s2544_s20 }
 0x22d   :  { %v502_v57 = vpop.permute.xlu2 %501 }
 0x24d   :  { %v508_v54 = vpop.permute.xlu1 %507  ;;  %v506_v55 = vpop.permute.xlu0 %505 }
 0x24e   :  { %v511_v15 = vsel %vm509_vm7, %v506_v55, %v508_v54 }
 0x24f   :  { %v2882_v56 = vsel %vm202_vm0, %v511_v15, 0 }
 0x250   :  { %530 = vmatpush.bf16.xpose.msrb.mxu2 %v2882_v56  ;;  %2166 = vmatpush.bf16.xpose.msra.mxu3 %v2882_v56 }
 0x255   :  { %v504_v58 = vpop.permute.xlu0 %503 }
 0x256   :  { %v510_v59 = vsel %vm509_vm7, %v502_v57, %v504_v58  ;;  %v872_v57 = vsel %vm871_vm15, 65537, %v2543_v52 }
 0x257   :  { %v2887_v22 = vsel %vm202_vm0, %v510_v59, 0 }
 0x258   :  { %531 = vmatpush.bf16.xpose.msrb.mxu2 %v2887_v22  ;;  %2167 = vmatpush.bf16.xpose.msra.mxu3 %v2887_v22 }
 0x25d   :  { %v680_v61 = vpop.permute.xlu0 %679 }
 0x25e   :  { %v681_v63 = vrot.slane %v680_v61, 4 }
 0x25f   :  { %1884 = vmatmul.msk.bf16.vlgmr.msrb.gmra.mxu2 %vm202_vm0, %v495_v28  ;;  %1885 = vmatmul.msk.bf16.vlgmr.msra.gmra.mxu3 %vm202_vm0, %v496_v62 }
 0x260   :  { %626 = vmatpush.bf16.xpose.msrb.mxu3 %v2882_v56  ;;  %820 = vmatpush.bf16.xpose.msra.mxu2 %v2882_v56  ;;  %v682_v3 = vsel %vm590_vm8, %v681_v63, %v680_v61 }
 0x261   :  { %v683_v23 = vunpack.c.l.b16 %v682_v3  ;;  %v684_v4 = vunpack.c.h.b16 %v682_v3 }
 0x263   :  { %vm687_vm9 = vcmp.ne.s32.totalorder %v683_v23, %v2897_v1  ;;  %vm688_vm10 = vcmp.ne.s32.totalorder %v684_v4, %v2900_v2 }
 0x264   :  { %vm689_vm11 = vmpackc.low %vm688_vm10, %vm687_vm9 }
 0x265   :  { %v2910_v5 = vsel %vm689_vm11, %v2874_v49, 0  ;;  %v690_v6 = vsel %vm689_vm11, %v2838_v19, 0  ;;  %v691_v7 = vsel %vm689_vm11, %v2865_v41, 0 }
 0x266   :  { %v702_v8 = vunpack.c.l.b16 %v2910_v5  ;;  %v698_v9 = vunpack.c.l.b16 %v690_v6  ;;  %v700_v11 = vunpack.c.l.b16 %v691_v7  ;;  %v699_v46 = vunpack.c.h.b16 %v690_v6 }
 0x267   :  { %v701_v47 = vunpack.c.h.b16 %v691_v7  ;;  %v703_v7 = vunpack.c.h.b16 %v2910_v5 }
 0x268   :  { %627 = vmatpush.bf16.xpose.msrb.mxu3 %v2887_v22  ;;  %821 = vmatpush.bf16.xpose.msra.mxu2 %v2887_v22  ;;  %v706_v13 = vpack.c.b16 %v702_v8, %v702_v8  ;;  %v2915_v14 = vpack.c.b16 %v700_v11, %v698_v9 }
 0x269   :  { %v705_v48 = vpack.c.b16 %v701_v47, %v699_v46  ;;  %v707_v8 = vpack.c.b16 %v703_v7, %v703_v7 }
 0x26a   :  { %712 = vrot.lane.b32.xlu1 %v706_v13, %s2544_s20  ;;  %v2975_v13 = vld [vmem:[%s3366_s1 + $0x10] sm:$0xff] }
 0x26b   :  { %vm547_vm1 = vcmp.gt.f32.partialorder %v2975_v13, 0.0 }
 0x26f   :  { %1886 = vmatmul.msk.bf16.vlgmr.msrb.gmra.mxu3 %vm202_vm0, %v2853_v29  ;;  %1892 = vmatmul.msk.bf16.vlgmr.msra.gmra.mxu2 %vm202_vm0, %v2859_v32 }
 0x27f   :  { %1887 = vmatmul.msk.bf16.gmra.mxu3 %vm202_vm0, %v613_v18  ;;  %1893 = vmatmul.msk.bf16.gmra.mxu2 %vm202_vm0, %v807_v20 }
 0x2dc   :  { %v713_v58 = vpop.permute.xlu1 %712 }
 0x2e2   :  { %v533_v21 = vpop.f32.mrf.mxu2  ;;  %v538_v24 = vpop.f32.mrf.mxu3 }
 0x2e3   :  { %v542_v9 = vmul.f32 0.20412415, %v533_v21  ;;  %v544_v18 = vmul.f32 0.20412415, %v538_v24 }
 0x2e5   :  { %v548_v11 = vsel %vm545_vm12, %v542_v9, -1e+30  ;;  %v2981_v5 = vsel %vm547_vm1, %v544_v18, -1e+30 }
 0x2e6   :  { %v552_v16 = vsel %vm551_vm13, %v548_v11, -inf  ;;  %v558_v20 = vsel %vm551_vm13, %v2981_v5, -inf }
 0x2ea   :  { %v535_v25 = vpop.f32.mrf.mxu2  ;;  %v540_v26 = vpop.f32.mrf.mxu3 }
 0x2eb   :  { %v543_v50 = vmul.f32 0.20412415, %v535_v25 }
 0x2ed   :  { %v549_v51 = vsel %vm546_vm14, %v543_v50, -1e+30 }
 0x2ee   :  { %v555_v53 = vsel %vm551_vm13, %v549_v51, -inf }
 0x2f2   :  { %v629_v28 = vpop.f32.mrf.mxu3  ;;  %v823_v29 = vpop.f32.mrf.mxu2 }
 0x2f3   :  { %v638_v30 = vmul.f32 0.20412415, %v629_v28  ;;  %v832_v54 = vmul.f32 0.20412415, %v823_v29  ;;  %v586_v29 = vsel %vm585_vm2, 65537, %v2543_v52 }
 0x2f5   :  { %v641_v31 = vsel %vm545_vm12, %v638_v30, -1e+30  ;;  %v2955_v55 = vsel %vm545_vm12, %v832_v54, -1e+30  ;;  %v1017_v30 = vsel %vm1016_vm4, 65537, %v2543_v52  ;;  %v950_v54 = vsel %vm2834_vm5, %v2863_v39, 0.0 }
 0x2f6   :  { %v644_v32 = vsel %vm551_vm13, %v641_v31, -inf  ;;  %v838_v15 = vsel %vm551_vm13, %v2955_v55, -inf }
 0x2f7   :  { %645 = vmax.xlane.f32.xlu2 %v644_v32 }
 0x2fa   :  { %v631_v35 = vpop.f32.mrf.mxu3  ;;  %v825_v36 = vpop.f32.mrf.mxu2 }
 0x2fb   :  { %v639_v37 = vmul.f32 0.20412415, %v631_v35  ;;  %v833_v25 = vmul.f32 0.20412415, %v825_v36 }
 0x2fd   :  { %v642_v38 = vsel %vm546_vm14, %v639_v37, -1e+30  ;;  %v2993_v26 = vsel %vm546_vm14, %v833_v25, -1e+30 }
 0x2fe   :  { %v647_v40 = vsel %vm551_vm13, %v642_v38, -inf  ;;  %v841_v28 = vsel %vm551_vm13, %v2993_v26, -inf }
 0x2ff   :  { %648 = vmax.xlane.f32.xlu1 %v647_v40 }
 0x302   :  { %v634_v42 = vpop.f32.mrf.mxu3  ;;  %v2947_v43 = vpop.f32.mrf.mxu2 }
 0x30a   :  { %v636_v44 = vpop.f32.mrf.mxu3  ;;  %v830_v45 = vpop.f32.mrf.mxu2 }
 0x318   :  { %710 = vrot.lane.b32.xlu1 %v705_v48, %s2544_s20 }
 0x342   :  { %556 = vmax.xlane.f32.xlu1 %v555_v53 }
 0x34a   :  { %839 = vmax.xlane.f32.xlu1 %v838_v15  ;;  %v952_v15 = vpack.c.bf16 %v950_v54, %v950_v54 }
 0x363   :  { %873 = vrot.lane.b32.xlu1 %v872_v57, %s2544_s20 }
 0x36a   :  { %v646_v59 = vpop.xlane.xlu2 %645 }
 0x36b   :  { %v653_v60 = vsub.f32 %v641_v31, %v646_v59 }
 0x36d   :  { %v656_v61 = vmul.f32 1.442695, %v653_v60 }
 0x36f   :  { %2202 = vpow2.f32 %v656_v61 }
 0x372   :  { %v649_v62 = vpop.xlane.xlu1 %648 }
 0x373   :  { %v654_v63 = vsub.f32 %v642_v38, %v649_v62 }
 0x375   :  { %v2203_v3 = vpop.eup %2202  ;;  %v658_v23 = vmul.f32 1.442695, %v654_v63 }
 0x376   :  { %v662_v4 = vsel %vm551_vm13, %v2203_v3, 0.0 }
 0x377   :  { %2204 = vpow2.f32 %v658_v23  ;;  %663 = vadd.xlane.f32.xlu0 %v662_v4 }
 0x37d   :  { %v2205_v10 = vpop.eup %2204 }
 0x37e   :  { %v665_v6 = vsel %vm551_vm13, %v2205_v10, 0.0 }
 0x37f   :  { %666 = vadd.xlane.f32.xlu2 %v665_v6 }
 0x38a   :  { %v711_v31 = vpop.permute.xlu1 %710 }
 0x38b   :  { %708 = vrot.lane.b32.xlu0 %v2915_v14, %s2544_s20  ;;  %v640_v14 = vmul.f32 0.20412415, %v634_v42 }
 0x38d   :  { %v2987_v21 = vsel %vm547_vm1, %v640_v14, -1e+30 }
 0x38e   :  { %v650_v24 = vsel %vm551_vm13, %v2987_v21, -inf }
 0x397   :  { %714 = vrot.lane.b32.xlu2 %v707_v8, %s2544_s20 }
 0x3b5   :  { %553 = vmax.xlane.f32.xlu0 %v552_v16  ;;  %v557_v32 = vpop.xlane.xlu1 %556 }
 0x3b6   :  { %v562_v35 = vsub.f32 %v549_v51, %v557_v32 }
 0x3b8   :  { %v566_v0 = vmul.f32 1.442695, %v562_v35  ;;  %v834_v35 = vmul.f32 0.20412415, %v2947_v43 }
 0x3bd   :  { %559 = vmax.xlane.f32.xlu0 %v558_v20 }
 0x3c0   :  { %651 = vmax.xlane.f32.xlu2 %v650_v24 }
 0x3c5   :  { %842 = vmax.xlane.f32.xlu0 %v841_v28 }
 0x3d8   :  { %587 = vrot.lane.b32.xlu2 %v586_v29, %s2544_s20 }
 0x3d9   :  { %1018 = vrot.lane.b32.xlu0 %v1017_v30, %s2544_s20  ;;  %v840_v30 = vpop.xlane.xlu1 %839 }
 0x3da   :  { %v847_v32 = vsub.f32 %v2955_v55, %v840_v30 }
 0x3ea   :  { %v664_v37 = vpop.xlane.xlu0 %663 }
 0x3f2   :  { %v667_v36 = vpop.xlane.xlu2 %666 }
 0x3f3   :  { %2206 = vrcp.f32 %v667_v36 }
 0x3f4   :  { %2208 = vrcp.f32 %v664_v37  ;;  %v850_v37 = vmul.f32 1.442695, %v847_v32 }
 0x3f5   :  { %2210 = vpow2.f32 %v566_v0  ;;  %v874_v0 = vpop.permute.xlu1 %873 }
 0x3f9   :  { %v2207_v40 = vpop.eup %2206 }
 0x3fa   :  { %v715_v38 = vpop.permute.xlu2 %714  ;;  %v2209_v44 = vpop.eup %2208  ;;  %v675_v46 = vmul.f32 %v2207_v40, %v2205_v10 }
 0x3fb   :  { %v717_v42 = vsel %vm590_vm8, %v713_v58, %v715_v38  ;;  %v3009_v47 = vpop.eup %2210  ;;  %v674_v48 = vmul.f32 %v2209_v44, %v2203_v3  ;;  %v875_v38 = vrot.slane %v874_v0, 4 }
 0x3fc   :  { %v727_v52 = vsel %vm725_vm3, %v717_v42, 0  ;;  %v573_v51 = vsel %vm551_vm13, %v3009_v47, 0.0 }
 0x3fd   :  { %v709_v45 = vpop.permute.xlu0 %708  ;;  %735 = vmatpush.bf16.msrb.mxu0 %v727_v52  ;;  %2168 = vmatpush.bf16.msrb.mxu1 %v727_v52  ;;  %v693_v53 = vpack.c.bf16 %v675_v46, %v674_v48  ;;  %v876_v55 = vsel %vm590_vm8, %v875_v38, %v874_v0 }
 0x3fe   :  { %v716_v50 = vsel %vm590_vm8, %v709_v45, %v711_v31  ;;  %v877_v52 = vunpack.c.l.b16 %v876_v55  ;;  %v878_v44 = vunpack.c.h.b16 %v876_v55 }
 0x400   :  { %vm881_vm9 = vcmp.ne.s32.totalorder %v877_v52, %v2897_v1  ;;  %vm882_vm10 = vcmp.ne.s32.totalorder %v878_v44, %v2900_v2 }
 0x401   :  { %736 = vmatpush.bf16.msrb.mxu0 %v716_v50  ;;  %2169 = vmatpush.bf16.msrb.mxu1 %v716_v50  ;;  %vm3064_vm11 = vmpackc.low %vm882_vm10, %vm881_vm9 }
 0x402   :  { %v886_v50 = vsel %vm3064_vm11, %v2874_v49, 0  ;;  %v885_v13 = vsel %vm3064_vm11, %v2865_v41, 0 }
 0x403   :  { %574 = vadd.xlane.f32.xlu0 %v573_v51  ;;  %v895_v52 = vunpack.c.h.b16 %v885_v13 }
 0x404   :  { %1888 = vmatmul.msk.bf16.vlgmr.msrb.gmra.mxu0 %vm551_vm13, %v693_v53  ;;  %v897_v53 = vunpack.c.h.b16 %v886_v50 }
 0x405   :  { %965 = vmatpush.bf16.xpose.msra.mxu0 %v2882_v56 }
 0x406   :  { %v901_v54 = vpack.c.b16 %v897_v53, %v897_v53 }
 0x40d   :  { %966 = vmatpush.bf16.xpose.msra.mxu0 %v2887_v22 }
 0x414   :  { %1896 = vmatmul.msk.bf16.vlgmr.msra.gmra.mxu0 %vm202_vm0, %v2861_v33 }
 0x424   :  { %1897 = vmatmul.msk.bf16.gmra.mxu0 %vm202_vm0, %v952_v15 }
 0x428   :  { %v554_v56 = vpop.xlane.xlu0 %553 }
 0x429   :  { %v561_v57 = vsub.f32 %v548_v11, %v554_v56 }
 0x42b   :  { %v564_v58 = vmul.f32 1.442695, %v561_v57  ;;  %v896_v57 = vunpack.c.l.b16 %v886_v50 }
 0x42d   :  { %2212 = vpow2.f32 %v564_v58 }
 0x430   :  { %v560_v25 = vpop.xlane.xlu0 %559 }
 0x431   :  { %v563_v28 = vsub.f32 %v2981_v5, %v560_v25  ;;  %v3049_v5 = vsel %vm547_vm1, %v834_v35, -1e+30 }
 0x432   :  { %v844_v43 = vsel %vm551_vm13, %v3049_v5, -inf }
 0x433   :  { %v3023_v59 = vpop.eup %2212  ;;  %v652_v60 = vpop.xlane.xlu2 %651  ;;  %v568_v29 = vmul.f32 1.442695, %v563_v28 }
 0x434   :  { %v570_v22 = vsel %vm551_vm13, %v3023_v59, 0.0  ;;  %v655_v20 = vsub.f32 %v2987_v21, %v652_v60 }
 0x435   :  { %571 = vadd.xlane.f32.xlu1 %v570_v22  ;;  %v900_v22 = vpack.c.b16 %v896_v57, %v896_v57 }
 0x436   :  { %v660_v24 = vmul.f32 1.442695, %v655_v20 }
 0x438   :  { %2214 = vpow2.f32 %v660_v24  ;;  %v843_v27 = vpop.xlane.xlu0 %842 }
 0x439   :  { %2216 = vpow2.f32 %v568_v29 }
 0x43a   :  { %2218 = vpow2.f32 %v850_v37 }
 0x43b   :  { %v588_v61 = vpop.permute.xlu2 %587 }
 0x43c   :  { %v589_v33 = vrot.slane %v588_v61, 4 }
 0x43e   :  { %v591_v62 = vsel %vm590_vm8, %v589_v33, %v588_v61  ;;  %v3039_v31 = vpop.eup %2214 }
 0x43f   :  { %v592_v17 = vunpack.c.l.b16 %v591_v62  ;;  %v593_v39 = vunpack.c.h.b16 %v591_v62  ;;  %v668_v36 = vsel %vm551_vm13, %v3039_v31, 0.0  ;;  %v3045_v21 = vpop.eup %2216 }
 0x440   :  { %v576_v40 = vsel %vm551_vm13, %v3045_v21, 0.0  ;;  %v3056_v42 = vpop.eup %2218 }
 0x441   :  { %vm596_vm5 = vcmp.ne.s32.totalorder %v592_v17, %v2897_v1  ;;  %vm597_vm6 = vcmp.ne.s32.totalorder %v593_v39, %v2900_v2  ;;  %v856_v45 = vsel %vm551_vm13, %v3056_v42, 0.0 }
 0x442   :  { %vm598_vm7 = vmpackc.low %vm597_vm6, %vm596_vm5 }
 0x443   :  { %v601_v63 = vsel %vm598_vm7, %v2874_v49, 0  ;;  %v599_v3 = vsel %vm598_vm7, %v2838_v19, 0  ;;  %v600_v23 = vsel %vm598_vm7, %v2865_v41, 0 }
 0x444   :  { %v754_v4 = vunpack.c.l.b16 %v601_v63  ;;  %v751_v10 = vunpack.c.h.b16 %v599_v3  ;;  %v753_v6 = vunpack.c.h.b16 %v600_v23  ;;  %v755_v9 = vunpack.c.h.b16 %v601_v63 }
 0x445   :  { %v750_v11 = vunpack.c.l.b16 %v599_v3  ;;  %v752_v16 = vunpack.c.l.b16 %v600_v23  ;;  %v848_v63 = vsub.f32 %v2993_v26, %v843_v27 }
 0x446   :  { %v758_v7 = vpack.c.b16 %v754_v4, %v754_v4  ;;  %v757_v8 = vpack.c.b16 %v753_v6, %v751_v10  ;;  %v759_v18 = vpack.c.b16 %v755_v9, %v755_v9  ;;  %v884_v4 = vsel %vm3064_vm11, %v2838_v19, 0 }
 0x447   :  { %v756_v14 = vpack.c.b16 %v752_v16, %v750_v11  ;;  %v852_v23 = vmul.f32 1.442695, %v848_v63  ;;  %v892_v6 = vunpack.c.l.b16 %v884_v4  ;;  %v893_v55 = vunpack.c.h.b16 %v884_v4 }
 0x448   :  { %764 = vrot.lane.b32.xlu2 %v758_v7, %s2544_s20  ;;  %762 = vrot.lane.b32.xlu0 %v757_v8, %s2544_s20  ;;  %v894_v7 = vunpack.c.l.b16 %v885_v13 }
 0x449   :  { %2220 = vpow2.f32 %v852_v23 }
 0x44a   :  { %v898_v11 = vpack.c.b16 %v894_v7, %v892_v6 }
 0x44b   :  { %v1019_v10 = vpop.permute.xlu0 %1018 }
 0x44c   :  { %v1020_v16 = vrot.slane %v1019_v10, 4 }
 0x44e   :  { %766 = vrot.lane.b32.xlu1 %v759_v18, %s2544_s20  ;;  %v1021_v25 = vsel %vm590_vm8, %v1020_v16, %v1019_v10 }
 0x44f   :  { %v3094_v8 = vpop.eup %2220  ;;  %v1022_v29 = vunpack.c.l.b16 %v1021_v25  ;;  %v1023_v30 = vunpack.c.h.b16 %v1021_v25 }
 0x450   :  { %760 = vrot.lane.b32.xlu2 %v756_v14, %s2544_s20  ;;  %v859_v18 = vsel %vm551_vm13, %v3094_v8, 0.0 }
 0x451   :  { %vm1027_vm15 = vcmp.ne.s32.totalorder %v1023_v30, %v2900_v2 }
 0x472   :  { %669 = vadd.xlane.f32.xlu0 %v668_v36 }
 0x476   :  { %v575_v14 = vpop.xlane.xlu0 %574 }
 0x478   :  { %577 = vadd.xlane.f32.xlu1 %v576_v40 }
 0x479   :  { %845 = vmax.xlane.f32.xlu2 %v844_v43 }
 0x481   :  { %v3060_v46 = vpop.f32.mrf.mxu0  ;;  %857 = vadd.xlane.f32.xlu2 %v856_v45  ;;  %v899_v45 = vpack.c.b16 %v895_v52, %v893_v55 }
 0x489   :  { %v3071_v51 = vpop.f32.mrf.mxu0 }
 0x491   :  { %v968_v15 = vpop.f32.mrf.mxu0  ;;  %908 = vrot.lane.b32.xlu1 %v901_v54, %s2544_s20 }
 0x492   :  { %v977_v56 = vmul.f32 0.20412415, %v968_v15 }
 0x494   :  { %v3076_v58 = vsel %vm545_vm12, %v977_v56, -1e+30  ;;  %vm1026_vm12 = vcmp.ne.s32.totalorder %v1022_v29, %v2897_v1 }
 0x495   :  { %v983_v60 = vsel %vm551_vm13, %v3076_v58, -inf }
 0x496   :  { %984 = vmax.xlane.f32.xlu0 %v983_v60 }
 0x499   :  { %v970_v61 = vpop.f32.mrf.mxu0  ;;  %906 = vrot.lane.b32.xlu2 %v900_v22, %s2544_s20 }
 0x49a   :  { %v978_v26 = vmul.f32 0.20412415, %v970_v61 }
 0x49c   :  { %v3102_v24 = vsel %vm546_vm14, %v978_v26, -1e+30  ;;  %vm1028_vm14 = vmpackc.low %vm1027_vm15, %vm1026_vm12 }
 0x49d   :  { %v986_v35 = vsel %vm551_vm13, %v3102_v24, -inf  ;;  %v1031_v38 = vsel %vm1028_vm14, %v2874_v49, 0  ;;  %v1029_v2 = vsel %vm1028_vm14, %v2838_v19, 0  ;;  %v1030_v48 = vsel %vm1028_vm14, %v2865_v41, 0 }
 0x49e   :  { %v1041_v40 = vunpack.c.l.b16 %v1031_v38  ;;  %v1042_v44 = vunpack.c.h.b16 %v1031_v38  ;;  %v1037_v50 = vunpack.c.l.b16 %v1029_v2  ;;  %v1039_v53 = vunpack.c.l.b16 %v1030_v48 }
 0x49f   :  { %v1038_v15 = vunpack.c.h.b16 %v1029_v2  ;;  %v1040_v56 = vunpack.c.h.b16 %v1030_v48 }
 0x4a0   :  { %v1045_v43 = vpack.c.b16 %v1041_v40, %v1041_v40  ;;  %v1046_v1 = vpack.c.b16 %v1042_v44, %v1042_v44  ;;  %v1043_v49 = vpack.c.b16 %v1039_v53, %v1037_v50 }
 0x4a1   :  { %v973_v33 = vpop.f32.mrf.mxu0  ;;  %v1044_v57 = vpack.c.b16 %v1040_v56, %v1038_v15 }
 0x4a2   :  { %v979_v62 = vmul.f32 0.20412415, %v973_v33  ;;  %v765_v20 = vpop.permute.xlu2 %764 }
 0x4a4   :  { %v3083_v17 = vsel %vm547_vm1, %v979_v62, -1e+30 }
 0x4a5   :  { %v989_v39 = vsel %vm551_vm13, %v3083_v17, -inf }
 0x4a6   :  { %990 = vmax.xlane.f32.xlu0 %v989_v39 }
 0x4a8   :  { %v572_v9 = vpop.xlane.xlu1 %571 }
 0x4a9   :  { %v975_v3 = vpop.f32.mrf.mxu0 }
 0x4aa   :  { %v761_v34 = vpop.permute.xlu2 %760 }
 0x4ba   :  { %902 = vrot.lane.b32.xlu0 %v898_v11, %s2544_s20  ;;  %v763_v37 = vpop.permute.xlu0 %762 }
 0x4bb   :  { %860 = vadd.xlane.f32.xlu1 %v859_v18  ;;  %v768_v0 = vsel %vm590_vm8, %v761_v34, %v763_v37 }
 0x4c0   :  { %v767_v28 = vpop.permute.xlu1 %766 }
 0x4c1   :  { %v769_v32 = vsel %vm590_vm8, %v765_v20, %v767_v28 }
 0x4c2   :  { %v778_v36 = vsel %vm725_vm3, %v769_v32, 0  ;;  %987 = vmax.xlane.f32.xlu2 %v986_v35 }
 0x4c3   :  { %786 = vmatpush.bf16.msra.mxu1 %v778_v36 }
 0x4c7   :  { %787 = vmatpush.bf16.msra.mxu1 %v768_v0 }
 0x4d4   :  { %1051 = vrot.lane.b32.xlu1 %v1045_v43, %s2544_s20 }
 0x4da   :  { %904 = vrot.lane.b32.xlu2 %v899_v45, %s2544_s20 }
 0x4dc   :  { %1053 = vrot.lane.b32.xlu1 %v1046_v1, %s2544_s20 }
 0x4e4   :  { %1047 = vrot.lane.b32.xlu1 %v1043_v49, %s2544_s20 }
 0x4e5   :  { %v670_v54 = vpop.xlane.xlu0 %669 }
 0x4e6   :  { %2222 = vrcp.f32 %v670_v54 }
 0x4e7   :  { %2224 = vrcp.f32 %v572_v9 }
 0x4e8   :  { %2226 = vrcp.f32 %v575_v14 }
 0x4eb   :  { %v578_v27 = vpop.xlane.xlu1 %577 }
 0x4ec   :  { %v2223_v60 = vpop.eup %2222  ;;  %1049 = vrot.lane.b32.xlu1 %v1044_v57, %s2544_s20  ;;  %v846_v19 = vpop.xlane.xlu2 %845  ;;  %2228 = vrcp.f32 %v578_v27 }
 0x4ed   :  { %v676_v22 = vmul.f32 %v2223_v60, %v3039_v31  ;;  %v2225_v41 = vpop.eup %2224  ;;  %v849_v4 = vsub.f32 %v3049_v5, %v846_v19 }
 0x4ee   :  { %v2227_v62 = vpop.eup %2226  ;;  %v582_v39 = vmul.f32 %v2225_v41, %v3023_v59 }
 0x4ef   :  { %v694_v61 = vpack.c.bf16 %v676_v22, %v676_v22  ;;  %v583_v63 = vmul.f32 %v2227_v62, %v3009_v47  ;;  %v854_v7 = vmul.f32 1.442695, %v849_v4 }
 0x4f1   :  { %1889 = vmatmul.msk.bf16.vlgmr.msrb.gmra.mxu1 %vm551_vm13, %v694_v61  ;;  %v602_v3 = vpack.c.bf16 %v583_v63, %v582_v39  ;;  %2230 = vpow2.f32 %v854_v7  ;;  %v2121_v7 = vld [vmem:[%s3371_s6 + $0x18] sm:$0xff] }
 0x4f2   :  { %v2229_v6 = vpop.eup %2228 }
 0x4f3   :  { %v584_v47 = vmul.f32 %v2229_v6, %v3045_v21 }
 0x4f4   :  { %v858_v33 = vpop.xlane.xlu2 %857 }
 0x4f5   :  { %v603_v16 = vpack.c.bf16 %v584_v47, %v584_v47 }
 0x4f7   :  { %v2231_v26 = vpop.eup %2230 }
 0x4f8   :  { %v862_v18 = vsel %vm551_vm13, %v2231_v26, 0.0 }
 0x4fc   :  { %v907_v23 = vpop.permute.xlu2 %906 }
 0x501   :  { %1890 = vmatmul.msk.bf16.vlgmr.msra.gmra.mxu1 %vm551_vm13, %v602_v3 }
 0x503   :  { %v909_v31 = vpop.permute.xlu1 %908 }
 0x504   :  { %v911_v13 = vsel %vm590_vm8, %v907_v23, %v909_v31 }
 0x505   :  { %v920_v10 = vsel %vm725_vm3, %v911_v13, 0  ;;  %v2123_v13 = vld [vmem:[%s3371_s6 + $0x28] sm:$0xff] }
 0x506   :  { %928 = vmatpush.bf16.msra.mxu3 %v920_v10  ;;  %1150 = vmatpush.bf16.msrb.mxu2 %v2123_v13  ;;  %v2122_v10 = vld [vmem:[%s3371_s6 + $0x20] sm:$0xff] }
 0x509   :  { %v985_v9 = vpop.xlane.xlu0 %984 }
 0x50a   :  { %v992_v59 = vsub.f32 %v3076_v58, %v985_v9  ;;  %1151 = vmatpush.bf16.msrb.mxu2 %v2122_v10  ;;  %v2120_v9 = vld [vmem:[%s3371_s6 + $0x10] sm:$0xff] }
 0x50b   :  { %v1990_v10 = vld [vmem:[#allocation12 + $0x84] sm:$0xf0] }
 0x50c   :  { %v995_v11 = vmul.f32 1.442695, %v992_v59 }
 0x50e   :  { %2232 = vpow2.f32 %v995_v11  ;;  %1152 = vmatpush.bf16.msrb.mxu2 %v2121_v7  ;;  %v2119_v11 = vld [vmem:[%s3371_s6 + $0x8] sm:$0xff]  ;;  %v2141_v7 = vld [vmem:[#allocation12 + $0x88] sm:$0xf0] }
 0x511   :  { %1891 = vmatmul.msk.bf16.gmra.mxu1 %vm551_vm13, %v603_v16 }
 0x512   :  { %1153 = vmatpush.bf16.msrb.mxu2 %v2120_v9 }
 0x514   :  { %v2233_v5 = vpop.eup %2232 }
 0x515   :  { %v1001_v14 = vsel %vm551_vm13, %v2233_v5, 0.0 }
 0x516   :  { %863 = vadd.xlane.f32.xlu1 %v862_v18  ;;  %1002 = vadd.xlane.f32.xlu0 %v1001_v14 }
 0x517   :  { %1154 = vmatpush.bf16.msrb.mxu2 %v2119_v11  ;;  %v2137_v11 = vld [vmem:[#allocation12 + $0x68] sm:$0xf0] }
 0x519   :  { %v991_v58 = vpop.xlane.xlu0 %990 }
 0x51a   :  { %v994_v28 = vsub.f32 %v3083_v17, %v991_v58 }
 0x51c   :  { %v999_v35 = vmul.f32 1.442695, %v994_v28 }
 0x52c   :  { %v903_v37 = vpop.permute.xlu0 %902 }
 0x52e   :  { %v861_v20 = vpop.xlane.xlu1 %860 }
 0x52f   :  { %2234 = vrcp.f32 %v861_v20 }
 0x530   :  { %2236 = vrcp.f32 %v858_v33 }
 0x535   :  { %v988_v25 = vpop.xlane.xlu2 %987  ;;  %v2235_v30 = vpop.eup %2234 }
 0x536   :  { %v993_v21 = vsub.f32 %v3102_v24, %v988_v25  ;;  %v2237_v32 = vpop.eup %2236  ;;  %v869_v36 = vmul.f32 %v2235_v30, %v3094_v8 }
 0x537   :  { %v868_v0 = vmul.f32 %v2237_v32, %v3056_v42 }
 0x538   :  { %v997_v29 = vmul.f32 1.442695, %v993_v21 }
 0x539   :  { %v887_v43 = vpack.c.bf16 %v869_v36, %v868_v0  ;;  %v2189_v0 = vld [vmem:[#allocation7] ss:$0 sm:$0xff] }
 0x53a   :  { %2238 = vpow2.f32 %v997_v29 }
 0x53b   :  { %2240 = vpow2.f32 %v999_v35 }
 0x53d   :  { %v905_v34 = vpop.permute.xlu2 %904 }
 0x53e   :  { %v910_v38 = vsel %vm590_vm8, %v903_v37, %v905_v34  ;;  %v2188_v34 = vld [vmem:[#allocation6] ss:$0 sm:$0xff] }
 0x53f   :  { %929 = vmatpush.bf16.msra.mxu3 %v910_v38 }
 0x540   :  { %v2239_v40 = vpop.eup %2238 }
 0x541   :  { %v1004_v24 = vsel %vm551_vm13, %v2239_v40, 0.0  ;;  %v2241_v17 = vpop.eup %2240 }
 0x542   :  { %1005 = vadd.xlane.f32.xlu2 %v1004_v24  ;;  %1894 = vmatmul.msk.bf16.vlgmr.msra.gmra.mxu3 %vm551_vm13, %v887_v43  ;;  %v1007_v52 = vsel %vm551_vm13, %v2241_v17, 0.0 }
 0x546   :  { %v1052_v55 = vpop.permute.xlu1 %1051 }
 0x54a   :  { %1008 = vadd.xlane.f32.xlu2 %v1007_v52 }
 0x54e   :  { %v1054_v8 = vpop.permute.xlu1 %1053 }
 0x54f   :  { %v1056_v44 = vsel %vm590_vm8, %v1052_v55, %v1054_v8  ;;  %v2275_v8 = vld [vmem:[%s3384_s0 + $0x8] sm:$0xff] }
 0x550   :  { %v1065_v42 = vsel %vm725_vm3, %v1056_v44, 0 }
 0x551   :  { %1073 = vmatpush.bf16.msrb.mxu1 %v1065_v42 }
 0x556   :  { %v1048_v45 = vpop.permute.xlu1 %1047 }
 0x55e   :  { %v1050_v1 = vpop.permute.xlu1 %1049 }
 0x55f   :  { %v1055_v2 = vsel %vm590_vm8, %v1048_v45, %v1050_v1 }
 0x560   :  { %1074 = vmatpush.bf16.msrb.mxu1 %v1055_v2 }
 0x56e   :  { %v743_v48 = vpop.f32.mrf.mxu1 }
 0x576   :  { %v745_v50 = vpop.f32.mrf.mxu1 }
 0x57e   :  { %v789_v53 = vpop.f32.mrf.mxu1 }
 0x57f   :  { %v790_v18 = vadd.f32 %v789_v53, %v3060_v46 }
 0x586   :  { %v791_v49 = vpop.f32.mrf.mxu1 }
 0x587   :  { %v792_v14 = vadd.f32 %v791_v49, %v3071_v51 }
 0x589   :  { %v864_v54 = vpop.xlane.xlu1 %863  ;;  %v1003_v61 = vpop.xlane.xlu0 %1002 }
 0x58a   :  { %2242 = vrcp.f32 %v864_v54 }
 0x58b   :  { %2244 = vrcp.f32 %v1003_v61 }
 0x58e   :  { %v794_v15 = vpop.f32.mrf.mxu1 }
 0x58f   :  { %v795_v56 = vadd.f32 %v794_v15, %v743_v48  ;;  %v2276_v48 = vld [vmem:[%s3384_s0 + $0x10] sm:$0xff] }
 0x590   :  { %v2243_v57 = vpop.eup %2242 }
 0x591   :  { %v870_v60 = vmul.f32 %v2243_v57, %v2231_v26  ;;  %v2245_v33 = vpop.eup %2244  ;;  %v2118_v26 = vld [vmem:[%s3371_s6] sm:$0xff] }
 0x592   :  { %v1013_v39 = vmul.f32 %v2245_v33, %v2233_v5  ;;  %1155 = vmatpush.bf16.msrb.mxu2 %v2118_v26 }
 0x593   :  { %v888_v22 = vpack.c.bf16 %v870_v60, %v870_v60 }
 0x595   :  { %1895 = vmatmul.msk.bf16.gmra.mxu3 %vm551_vm13, %v888_v22 }
 0x596   :  { %v796_v19 = vpop.f32.mrf.mxu1 }
 0x5b5   :  { %v1006_v41 = vpop.xlane.xlu2 %1005 }
 0x5b6   :  { %2246 = vrcp.f32 %v1006_v41 }
 0x5bc   :  { %v2247_v62 = vpop.eup %2246 }
 0x5bd   :  { %v1014_v27 = vmul.f32 %v2247_v62, %v2239_v40  ;;  %v1009_v3 = vpop.xlane.xlu2 %1008  ;;  %v2274_v40 = vld [vmem:[%s3384_s0] sm:$0xff] }
 0x5be   :  { %2248 = vrcp.f32 %v1009_v3 }
 0x5bf   :  { %v1032_v63 = vpack.c.bf16 %v1014_v27, %v1013_v39 }
 0x5c1   :  { %1898 = vmatmul.msk.bf16.vlgmr.msrb.gmra.mxu1 %vm551_vm13, %v1032_v63 }
 0x5c4   :  { %v2249_v23 = vpop.eup %2248 }
 0x5c5   :  { %v1015_v31 = vmul.f32 %v2249_v23, %v2241_v17  ;;  %v931_v6 = vpop.f32.mrf.mxu3  ;;  %v1988_v23 = vld [vmem:[#allocation12 + $0x78] sm:$0xf] }
 0x5c6   :  { %v940_v20 = vadd.f32 %v931_v6, %v790_v18  ;;  %v1996_v6 = vld [vmem:[#allocation12 + $0x80] sm:$0xf]  ;;  %v1984_v18 = vld [vmem:[#allocation12 + $0x68] sm:$0xf] }
 0x5c7   :  { %v1033_v4 = vpack.c.bf16 %v1015_v31, %v1015_v31  ;;  %v2140_v31 = vld [vmem:[#allocation12 + $0x80] sm:$0xf0] }
 0x5c8   :  { %v1989_v13 = vor.u32 %v2140_v31, %v1988_v23 }
 0x5ca   :  { %1394 = vmatpush.bf16.msrb.mxu3 %v1989_v13 }
 0x5cd   :  { %v933_v59 = vpop.f32.mrf.mxu3 }
 0x5ce   :  { %v941_v58 = vadd.f32 %v933_v59, %v792_v14  ;;  %v1997_v59 = vor.u32 %v2141_v7, %v1996_v6  ;;  %v2138_v14 = vld [vmem:[#allocation12 + $0x70] sm:$0xf0] }
 0x5d0   :  { %1430 = vmatpush.bf16.msra.mxu1 %v1997_v59 }
 0x5d1   :  { %1899 = vmatmul.msk.bf16.gmra.mxu1 %vm551_vm13, %v1033_v4  ;;  %v2139_v4 = vld [vmem:[#allocation12 + $0x7c] sm:$0xf] }
 0x5d2   :  { %v1993_v9 = vor.u32 %v2139_v4, %v1990_v10 }
 0x5d4   :  { %1412 = vmatpush.bf16.msrb.mxu0 %v1993_v9 }
 0x618   :  { %v936_v47 = vpop.f32.mrf.mxu3 }
 0x619   :  { %v942_v32 = vadd.f32 %v936_v47, %v795_v56  ;;  %v1976_v47 = vld [vmem:[#allocation12 + $0x60] sm:$0xf] }
 0x61a   :  { %v1977_v26 = vor.u32 %v2137_v11, %v1976_v47 }
 0x61c   :  { %1395 = vmatpush.bf16.msrb.mxu3 %v1977_v26 }
 0x620   :  { %v938_v16 = vpop.f32.mrf.mxu3 }
 0x621   :  { %v2136_v16 = vld [vmem:[#allocation12 + $0x64] sm:$0xf] }
 0x63e   :  { %v1076_v5 = vpop.f32.mrf.mxu1 }
 0x63f   :  { %v1085_v21 = vadd.f32 %v1076_v5, %v940_v20  ;;  %v1978_v5 = vld [vmem:[#allocation12 + $0x6c] sm:$0xf0] }
 0x640   :  { %v1981_v20 = vor.u32 %v2136_v16, %v1978_v5 }
 0x642   :  { %1413 = vmatpush.bf16.msrb.mxu0 %v1981_v20 }
 0x646   :  { %v1078_v25 = vpop.f32.mrf.mxu1 }
 0x647   :  { %v1086_v28 = vadd.f32 %v1078_v25, %v941_v58  ;;  %v1985_v58 = vor.u32 %v2138_v14, %v1984_v18  ;;  %v1964_v25 = vld [vmem:[#allocation12 + $0x48] sm:$0xf] }
 0x649   :  { %v1100_v29 = vpack.c.bf16 %v1086_v28, %v1085_v21  ;;  %v2134_v21 = vld [vmem:[#allocation12 + $0x50] sm:$0xf0]  ;;  %1431 = vmatpush.bf16.msra.mxu1 %v1985_v58  ;;  %v2133_v28 = vld [vmem:[#allocation12 + $0x4c] sm:$0xf] }
 0x64b   :  { %1924 = vmatmul.msk.bf16.vlgmr.msrb.gmra.mxu2 %vm202_vm0, %v1100_v29  ;;  %v1965_v29 = vor.u32 %v2134_v21, %v1964_v25  ;;  %v2190_v21 = vld [vmem:[#allocation9] ss:$0 sm:$0xff] }
 0x64d   :  { %1396 = vmatpush.bf16.msrb.mxu3 %v1965_v29 }
 0x64e   :  { %v1081_v30 = vpop.f32.mrf.mxu1 }
 0x64f   :  { %v1087_v35 = vadd.f32 %v1081_v30, %v942_v32  ;;  %v1966_v30 = vld [vmem:[#allocation12 + $0x54] sm:$0xf0]  ;;  %v1972_v32 = vld [vmem:[#allocation12 + $0x50] sm:$0xf] }
 0x651   :  { %v1101_v37 = vpack.c.bf16 %v1087_v35, %v1087_v35  ;;  %v2135_v35 = vld [vmem:[#allocation12 + $0x58] sm:$0xf0] }
 0x656   :  { %v1083_v36 = vpop.f32.mrf.mxu1 }
 0x657   :  { %v1969_v36 = vor.u32 %v2133_v28, %v1966_v30 }
 0x659   :  { %1414 = vmatpush.bf16.msrb.mxu0 %v1969_v36 }
 0x65b   :  { %1925 = vmatmul.msk.bf16.gmra.mxu2 %vm202_vm0, %v1101_v37  ;;  %v1973_v37 = vor.u32 %v2135_v35, %v1972_v32  ;;  %v2191_v35 = vld [vmem:[#allocation10] ss:$0 sm:$0xff] }
 0x65d   :  { %1432 = vmatpush.bf16.msra.mxu1 %v1973_v37 }
 0x6ce   :  { %v1157_v46 = vpop.f32.mrf.mxu2 }
 0x6cf   :  { %v1158_v38 = vadd.f32 %v2188_v34, %v1157_v46  ;;  %v2130_v46 = vld [vmem:[#allocation12 + $0x34] sm:$0xf] }
 0x6d1   :  { %v1170_v51 = vmul.f32 %v2189_v0, %v1158_v38 }
 0x6d3   :  { %v3171_v43 = vadd.f32 %v2274_v40, %v1170_v51  ;;  %v1954_v51 = vld [vmem:[#allocation12 + $0x3c] sm:$0xf0]  ;;  %v1960_v40 = vld [vmem:[#allocation12 + $0x38] sm:$0xf] }
 0x6d5   :  { %v1178_v24 = vsel %vm202_vm0, %v3171_v43, 0.0 }
 0x6d6   :  { %v1159_v17 = vpop.f32.mrf.mxu2  ;;  %1179 = vadd.xlane.f32.xlu0 %v1178_v24  ;;  %v2132_v24 = vld [vmem:[#allocation12 + $0x40] sm:$0xf0] }
 0x6d7   :  { %v1160_v55 = vadd.f32 %v2188_v34, %v1159_v17  ;;  %v1957_v17 = vor.u32 %v2130_v46, %v1954_v51 }
 0x6d9   :  { %v1171_v52 = vmul.f32 %v2189_v0, %v1160_v55  ;;  %v1961_v55 = vor.u32 %v2132_v24, %v1960_v40  ;;  %1415 = vmatpush.bf16.msrb.mxu0 %v1957_v17 }
 0x6db   :  { %v3178_v44 = vadd.f32 %v2275_v8, %v1171_v52  ;;  %1433 = vmatpush.bf16.msra.mxu1 %v1961_v55  ;;  %v1940_v52 = vld [vmem:[#allocation12 + $0x18] sm:$0xf]  ;;  %v2128_v8 = vld [vmem:[#allocation12 + $0x20] sm:$0xf0] }
 0x6dd   :  { %v1181_v42 = vsel %vm202_vm0, %v3178_v44, 0.0 }
 0x6de   :  { %1182 = vadd.xlane.f32.xlu2 %v1181_v42  ;;  %v1162_v45 = vpop.f32.mrf.mxu2  ;;  %v2127_v42 = vld [vmem:[#allocation12 + $0x1c] sm:$0xf] }
 0x6df   :  { %v1163_v1 = vadd.f32 %v2188_v34, %v1162_v45  ;;  %v1952_v34 = vld [vmem:[#allocation12 + $0x30] sm:$0xf]  ;;  %v1941_v45 = vor.u32 %v2128_v8, %v1940_v52 }
 0x6e0   :  { %v2157_v8 = vld [vmem:[%s3378_s13 + $0x78] sm:$0xff] }
 0x6e1   :  { %v1172_v2 = vmul.f32 %v2189_v0, %v1163_v1  ;;  %v2131_v0 = vld [vmem:[#allocation12 + $0x38] sm:$0xf0]  ;;  %v1942_v1 = vld [vmem:[#allocation12 + $0x24] sm:$0xf0] }
 0x6e2   :  { %v1953_v38 = vor.u32 %v2131_v0, %v1952_v34 }
 0x6e3   :  { %v3185_v50 = vadd.f32 %v2276_v48, %v1172_v2  ;;  %v1948_v2 = vld [vmem:[#allocation12 + $0x20] sm:$0xf]  ;;  %v2129_v48 = vld [vmem:[#allocation12 + $0x28] sm:$0xf0] }
 0x6e4   :  { %1397 = vmatpush.bf16.msrb.mxu3 %v1953_v38 }
 0x6e5   :  { %v1184_v53 = vsel %vm202_vm0, %v3185_v50, 0.0 }
 0x6e6   :  { %v1164_v49 = vpop.f32.mrf.mxu2  ;;  %1185 = vadd.xlane.f32.xlu0 %v1184_v53 }
 0x6e7   :  { %v1945_v49 = vor.u32 %v2127_v42, %v1942_v1  ;;  %v2165_v42 = vld [vmem:[%s3378_s13 + $0xb8] sm:$0xff] }
 0x6e8   :  { %1398 = vmatpush.bf16.msrb.mxu3 %v1941_v45  ;;  %v2164_v45 = vld [vmem:[%s3378_s13 + $0xb0] sm:$0xff]  ;;  %v2149_v1 = vld [vmem:[%s3378_s13 + $0x38] sm:$0xff] }
 0x6e9   :  { %1416 = vmatpush.bf16.msrb.mxu0 %v1945_v49  ;;  %1729 = vmatpush.bf16.msra.mxu2 %v2149_v1  ;;  %v2154_v49 = vld [vmem:[%s3378_s13 + $0x60] sm:$0xff] }
 0x749   :  { %v1180_v54 = vpop.xlane.xlu0 %1179 }
 0x74a   :  { %v1187_v15 = vmul.f32 %v1180_v54, %v2672_v12  ;;  %v1949_v54 = vor.u32 %v2129_v48, %v1948_v2  ;;  %v2155_v2 = vld [vmem:[%s3378_s13 + $0x68] sm:$0xff] }
 0x74b   :  { %v2163_v48 = vld [vmem:[%s3378_s13 + $0xa8] sm:$0xff] }
 0x74c   :  { %v3191_v56 = vsub.f32 %v3171_v43, %v1187_v15  ;;  %1434 = vmatpush.bf16.msra.mxu1 %v1949_v54  ;;  %v2162_v54 = vld [vmem:[%s3378_s13 + $0xa0] sm:$0xff] }
 0x74e   :  { %v1193_v57 = vmul.f32 %v3191_v56, %v3191_v56 }
 0x750   :  { %v1196_v60 = vsel %vm202_vm0, %v1193_v57, 0.0  ;;  %v1928_v57 = vld [vmem:[#allocation12] sm:$0xf] }
 0x751   :  { %v1183_v22 = vpop.xlane.xlu2 %1182  ;;  %1197 = vadd.xlane.f32.xlu2 %v1196_v60  ;;  %v2125_v60 = vld [vmem:[#allocation12 + $0x8] sm:$0xf0] }
 0x752   :  { %v1188_v19 = vmul.f32 %v1183_v22, %v2672_v12  ;;  %v2124_v22 = vld [vmem:[#allocation12 + $0x4] sm:$0xf] }
 0x754   :  { %v3198_v61 = vsub.f32 %v3178_v44, %v1188_v19 }
 0x756   :  { %v1194_v41 = vmul.f32 %v3198_v61, %v3198_v61 }
 0x758   :  { %v1199_v33 = vsel %vm202_vm0, %v1194_v41, 0.0  ;;  %v1929_v41 = vor.u32 %v2125_v60, %v1928_v57  ;;  %v2153_v57 = vld [vmem:[%s3378_s13 + $0x58] sm:$0xff] }
 0x759   :  { %1200 = vadd.xlane.f32.xlu0 %v1199_v33  ;;  %v1186_v62 = vpop.xlane.xlu0 %1185  ;;  %v1930_v33 = vld [vmem:[#allocation12 + $0xc] sm:$0xf0] }
 0x75a   :  { %v1189_v39 = vmul.f32 %v1186_v62, %v2672_v12  ;;  %v1936_v62 = vld [vmem:[#allocation12 + $0x8] sm:$0xf]  ;;  %1399 = vmatpush.bf16.msrb.mxu3 %v1929_v41 }
 0x75b   :  { %v2161_v60 = vld [vmem:[%s3378_s13 + $0x98] sm:$0xff]  ;;  %v2160_v41 = vld [vmem:[%s3378_s13 + $0x90] sm:$0xff] }
 0x75c   :  { %v3205_v27 = vsub.f32 %v3185_v50, %v1189_v39  ;;  %v1933_v39 = vor.u32 %v2124_v22, %v1930_v33  ;;  %v2146_v22 = vld [vmem:[%s3378_s13 + $0x20] sm:$0xff] }
 0x75d   :  { %v1282_v33 = vld [vmem:[#allocation13] sm:$0x7] }
 0x75e   :  { %v1195_v63 = vmul.f32 %v3205_v27, %v3205_v27  ;;  %1417 = vmatpush.bf16.msrb.mxu0 %v1933_v39  ;;  %1747 = vmatpush.bf16.msra.mxu3 %v2157_v8  ;;  %v2151_v39 = vld [vmem:[%s3378_s13 + $0x48] sm:$0xff] }
 0x760   :  { %v1202_v3 = vsel %vm202_vm0, %v1195_v63, 0.0  ;;  %v2126_v63 = vld [vmem:[#allocation12 + $0x10] sm:$0xf0] }
 0x761   :  { %1203 = vadd.xlane.f32.xlu2 %v1202_v3  ;;  %v1937_v3 = vor.u32 %v2126_v63, %v1936_v62  ;;  %v2145_v62 = vld [vmem:[%s3378_s13 + $0x18] sm:$0xff]  ;;  %v2159_v63 = vld [vmem:[%s3378_s13 + $0x88] sm:$0xff] }
 0x762   :  { %1765 = vmatpush.bf16.msra.mxu0 %v2165_v42 }
 0x763   :  { %1435 = vmatpush.bf16.msra.mxu1 %v1937_v3  ;;  %v1285_v3 = vperm.slane %v1282_v33, 1 }
 0x766   :  { %1766 = vmatpush.bf16.msra.mxu0 %v2164_v45 }
 0x76a   :  { %1767 = vmatpush.bf16.msra.mxu0 %v2163_v48 }
 0x76e   :  { %1768 = vmatpush.bf16.msra.mxu0 %v2162_v54 }
 0x772   :  { %1769 = vmatpush.bf16.msra.mxu0 %v2161_v60 }
 0x776   :  { %1770 = vmatpush.bf16.msra.mxu0 %v2160_v41 }
 0x77a   :  { %1771 = vmatpush.bf16.msra.mxu0 %v2159_v63 }
 0x7c4   :  { %v1198_v53 = vpop.xlane.xlu2 %1197 }
 0x7c5   :  { %v1205_v15 = vmul.f32 %v1198_v53, %v2672_v12  ;;  %v2148_v53 = vld [vmem:[%s3378_s13 + $0x30] sm:$0xff] }
 0x7c6   :  { %1730 = vmatpush.bf16.msra.mxu2 %v2148_v53 }
 0x7c7   :  { %v1208_v19 = vadd.f32 1e-06, %v1205_v15  ;;  %v2147_v15 = vld [vmem:[%s3378_s13 + $0x28] sm:$0xff] }
 0x7c9   :  { %2250 = vrsqrt.f32 %v1208_v19  ;;  %vm1217_vm13 = vweird.f32 %v1208_v19 }
 0x7ca   :  { %1731 = vmatpush.bf16.msra.mxu2 %v2147_v15 }
 0x7cc   :  { %v1201_v23 = vpop.xlane.xlu0 %1200 }
 0x7cd   :  { %v1206_v31 = vmul.f32 %v1201_v23, %v2672_v12  ;;  %v1286_v23 = vperm.slane %v1282_v33, 2 }
 0x7ce   :  { %1732 = vmatpush.bf16.msra.mxu2 %v2146_v22 }
 0x7cf   :  { %v2251_v4 = vpop.eup %2250  ;;  %v1209_v13 = vadd.f32 1e-06, %v1206_v31  ;;  %v2144_v31 = vld [vmem:[%s3378_s13 + $0x10] sm:$0xff] }
 0x7d0   :  { %v1212_v10 = vmul.f32 %v2251_v4, %v1208_v19  ;;  %vm1218_vm8 = vweird.f32 %v2251_v4  ;;  %v2152_v19 = vld [vmem:[%s3378_s13 + $0x50] sm:$0xff] }
 0x7d1   :  { %2252 = vrsqrt.f32 %v1209_v13  ;;  %vm1219_vm1 = vmor %vm1217_vm13, %vm1218_vm8  ;;  %vm1227_vm4 = vweird.f32 %v1209_v13 }
 0x7d2   :  { %v1213_v6 = vmul.f32 %v2251_v4, %v1212_v10  ;;  %1733 = vmatpush.bf16.msra.mxu2 %v2145_v62  ;;  %v2158_v10 = vld [vmem:[%s3378_s13 + $0x80] sm:$0xff] }
 0x7d3   :  { %1772 = vmatpush.bf16.msra.mxu0 %v2158_v10 }
 0x7d4   :  { %v1214_v7 = vmul.f32 0.5, %v1213_v6  ;;  %v1204_v9 = vpop.xlane.xlu2 %1203 }
 0x7d5   :  { %v1207_v59 = vmul.f32 %v1204_v9, %v2672_v12 }
 0x7d6   :  { %v1215_v47 = vsub.f32 1.5, %v1214_v7  ;;  %1734 = vmatpush.bf16.msra.mxu2 %v2144_v31 }
 0x7d7   :  { %v2253_v11 = vpop.eup %2252  ;;  %v1210_v16 = vadd.f32 1e-06, %v1207_v59  ;;  %v2143_v59 = vld [vmem:[%s3378_s13 + $0x8] sm:$0xff] }
 0x7d8   :  { %v1216_v26 = vmul.f32 %v2251_v4, %v1215_v47  ;;  %v1222_v5 = vmul.f32 %v2253_v11, %v1209_v13  ;;  %vm1228_vm2 = vweird.f32 %v2253_v11  ;;  %v2150_v13 = vld [vmem:[%s3378_s13 + $0x40] sm:$0xff] }
 0x7d9   :  { %2254 = vrsqrt.f32 %v1210_v16  ;;  %vm1229_vm3 = vmor %vm1227_vm4, %vm1228_vm2  ;;  %vm1237_vm6 = vweird.f32 %v1210_v16 }
 0x7da   :  { %v1223_v18 = vmul.f32 %v2253_v11, %v1222_v5  ;;  %v1220_v14 = vsel %vm1219_vm1, %v2251_v4, %v1216_v26  ;;  %1735 = vmatpush.bf16.msra.mxu2 %v2143_v59 }
 0x7db   :  { %v1241_v28 = vmul.f32 %v1220_v14, %v3191_v56  ;;  %v2142_v14 = vld [vmem:[%s3378_s13] sm:$0xff] }
 0x7dc   :  { %v1224_v20 = vmul.f32 0.5, %v1223_v18 }
 0x7dd   :  { %v1247_v36 = vmul.f32 %v2190_v21, %v1241_v28 }
 0x7de   :  { %v1225_v58 = vsub.f32 1.5, %v1224_v20  ;;  %1736 = vmatpush.bf16.msra.mxu2 %v2142_v14 }
 0x7df   :  { %v2255_v25 = vpop.eup %2254  ;;  %v1253_v38 = vadd.f32 %v2191_v35, %v1247_v36 }
 0x7e0   :  { %v1226_v29 = vmul.f32 %v2253_v11, %v1225_v58  ;;  %v1232_v12 = vmul.f32 %v2255_v25, %v1210_v16  ;;  %vm1238_vm5 = vweird.f32 %v2255_v25 }
 0x7e1   :  { %vm1239_vm7 = vmor %vm1237_vm6, %vm1238_vm5 }
 0x7e2   :  { %v1230_v30 = vsel %vm1229_vm3, %v2253_v11, %v1226_v29  ;;  %v1233_v32 = vmul.f32 %v2255_v25, %v1232_v12  ;;  %v1284_v11 = vperm.slane %v1282_v33, 0 }
 0x7e3   :  { %v1242_v37 = vmul.f32 %v1230_v30, %v3198_v61 }
 0x7e4   :  { %v1234_v34 = vmul.f32 0.5, %v1233_v32 }
 0x7e5   :  { %v1248_v0 = vmul.f32 %v2190_v21, %v1242_v37 }
 0x7e6   :  { %v1235_v46 = vsub.f32 1.5, %v1234_v34 }
 0x7e7   :  { %v1254_v51 = vadd.f32 %v2191_v35, %v1248_v0 }
 0x7e8   :  { %v1236_v40 = vmul.f32 %v2255_v25, %v1235_v46 }
 0x7e9   :  { %v1280_v56 = vpack.c.bf16 %v1254_v51, %v1253_v38 }
 0x7ea   :  { %v1240_v24 = vsel %vm1239_vm7, %v2255_v25, %v1236_v40 }
 0x7eb   :  { %1998 = vmatmul.msk.bf16.vlgmr.msrb.gmra.mxu3 %vm202_vm0, %v1280_v56  ;;  %2000 = vmatmul.msk.bf16.vlgmr.msrb.gmra.mxu0 %vm202_vm0, %v1280_v56  ;;  %v1243_v17 = vmul.f32 %v1240_v24, %v3205_v27  ;;  %v2156_v27 = vld [vmem:[%s3378_s13 + $0x70] sm:$0xff] }
 0x7ec   :  { %2002 = vmatmul.msk.bf16.vlgmr.msra.gmra.mxu1 %vm202_vm0, %v1280_v56  ;;  %1748 = vmatpush.bf16.msra.mxu3 %v2156_v27 }
 0x7ed   :  { %v1249_v61 = vmul.f32 %v2190_v21, %v1243_v17 }
 0x7ef   :  { %v1255_v55 = vadd.f32 %v2191_v35, %v1249_v61 }
 0x7f0   :  { %1749 = vmatpush.bf16.msra.mxu3 %v2155_v2 }
 0x7f1   :  { %v1281_v52 = vpack.c.bf16 %v1255_v55, %v1255_v55 }
 0x7f4   :  { %1750 = vmatpush.bf16.msra.mxu3 %v2154_v49 }
 0x7f8   :  { %1751 = vmatpush.bf16.msra.mxu3 %v2153_v57 }
 0x7fb   :  { %1999 = vmatmul.msk.bf16.gmra.mxu3 %vm202_vm0, %v1281_v52  ;;  %2001 = vmatmul.msk.bf16.gmra.mxu0 %vm202_vm0, %v1281_v52 }
 0x7fc   :  { %2003 = vmatmul.msk.bf16.gmra.mxu1 %vm202_vm0, %v1281_v52  ;;  %1752 = vmatpush.bf16.msra.mxu3 %v2152_v19 }
 0x800   :  { %1753 = vmatpush.bf16.msra.mxu3 %v2151_v39 }
 0x804   :  { %1754 = vmatpush.bf16.msra.mxu3 %v2150_v13 }
 0x868   :  { %v1419_v4 = vpop.f32.mrf.mxu0 }
 0x869   :  { %v3288_v6 = vadd.f32 %v1419_v4, %v1285_v3  ;;  %v1437_v7 = vpop.f32.mrf.mxu1 }
 0x86a   :  { %v3290_v9 = vadd.f32 %v1437_v7, %v1286_v23 }
 0x86b   :  { %v1447_v47 = vmul.f32 %v3288_v6, %v3288_v6 }
 0x86c   :  { %v1448_v16 = vmul.f32 %v3290_v9, %v3290_v9 }
 0x86d   :  { %v1456_v26 = vmul.f32 %v1447_v47, %v3288_v6 }
 0x86e   :  { %v1457_v5 = vmul.f32 %v1448_v16, %v3290_v9  ;;  %v1401_v18 = vpop.f32.mrf.mxu3 }
 0x86f   :  { %v1465_v20 = vmul.f32 0.044715, %v1456_v26  ;;  %v3304_v58 = vadd.f32 %v1401_v18, %v1284_v11 }
 0x870   :  { %v1466_v25 = vmul.f32 0.044715, %v1457_v5  ;;  %v1421_v21 = vpop.f32.mrf.mxu0 }
 0x871   :  { %v1474_v28 = vadd.f32 %v1465_v20, %v3288_v6  ;;  %v1446_v29 = vmul.f32 %v3304_v58, %v3304_v58  ;;  %v3309_v12 = vadd.f32 %v1421_v21, %v1285_v3  ;;  %v1439_v30 = vpop.f32.mrf.mxu1 }
 0x872   :  { %v1475_v32 = vadd.f32 %v1466_v25, %v3290_v9  ;;  %v3312_v35 = vadd.f32 %v1439_v30, %v1286_v23 }
 0x873   :  { %v1483_v36 = vmul.f32 0.7978846, %v1474_v28  ;;  %v1455_v37 = vmul.f32 %v1446_v29, %v3304_v58  ;;  %v1450_v34 = vmul.f32 %v3309_v12, %v3309_v12 }
 0x874   :  { %v1484_v0 = vmul.f32 0.7978846, %v1475_v32  ;;  %v1451_v46 = vmul.f32 %v3312_v35, %v3312_v35 }
 0x875   :  { %v1464_v38 = vmul.f32 0.044715, %v1455_v37  ;;  %v1459_v51 = vmul.f32 %v1450_v34, %v3309_v12  ;;  %2256 = vtanh.f32 %v1483_v36 }
 0x876   :  { %v1460_v40 = vmul.f32 %v1451_v46, %v3312_v35  ;;  %v1403_v56 = vpop.f32.mrf.mxu3  ;;  %2258 = vtanh.f32 %v1484_v0 }
 0x877   :  { %v1473_v24 = vadd.f32 %v1464_v38, %v3304_v58  ;;  %v1468_v17 = vmul.f32 0.044715, %v1459_v51  ;;  %v3322_v61 = vadd.f32 %v1403_v56, %v1284_v11 }
 0x878   :  { %v1469_v55 = vmul.f32 0.044715, %v1460_v40  ;;  %v1424_v52 = vpop.f32.mrf.mxu0 }
 0x879   :  { %v1482_v8 = vmul.f32 0.7978846, %v1473_v24  ;;  %v1477_v42 = vadd.f32 %v1468_v17, %v3309_v12  ;;  %v1449_v27 = vmul.f32 %v3322_v61, %v3322_v61  ;;  %v3327_v45 = vadd.f32 %v1424_v52, %v1285_v3  ;;  %v1442_v1 = vpop.f32.mrf.mxu1 }
 0x87a   :  { %v1478_v2 = vadd.f32 %v1469_v55, %v3312_v35  ;;  %v3330_v48 = vadd.f32 %v1442_v1, %v1286_v23 }
 0x87b   :  { %v1486_v53 = vmul.f32 0.7978846, %v1477_v42  ;;  %v1458_v49 = vmul.f32 %v1449_v27, %v3322_v61  ;;  %v1453_v54 = vmul.f32 %v3327_v45, %v3327_v45  ;;  %2260 = vtanh.f32 %v1482_v8  ;;  %v2257_v60 = vpop.eup %2256 }
 0x87c   :  { %v1487_v15 = vmul.f32 0.7978846, %v1478_v2  ;;  %v1454_v57 = vmul.f32 %v3330_v48, %v3330_v48  ;;  %v2259_v41 = vpop.eup %2258  ;;  %v1501_v23 = vadd.f32 1.0, %v2257_v60 }
 0x87d   :  { %2262 = vtanh.f32 %v1486_v53  ;;  %v1467_v22 = vmul.f32 0.044715, %v1458_v49  ;;  %v1462_v19 = vmul.f32 %v1453_v54, %v3327_v45  ;;  %v1502_v13 = vadd.f32 1.0, %v2259_v41 }
 0x87e   :  { %2264 = vtanh.f32 %v1487_v15  ;;  %v1463_v33 = vmul.f32 %v1454_v57, %v3330_v48  ;;  %v1406_v62 = vpop.f32.mrf.mxu3  ;;  %v1510_v25 = vmul.f32 0.5, %v1501_v23 }
 0x87f   :  { %v1476_v39 = vadd.f32 %v1467_v22, %v3322_v61  ;;  %v1471_v63 = vmul.f32 0.044715, %v1462_v19  ;;  %v1407_v3 = vadd.f32 %v1406_v62, %v1284_v11  ;;  %v1511_v28 = vmul.f32 0.5, %v1502_v13 }
 0x880   :  { %v1472_v31 = vmul.f32 0.044715, %v1463_v33  ;;  %v1426_v4 = vpop.f32.mrf.mxu0  ;;  %v1519_v46 = vmul.f32 %v1510_v25, %v3288_v6 }
 0x881   :  { %v1485_v10 = vmul.f32 0.7978846, %v1476_v39  ;;  %v1452_v7 = vmul.f32 %v1407_v3, %v1407_v3  ;;  %v1444_v59 = vpop.f32.mrf.mxu1  ;;  %v1480_v47 = vadd.f32 %v1471_v63, %v3327_v45  ;;  %v2261_v16 = vpop.eup %2260  ;;  %v1520_v40 = vmul.f32 %v1511_v28, %v3290_v9  ;;  %v2192_v63 = vld [vmem:[#allocation15] ss:$0 sm:$0xff] }
 0x882   :  { %v1481_v26 = vadd.f32 %v1472_v31, %v3330_v48  ;;  %v1500_v32 = vadd.f32 1.0, %v2261_v16 }
 0x883   :  { %v2263_v5 = vpop.eup %2262  ;;  %2266 = vtanh.f32 %v1485_v10  ;;  %v1461_v18 = vmul.f32 %v1452_v7, %v1407_v3  ;;  %v1489_v14 = vmul.f32 0.7978846, %v1480_v47  ;;  %v2193_v10 = vld [vmem:[#allocation16] ss:$0 sm:$0xff] }
 0x884   :  { %v2265_v20 = vpop.eup %2264  ;;  %v1504_v21 = vadd.f32 1.0, %v2263_v5  ;;  %v1490_v11 = vmul.f32 0.7978846, %v1481_v26  ;;  %v1509_v17 = vmul.f32 0.5, %v1500_v32 }
 0x885   :  { %v1505_v29 = vadd.f32 1.0, %v2265_v20  ;;  %v1470_v30 = vmul.f32 0.044715, %v1461_v18  ;;  %2268 = vtanh.f32 %v1489_v14 }
 0x886   :  { %v1513_v36 = vmul.f32 0.5, %v1504_v21  ;;  %v1408_v37 = vpop.f32.mrf.mxu3  ;;  %2270 = vtanh.f32 %v1490_v11  ;;  %v1518_v6 = vmul.f32 %v1509_v17, %v3304_v58 }
 0x887   :  { %v1514_v34 = vmul.f32 0.5, %v1505_v29  ;;  %v1479_v0 = vadd.f32 %v1470_v30, %v1407_v3 }
 0x888   :  { %v1522_v38 = vmul.f32 %v1513_v36, %v3309_v12 }
 0x889   :  { %v2267_v51 = vpop.eup %2266  ;;  %v1523_v56 = vmul.f32 %v1514_v34, %v3312_v35  ;;  %v1488_v24 = vmul.f32 0.7978846, %v1479_v0 }
 0x88a   :  { %v1503_v55 = vadd.f32 1.0, %v2267_v51  ;;  %v1576_v52 = vpack.c.bf16 %v1522_v38, %v1519_v46 }
 0x88b   :  { %v2269_v8 = vpop.eup %2268  ;;  %v1577_v42 = vpack.c.bf16 %v1523_v56, %v1520_v40  ;;  %2272 = vtanh.f32 %v1488_v24 }
 0x88c   :  { %v2271_v27 = vpop.eup %2270  ;;  %v1512_v1 = vmul.f32 0.5, %v1503_v55  ;;  %1755 = vmatmul.bf16.vlgmr.msra.gmra.mxu3 %v1576_v52  ;;  %v1507_v2 = vadd.f32 1.0, %v2269_v8 }
 0x88d   :  { %1773 = vmatmul.bf16.vlgmr.msra.gmra.mxu0 %v1577_v42  ;;  %v1508_v53 = vadd.f32 1.0, %v2271_v27 }
 0x88e   :  { %v1521_v12 = vmul.f32 %v1512_v1, %v3322_v61  ;;  %v1516_v35 = vmul.f32 0.5, %v1507_v2 }
 0x88f   :  { %v1517_v54 = vmul.f32 0.5, %v1508_v53 }
 0x890   :  { %v1575_v9 = vpack.c.bf16 %v1521_v12, %v1518_v6  ;;  %v1525_v57 = vmul.f32 %v1516_v35, %v3327_v45 }
 0x891   :  { %v2273_v49 = vpop.eup %2272  ;;  %v1526_v60 = vmul.f32 %v1517_v54, %v3330_v48 }
 0x892   :  { %1737 = vmatmul.bf16.vlgmr.msra.gmra.mxu2 %v1575_v9  ;;  %v1506_v15 = vadd.f32 1.0, %v2273_v49  ;;  %v1579_v19 = vpack.c.bf16 %v1525_v57, %v1525_v57 }
 0x893   :  { %v1580_v41 = vpack.c.bf16 %v1526_v60, %v1526_v60 }
 0x894   :  { %v1515_v22 = vmul.f32 0.5, %v1506_v15 }
 0x896   :  { %v1524_v33 = vmul.f32 %v1515_v22, %v1407_v3 }
 0x898   :  { %v1578_v58 = vpack.c.bf16 %v1524_v33, %v1524_v33 }
 0x89c   :  { %1760 = vmatmul.bf16.gmra.mxu3 %v1579_v19 }
 0x89d   :  { %1778 = vmatmul.bf16.gmra.mxu0 %v1580_v41 }
 0x8a2   :  { %1742 = vmatmul.bf16.gmra.mxu2 %v1578_v58 }
 0x90a   :  { %v1774_v61 = vpop.f32.mrf.mxu0 }
 0x90f   :  { %v1756_v62 = vpop.f32.mrf.mxu3 }
 0x912   :  { %v1776_v39 = vpop.f32.mrf.mxu0 }
 0x915   :  { %v1738_v23 = vpop.f32.mrf.mxu2 }
 0x916   :  { %v1739_v31 = vadd.f32 %v2192_v63, %v1738_v23 }
 0x917   :  { %v1758_v4 = vpop.f32.mrf.mxu3 }
 0x918   :  { %v1757_v13 = vadd.f32 %v1756_v62, %v1739_v31 }
 0x91a   :  { %v1775_v45 = vadd.f32 %v1774_v61, %v1757_v13  ;;  %v1779_v7 = vpop.f32.mrf.mxu0 }
 0x91c   :  { %v1787_v48 = vmul.f32 %v2193_v10, %v1775_v45 }
 0x91d   :  { %v1740_v59 = vpop.f32.mrf.mxu2 }
 0x91e   :  { %v1790_v47 = vadd.f32 %v1787_v48, %v3171_v43  ;;  %v1741_v16 = vadd.f32 %v2192_v63, %v1740_v59 }
 0x91f   :  { %v1761_v3 = vpop.f32.mrf.mxu3 }
 0x920   :  { %1793 = vst.msk [vmem:[%s3381_s16] sm:$0xff] %vm202_vm0, %v1790_v47  ;;  %v1759_v26 = vadd.f32 %v1758_v4, %v1741_v16 }
 0x922   :  { %v1777_v5 = vadd.f32 %v1776_v39, %v1759_v26  ;;  %v1781_v18 = vpop.f32.mrf.mxu0 }
 0x924   :  { %v1788_v14 = vmul.f32 %v2193_v10, %v1777_v5 }
 0x925   :  { %v1743_v20 = vpop.f32.mrf.mxu2 }
 0x926   :  { %v1791_v25 = vadd.f32 %v1788_v14, %v3178_v44  ;;  %v1744_v21 = vadd.f32 %v2192_v63, %v1743_v20 }
 0x927   :  { %v1763_v11 = vpop.f32.mrf.mxu3 }
 0x928   :  { %1794 = vst.msk [vmem:[%s3381_s16 + $0x8] sm:$0xff] %vm202_vm0, %v1791_v25  ;;  %v1762_v43 = vadd.f32 %v1761_v3, %v1744_v21 }
 0x92a   :  { %v1780_v28 = vadd.f32 %v1779_v7, %v1762_v43 }
 0x92c   :  { %v1789_v29 = vmul.f32 %v2193_v10, %v1780_v28 }
 0x92d   :  { %v1745_v30 = vpop.f32.mrf.mxu2 }
 0x92e   :  { %v1792_v32 = vadd.f32 %v1789_v29, %v3185_v50 }
 0x930   :  { %1795 = vst.msk [vmem:[%s3381_s16 + $0x10] sm:$0xff] %vm202_vm0, %v1792_v32 }
 0x931   :  { %1800 = vsyncpa [#allocation3], 1 }
 0x932   :  { %1801 = vsyncpa [#allocation5], 1 }
 0x933   :  { %1802 = vsyncpa [#allocation8], 1 }
 0x934   :  { %1803 = vsyncpa [#allocation11], 1 }
 0x935   :  { %1804 = vsyncpa [#allocation14], 1 }
 0x936   :  { %1805 = vsyncpa [#allocation17], 1 }

// kernel: fwd.7
= control target key start
LH: loop header
LB: loop body
LE: loop exit
PB: predicated region body
PF: predicated region fallthrough
CT: control target
= control target key end

     0   :  { %s3505_s0 = inlined_call_operand.vmem [shape: f32[24,96], index: 0, kind: input, shape index: {}]   ;;  %s3506_s1 = inlined_call_operand.vmem [shape: f32[24,24], index: 1, kind: input, shape index: {}]   ;;  %s3507_s2 = inlined_call_operand.hbm [shape: f32[1,96], index: 2, kind: input, shape index: {}]   ;;  %s3508_s3 = inlined_call_operand.hbm [shape: f32[1,96], index: 3, kind: input, shape index: {}]   ;;  %s3509_s4 = inlined_call_operand.vmem [shape: bf16[96,288], index: 4, kind: input, shape index: {}]   ;;  %s3510_s5 = inlined_call_operand.hbm [shape: f32[1,288], index: 5, kind: input, shape index: {}]   ;;  %s3511_s6 = inlined_call_operand.vmem [shape: bf16[96,96], index: 6, kind: input, shape index: {}]   ;;  %s3512_s7 = inlined_call_operand.hbm [shape: f32[1,96], index: 7, kind: input, shape index: {}]   ;;  %s3513_s8 = inlined_call_operand.hbm [shape: f32[1,96], index: 8, kind: input, shape index: {}]   ;;  %s3514_s9 = inlined_call_operand.hbm [shape: f32[1,96], index: 9, kind: input, shape index: {}]   ;;  %s3515_s10 = inlined_call_operand.hbm [shape: f32[1,96], index: 10, kind: input, shape index: {}]   ;;  %s3516_s11 = inlined_call_operand.vmem [shape: bf16[96,384], index: 11, kind: input, shape index: {}]   ;;  %s3517_s12 = inlined_call_operand.hbm [shape: f32[1,384], index: 12, kind: input, shape index: {}]   ;;  %s3518_s13 = inlined_call_operand.vmem [shape: bf16[384,96], index: 13, kind: input, shape index: {}]   ;;  %s3519_s14 = inlined_call_operand.hbm [shape: f32[1,96], index: 14, kind: input, shape index: {}]   ;;  %s3520_s15 = inlined_call_operand.hbm [shape: f32[1,96], index: 15, kind: input, shape index: {}]   ;;  %s3521_s16 = inlined_call_operand.hbm [shape: f32[24,96], index: 16, kind: output, shape index: {}]  }
   0x1   :  { %3523 = sst [smem:[#allocation27_spill]] %s3505_s0 }
   0x2   :  { %21 = vsyncpa [#allocation3], 0 }
   0x3   :  { %22 = vsyncpa [#allocation6], 0 }
   0x4   :  { %23 = vsyncpa [#allocation9], 0 }
   0x5   :  { %24 = vsyncpa [#allocation12], 0 }
   0x6   :  { %25 = vsyncpa [#allocation15], 0 }
   0x7   :  { %26 = vsyncpa [#allocation18], 0  ;;  %s48_s23 = sshll.u32 %s3508_s3, 4  ;;  %s49_s23 = int_to_ptr.hbm [resolvable:$true] %s48_s23 }
   0x8   :  { %27 = vsyncpa [#allocation4], 0  ;;  %s2569_s24 = smov [#allocation5]   ;;  %s74_s28 = sshll.u32 %s3512_s7, 4  ;;  %s75_s28 = int_to_ptr.hbm [resolvable:$true] %s74_s28 }
   0x9   :  { %s50_s25 = sshll.u32 %s2569_s24, 4  ;;  %s2570_s29 = smov [#allocation8]   ;;  %s51_s25 = int_to_ptr.vmem [resolvable:$true] %s50_s25 }
   0xa   :  { %53 = dma.hbm_to_vmem [thread:$0]  %s49_s23, 16, %s51_s25, [#allocation6]  }
   0xb   :  { %s76_s30 = sshll.u32 %s2570_s29, 4  ;;  %s96_s18 = sshll.u32 %s3514_s9, 4  ;;  %s77_s30 = int_to_ptr.vmem [resolvable:$true] %s76_s30  ;;  %s97_s18 = int_to_ptr.hbm [resolvable:$true] %s96_s18 }
   0xc   :  { %79 = dma.hbm_to_vmem [thread:$0]  %s75_s28, 16, %s77_s30, [#allocation9]  }
   0xd   :  { %s120_s20 = sshll.u32 %s3517_s12, 4  ;;  %s2571_s21 = smov [#allocation11]   ;;  %s121_s20 = int_to_ptr.hbm [resolvable:$true] %s120_s20 }
   0xe   :  { %s98_s22 = sshll.u32 %s2571_s21, 4  ;;  %s2572_s7 = smov [#allocation14]   ;;  %s99_s22 = int_to_ptr.vmem [resolvable:$true] %s98_s22 }
   0xf   :  { %101 = dma.hbm_to_vmem [thread:$0]  %s97_s18, 16, %s99_s22, [#allocation12]  }
  0x10   :  { %s122_s23 = sshll.u32 %s2572_s7, 4  ;;  %s37_s26 = sshll.u32 %s3507_s2, 4  ;;  %s123_s23 = int_to_ptr.vmem [resolvable:$true] %s122_s23  ;;  %s38_s26 = int_to_ptr.hbm [resolvable:$true] %s37_s26 }
  0x11   :  { %125 = dma.hbm_to_vmem [thread:$0]  %s121_s20, 48, %s123_s23, [#allocation15]  }
  0x12   :  { %s61_s28 = sshll.u32 %s3510_s5, 4  ;;  %s2573_s29 = smov [#allocation2]   ;;  %s62_s28 = int_to_ptr.hbm [resolvable:$true] %s61_s28 }
  0x13   :  { %s39_s12 = sshll.u32 %s2573_s29, 4  ;;  %s2574_s30 = smov [#allocation7]   ;;  %s40_s12 = int_to_ptr.vmem [resolvable:$true] %s39_s12 }
  0x14   :  { %42 = dma.hbm_to_vmem [thread:$0]  %s38_s26, 16, %s40_s12, [#allocation3]  }
  0x15   :  { %s63_s0 = sshll.u32 %s2574_s30, 4  ;;  %s85_s3 = sshll.u32 %s3513_s8, 4  ;;  %s64_s0 = int_to_ptr.vmem [resolvable:$true] %s63_s0  ;;  %s86_s3 = int_to_ptr.hbm [resolvable:$true] %s85_s3 }
  0x16   :  { %66 = dma.hbm_to_vmem [thread:$0]  %s62_s28, 48, %s64_s0, [#allocation6]  }
  0x17   :  { %s107_s20 = sshll.u32 %s3515_s10, 4  ;;  %s2575_s21 = smov [#allocation10]   ;;  %s108_s20 = int_to_ptr.hbm [resolvable:$true] %s107_s20 }
  0x18   :  { %s87_s5 = sshll.u32 %s2575_s21, 4  ;;  %s2576_s22 = smov [#allocation13]   ;;  %s88_s5 = int_to_ptr.vmem [resolvable:$true] %s87_s5 }
  0x19   :  { %90 = dma.hbm_to_vmem [thread:$0]  %s86_s3, 16, %s88_s5, [#allocation9]  }
  0x1a   :  { %s109_s7 = sshll.u32 %s2576_s22, 4  ;;  %s133_s25 = sshll.u32 %s3519_s14, 4  ;;  %s110_s7 = int_to_ptr.vmem [resolvable:$true] %s109_s7  ;;  %s134_s25 = int_to_ptr.hbm [resolvable:$true] %s133_s25 }
  0x1b   :  { %112 = dma.hbm_to_vmem [thread:$0]  %s108_s20, 16, %s110_s7, [#allocation12]  }
  0x1c   :  { %s144_s9 = sshll.u32 %s3520_s15, 4  ;;  %s2577_s27 = smov [#allocation16]   ;;  %s145_s9 = int_to_ptr.hbm [resolvable:$true] %s144_s9 }
  0x1d   :  { %s135_s10 = sshll.u32 %s2577_s27, 4  ;;  %s2578_s28 = smov [#allocation17]   ;;  %s136_s10 = int_to_ptr.vmem [resolvable:$true] %s135_s10 }
  0x1e   :  { %138 = dma.hbm_to_vmem [thread:$0]  %s134_s25, 16, %s136_s10, [#allocation15]  }
  0x1f   :  { %s146_s29 = sshll.u32 %s2578_s28, 4  ;;  %s147_s29 = int_to_ptr.vmem [resolvable:$true] %s146_s29 }
  0x20   :  { %149 = dma.hbm_to_vmem [thread:$0]  %s145_s9, 16, %s147_s29, [#allocation18]  }
  0x21   :  { %2555 = dma.done.wait [#allocation3], 16  }
  0x22   :  { %2556 = vsyncadd [#allocation3], 4294967280 }
  0x23   :  { %2557 = dma.done.wait [#allocation6], 64  }
  0x24   :  { %2558 = vsyncadd [#allocation6], 4294967232 }
  0x25   :  { %2559 = dma.done.wait [#allocation9], 32  }
  0x26   :  { %2560 = vsyncadd [#allocation9], 4294967264 }
  0x27   :  { %2561 = dma.done.wait [#allocation12], 32  }
  0x28   :  { %2562 = vsyncadd [#allocation12], 4294967264 }
  0x29   :  { %2563 = dma.done.wait [#allocation15], 64  }
  0x2a   :  { %2564 = vsyncadd [#allocation15], 4294967232 }
  0x2b   :  { %2565 = dma.done.wait [#allocation18], 16  }
  0x2c   :  { %2566 = vsyncadd [#allocation18], 4294967280  ;;  %vm201_vm0 = vcmask 785408   ;;  %s3524_s12 = sld [smem:[#allocation27_spill]]  ;;  %v2579_v6 = vmov 96.0   ;;  %s2582_s3 = smov 64  }
  0x2d   :  { %2208 = vrcp.f32 %v2579_v6  ;;  %v1881_v28 = vld [vmem:[%s3509_s4 + $0x78] sm:$0xf]  ;;  %v2129_v29 = vld [vmem:[%s3509_s4 + $0x80] sm:$0xf0]  ;;  %v2128_v30 = vld [vmem:[%s3509_s4 + $0x7c] sm:$0xf] }
  0x2e   :  { %v1882_v31 = vor.u32 %v2129_v29, %v1881_v28  ;;  %v1883_v32 = vld [vmem:[%s3509_s4 + $0x84] sm:$0xf0]  ;;  %v1889_v33 = vld [vmem:[%s3509_s4 + $0x80] sm:$0xf]  ;;  %v2130_v34 = vld [vmem:[%s3509_s4 + $0x88] sm:$0xf0] }
  0x2f   :  { %v1886_v35 = vor.u32 %v2128_v30, %v1883_v32  ;;  %v1890_v36 = vor.u32 %v2130_v34, %v1889_v33  ;;  %v1869_v37 = vld [vmem:[%s3509_s4 + $0x60] sm:$0xf]  ;;  %v2126_v38 = vld [vmem:[%s3509_s4 + $0x68] sm:$0xf0]  ;;  %v2125_v39 = vld [vmem:[%s3509_s4 + $0x64] sm:$0xf] }
  0x30   :  { %425 = vmatpush.bf16.msra.mxu0 %v1882_v31  ;;  %v1870_v40 = vor.u32 %v2126_v38, %v1869_v37  ;;  %v1871_v41 = vld [vmem:[%s3509_s4 + $0x6c] sm:$0xf0]  ;;  %v1877_v42 = vld [vmem:[%s3509_s4 + $0x68] sm:$0xf]  ;;  %v2127_v43 = vld [vmem:[%s3509_s4 + $0x70] sm:$0xf0] }
  0x31   :  { %443 = vmatpush.bf16.msra.mxu1 %v1886_v35  ;;  %461 = vmatpush.bf16.msra.mxu2 %v1890_v36  ;;  %v1874_v44 = vor.u32 %v2125_v39, %v1871_v41  ;;  %v1878_v45 = vor.u32 %v2127_v43, %v1877_v42  ;;  %v1857_v46 = vld [vmem:[%s3509_s4 + $0x48] sm:$0xf]  ;;  %v2123_v47 = vld [vmem:[%s3509_s4 + $0x50] sm:$0xf0]  ;;  %v2122_v48 = vld [vmem:[%s3509_s4 + $0x4c] sm:$0xf] }
  0x32   :  { %v193_v0 = vld [vmem:[%s3524_s12] sm:$0xff]  ;;  %v195_v1 = vld [vmem:[%s3524_s12 + $0x10] sm:$0xff]  ;;  %v194_v4 = vld [vmem:[%s3524_s12 + $0x8] sm:$0xff]  ;;  %v1858_v49 = vor.u32 %v2123_v47, %v1857_v46  ;;  %s1801_s22 = sshll.u32 %s3521_s16, 4  ;;  %s2585_s7 = smov 8   ;;  %s1802_s22 = int_to_ptr.hbm [resolvable:$true] %s1801_s22 }
  0x33   :  { %v202_v2 = vsel %vm201_vm0, %v193_v0, 0.0  ;;  %v208_v3 = vsel %vm201_vm0, %v195_v1, 0.0  ;;  %v205_v5 = vsel %vm201_vm0, %v194_v4, 0.0  ;;  %v2209_v7 = vpop.eup %2208  ;;  %v1859_v50 = vld [vmem:[%s3509_s4 + $0x54] sm:$0xf0] }
  0x34   :  { %203 = vadd.xlane.f32.xlu0 %v202_v2  ;;  %209 = vadd.xlane.f32.xlu1 %v208_v3  ;;  %v212_v8 = vmul.f32 96.0, %v2209_v7  ;;  %vm216_vm1 = vweird.f32 %v2209_v7  ;;  %v1865_v51 = vld [vmem:[%s3509_s4 + $0x50] sm:$0xf]  ;;  %v2124_v52 = vld [vmem:[%s3509_s4 + $0x58] sm:$0xf0]  ;;  %v1862_v53 = vor.u32 %v2122_v48, %v1859_v50 }
  0x35   :  { %426 = vmatpush.bf16.msra.mxu0 %v1870_v40  ;;  %444 = vmatpush.bf16.msra.mxu1 %v1874_v44  ;;  %v1866_v54 = vor.u32 %v2124_v52, %v1865_v51  ;;  %v1845_v55 = vld [vmem:[%s3509_s4 + $0x30] sm:$0xf]  ;;  %v2120_v56 = vld [vmem:[%s3509_s4 + $0x38] sm:$0xf0]  ;;  %v2119_v57 = vld [vmem:[%s3509_s4 + $0x34] sm:$0xf] }
  0x36   :  { %v213_v9 = vsub.f32 1.0, %v212_v8  ;;  %462 = vmatpush.bf16.msra.mxu2 %v1878_v45  ;;  %v1846_v58 = vor.u32 %v2120_v56, %v1845_v55  ;;  %v1847_v59 = vld [vmem:[%s3509_s4 + $0x3c] sm:$0xf0]  ;;  %v1853_v60 = vld [vmem:[%s3509_s4 + $0x38] sm:$0xf] }
  0x37   :  { %v2121_v61 = vld [vmem:[%s3509_s4 + $0x40] sm:$0xf0]  ;;  %v1850_v62 = vor.u32 %v2119_v57, %v1847_v59  ;;  %v2116_v2 = vld [vmem:[%s3509_s4 + $0x1c] sm:$0xf]  ;;  %v2118_v6 = vld [vmem:[%s3509_s4 + $0x28] sm:$0xf0] }
  0x38   :  { %v214_v10 = vmul.f32 %v2209_v7, %v213_v9  ;;  %v1854_v63 = vor.u32 %v2121_v61, %v1853_v60  ;;  %v2200_v45 = vld [vmem:[#allocation2] ss:$0 sm:$0xff]  ;;  %v2201_v52 = vld [vmem:[#allocation5] ss:$0 sm:$0xff] }
  0x39   :  { %427 = vmatpush.bf16.msra.mxu0 %v1858_v49  ;;  %445 = vmatpush.bf16.msra.mxu1 %v1862_v53 }
  0x3a   :  { %v215_v11 = vadd.f32 %v2209_v7, %v214_v10  ;;  %463 = vmatpush.bf16.msra.mxu2 %v1866_v54 }
  0x3c   :  { %206 = vadd.xlane.f32.xlu0 %v205_v5  ;;  %v2713_v12 = vsel %vm216_vm1, %v2209_v7, %v215_v11  ;;  %v1841_v5 = vld [vmem:[%s3509_s4 + $0x20] sm:$0xf] }
  0x3d   :  { %428 = vmatpush.bf16.msra.mxu0 %v1846_v58  ;;  %446 = vmatpush.bf16.msra.mxu1 %v1850_v62  ;;  %v1842_v8 = vor.u32 %v2118_v6, %v1841_v5  ;;  %v1821_v11 = vld [vmem:[%s3509_s4] sm:$0xf] }
  0x3e   :  { %464 = vmatpush.bf16.msra.mxu2 %v1854_v63  ;;  %v484_v63 = vlaneseq }
  0x42   :  { %465 = vmatpush.bf16.msra.mxu2 %v1842_v8 }
  0xa7   :  { %v204_v13 = vpop.xlane.xlu0 %203  ;;  %v210_v17 = vpop.xlane.xlu1 %209 }
  0xa8   :  { %v218_v14 = vmul.f32 %v2713_v12, %v204_v13  ;;  %v220_v21 = vmul.f32 %v2713_v12, %v210_v17  ;;  %v2114_v13 = vld [vmem:[%s3509_s4 + $0x8] sm:$0xf0]  ;;  %v1823_v17 = vld [vmem:[%s3509_s4 + $0xc] sm:$0xf0] }
  0xaa   :  { %v2716_v15 = vsub.f32 %v193_v0, %v218_v14  ;;  %v2725_v23 = vsub.f32 %v195_v1, %v220_v21  ;;  %v1833_v0 = vld [vmem:[%s3509_s4 + $0x18] sm:$0xf]  ;;  %v2117_v1 = vld [vmem:[%s3509_s4 + $0x20] sm:$0xf0] }
  0xab   :  { %v1834_v3 = vor.u32 %v2117_v1, %v1833_v0  ;;  %v2113_v14 = vld [vmem:[%s3509_s4 + $0x4] sm:$0xf]  ;;  %v2853_v0 = vand.u32 127, %v484_v63 }
  0xac   :  { %v224_v16 = vmul.f32 %v2716_v15, %v2716_v15  ;;  %v226_v26 = vmul.f32 %v2725_v23, %v2725_v23  ;;  %v1826_v21 = vor.u32 %v2113_v14, %v1823_v17  ;;  %v313_v1 = vld [vmem:[#allocation7] sm:$0x7] }
  0xad   :  { %429 = vmatpush.bf16.msra.mxu0 %v1834_v3  ;;  %vm603_vm11 = vcmp.ge.s32.totalorder %v2853_v0, 24  ;;  %vm604_vm12 = vcmp.lt.s32.totalorder %v2853_v0, 48  ;;  %v317_v8 = vperm.slane %v313_v1, 2  ;;  %vm797_vm14 = vcmp.ge.s32.totalorder %v2853_v0, 48 }
  0xae   :  { %v227_v18 = vsel %vm201_vm0, %v224_v16, 0.0  ;;  %v233_v27 = vsel %vm201_vm0, %v226_v26, 0.0  ;;  %v1822_v16 = vor.u32 %v2114_v13, %v1821_v11  ;;  %vm2857_vm13 = vmand %vm603_vm11, %vm604_vm12  ;;  %vm798_vm15 = vcmp.lt.s32.totalorder %v2853_v0, 72 }
  0xaf   :  { %228 = vadd.xlane.f32.xlu1 %v227_v18  ;;  %v207_v19 = vpop.xlane.xlu0 %206  ;;  %v1829_v18 = vld [vmem:[%s3509_s4 + $0x8] sm:$0xf]  ;;  %vm942_vm1 = vcmp.ge.s32.totalorder %v2853_v0, 72 }
  0xb0   :  { %v219_v20 = vmul.f32 %v2713_v12, %v207_v19  ;;  %v2115_v19 = vld [vmem:[%s3509_s4 + $0x10] sm:$0xf0] }
  0xb1   :  { %430 = vmatpush.bf16.msra.mxu0 %v1822_v16 }
  0xb2   :  { %v2723_v22 = vsub.f32 %v194_v4, %v219_v20  ;;  %v1835_v4 = vld [vmem:[%s3509_s4 + $0x24] sm:$0xf0]  ;;  %s2580_s4 = smov 32  }
  0xb3   :  { %v1838_v7 = vor.u32 %v2116_v2, %v1835_v4  ;;  %v315_v2 = vperm.slane %v313_v1, 0 }
  0xb4   :  { %v225_v24 = vmul.f32 %v2723_v22, %v2723_v22 }
  0xb5   :  { %447 = vmatpush.bf16.msra.mxu1 %v1838_v7  ;;  %v316_v7 = vperm.slane %v313_v1, 1 }
  0xb6   :  { %v230_v25 = vsel %vm201_vm0, %v225_v24, 0.0  ;;  %v1830_v24 = vor.u32 %v2115_v19, %v1829_v18 }
  0xb7   :  { %231 = vadd.xlane.f32.xlu2 %v230_v25 }
  0xb8   :  { %466 = vmatpush.bf16.msra.mxu2 %v1830_v24 }
  0xb9   :  { %448 = vmatpush.bf16.msra.mxu1 %v1826_v21 }
  0xbf   :  { %234 = vadd.xlane.f32.xlu2 %v233_v27 }
 0x122   :  { %v229_v9 = vpop.xlane.xlu1 %228 }
 0x123   :  { %v236_v10 = vmul.f32 %v229_v9, %v2713_v12 }
 0x125   :  { %v239_v20 = vadd.f32 1e-06, %v236_v10 }
 0x127   :  { %2210 = vrsqrt.f32 %v239_v20  ;;  %vm248_vm3 = vweird.f32 %v239_v20 }
 0x12a   :  { %v232_v25 = vpop.xlane.xlu2 %231 }
 0x12b   :  { %v237_v26 = vmul.f32 %v232_v25, %v2713_v12 }
 0x12d   :  { %v2211_v27 = vpop.eup %2210  ;;  %v240_v28 = vadd.f32 1e-06, %v237_v26 }
 0x12e   :  { %v243_v29 = vmul.f32 %v2211_v27, %v239_v20  ;;  %vm249_vm2 = vweird.f32 %v2211_v27 }
 0x12f   :  { %2212 = vrsqrt.f32 %v240_v28  ;;  %vm250_vm4 = vmor %vm248_vm3, %vm249_vm2  ;;  %vm258_vm6 = vweird.f32 %v240_v28  ;;  %vm943_vm2 = vcmp.lt.s32.totalorder %v2853_v0, 96  ;;  %vm487_vm3 = vcmp.lt.s32.totalorder %v2853_v0, 24 }
 0x130   :  { %v244_v30 = vmul.f32 %v2211_v27, %v243_v29 }
 0x132   :  { %v245_v31 = vmul.f32 0.5, %v244_v30  ;;  %v235_v32 = vpop.xlane.xlu2 %234 }
 0x133   :  { %v238_v33 = vmul.f32 %v235_v32, %v2713_v12 }
 0x134   :  { %v246_v34 = vsub.f32 1.5, %v245_v31 }
 0x135   :  { %v2213_v35 = vpop.eup %2212  ;;  %v241_v36 = vadd.f32 1e-06, %v238_v33 }
 0x136   :  { %v247_v37 = vmul.f32 %v2211_v27, %v246_v34  ;;  %v253_v38 = vmul.f32 %v2213_v35, %v240_v28  ;;  %vm259_vm5 = vweird.f32 %v2213_v35 }
 0x137   :  { %2214 = vrsqrt.f32 %v241_v36  ;;  %vm260_vm7 = vmor %vm258_vm6, %vm259_vm5  ;;  %vm268_vm8 = vweird.f32 %v241_v36 }
 0x138   :  { %v254_v39 = vmul.f32 %v2213_v35, %v253_v38  ;;  %v251_v40 = vsel %vm250_vm4, %v2211_v27, %v247_v37  ;;  %vm2868_vm4 = vmand %vm797_vm14, %vm798_vm15 }
 0x139   :  { %v272_v44 = vmul.f32 %v251_v40, %v2716_v15  ;;  %vm2872_vm5 = vmand %vm942_vm1, %vm943_vm2 }
 0x13a   :  { %v255_v41 = vmul.f32 0.5, %v254_v39  ;;  %vm676_vm6 = vmpackc.low %vm2857_vm13, %vm2857_vm13 }
 0x13b   :  { %v278_v51 = vmul.f32 %v2200_v45, %v272_v44  ;;  %vm870_vm15 = vmpackc.low %vm2868_vm4, %vm2868_vm4 }
 0x13c   :  { %v256_v42 = vsub.f32 1.5, %v255_v41  ;;  %vm584_vm2 = vmpackc.low %vm487_vm3, %vm487_vm3 }
 0x13d   :  { %v2215_v43 = vpop.eup %2214  ;;  %v284_v56 = vadd.f32 %v2201_v52, %v278_v51 }
 0x13e   :  { %v257_v46 = vmul.f32 %v2213_v35, %v256_v42  ;;  %v263_v47 = vmul.f32 %v2215_v43, %v241_v36  ;;  %vm269_vm9 = vweird.f32 %v2215_v43 }
 0x13f   :  { %vm270_vm10 = vmor %vm268_vm8, %vm269_vm9  ;;  %vm589_vm8 = vcmask 523264  }
 0x140   :  { %v261_v48 = vsel %vm260_vm7, %v2213_v35, %v257_v46  ;;  %v264_v49 = vmul.f32 %v2215_v43, %v263_v47  ;;  %vm508_vm7 = vcmask 261120  }
 0x141   :  { %v273_v50 = vmul.f32 %v261_v48, %v2723_v22 }
 0x142   :  { %v265_v53 = vmul.f32 0.5, %v264_v49 }
 0x143   :  { %v279_v54 = vmul.f32 %v2200_v45, %v273_v50 }
 0x144   :  { %v266_v55 = vsub.f32 1.5, %v265_v53 }
 0x145   :  { %v285_v57 = vadd.f32 %v2201_v52, %v279_v54 }
 0x146   :  { %v267_v58 = vmul.f32 %v2215_v43, %v266_v55 }
 0x147   :  { %v311_v15 = vpack.c.bf16 %v285_v57, %v284_v56 }
 0x148   :  { %v271_v59 = vsel %vm270_vm10, %v2215_v43, %v267_v58 }
 0x149   :  { %1891 = vmatmul.msk.bf16.vlgmr.msra.gmra.mxu0 %vm201_vm0, %v311_v15  ;;  %1893 = vmatmul.msk.bf16.vlgmr.msra.gmra.mxu1 %vm201_vm0, %v311_v15  ;;  %v274_v22 = vmul.f32 %v271_v59, %v2725_v23 }
 0x14a   :  { %1895 = vmatmul.msk.bf16.vlgmr.msra.gmra.mxu2 %vm201_vm0, %v311_v15 }
 0x14b   :  { %v280_v60 = vmul.f32 %v2200_v45, %v274_v22 }
 0x14d   :  { %v286_v61 = vadd.f32 %v2201_v52, %v280_v60  ;;  %v2581_v52 = vmov 0  }
 0x14e   :  { %v677_v53 = vsel %vm676_vm6, 65537, %v2581_v52  ;;  %v2935_v1 = vunpack.c.l.b16 %v2581_v52 }
 0x14f   :  { %v312_v62 = vpack.c.bf16 %v286_v61, %v286_v61 }
 0x159   :  { %1892 = vmatmul.msk.bf16.gmra.mxu0 %vm201_vm0, %v312_v62  ;;  %1894 = vmatmul.msk.bf16.gmra.mxu1 %vm201_vm0, %v312_v62 }
 0x15a   :  { %1896 = vmatmul.msk.bf16.gmra.mxu2 %vm201_vm0, %v312_v62 }
 0x1c6   :  { %v432_v3 = vpop.f32.mrf.mxu0  ;;  %v450_v23 = vpop.f32.mrf.mxu1 }
 0x1c7   :  { %v433_v5 = vadd.f32 %v432_v3, %v315_v2  ;;  %v451_v11 = vadd.f32 %v450_v23, %v316_v7 }
 0x1c9   :  { %v608_v6 = vsel %vm2857_vm13, %v433_v5, 0.0  ;;  %v2880_v20 = vsel %vm487_vm3, %v433_v5, 0.0  ;;  %v802_v21 = vsel %vm2868_vm4, %v433_v5, 0.0  ;;  %v947_v27 = vsel %vm2872_vm5, %v433_v5, 0.0 }
 0x1cd   :  { %v468_v9 = vpop.f32.mrf.mxu2 }
 0x1ce   :  { %v469_v13 = vadd.f32 %v468_v9, %v317_v8  ;;  %v434_v14 = vpop.f32.mrf.mxu0  ;;  %v452_v16 = vpop.f32.mrf.mxu1 }
 0x1cf   :  { %v435_v18 = vadd.f32 %v434_v14, %v315_v2  ;;  %v453_v35 = vadd.f32 %v452_v16, %v316_v7 }
 0x1d0   :  { %v2876_v19 = vpack.c.bf16 %v469_v13, %v451_v11 }
 0x1d1   :  { %v477_v24 = vpack.c.bf16 %v435_v18, %v433_v5  ;;  %v492_v25 = vsel %vm487_vm3, %v435_v18, 0.0  ;;  %v609_v26 = vsel %vm2857_vm13, %v435_v18, 0.0  ;;  %v803_v30 = vsel %vm2868_vm4, %v435_v18, 0.0 }
 0x1d2   :  { %v494_v28 = vpack.c.bf16 %v492_v25, %v2880_v20  ;;  %v2891_v29 = vpack.c.bf16 %v609_v26, %v608_v6  ;;  %v948_v31 = vsel %vm2872_vm5, %v435_v18, 0.0  ;;  %v2897_v32 = vpack.c.bf16 %v803_v30, %v802_v21 }
 0x1d3   :  { %500 = vrot.lane.b32.xlu2 %v477_v24, %s2580_s4  ;;  %v2899_v33 = vpack.c.bf16 %v948_v31, %v947_v27  ;;  %v478_v50 = vpack.c.bf16 %v453_v35, %v451_v11  ;;  %v2970_v27 = vld [vmem:[%s3506_s1] sm:$0xff] }
 0x1d4   :  { %vm544_vm12 = vcmp.gt.f32.partialorder %v2970_v27, 0.0 }
 0x1d5   :  { %v470_v34 = vpop.f32.mrf.mxu2 }
 0x1d6   :  { %v471_v36 = vadd.f32 %v470_v34, %v317_v8  ;;  %v437_v37 = vpop.f32.mrf.mxu0  ;;  %v455_v38 = vpop.f32.mrf.mxu1  ;;  %v2979_v34 = vld [vmem:[%s3506_s1 + $0x8] sm:$0xff] }
 0x1d7   :  { %v2901_v39 = vadd.f32 %v437_v37, %v315_v2  ;;  %v456_v40 = vadd.f32 %v455_v38, %v316_v7  ;;  %v2938_v2 = vunpack.c.h.b16 %v2581_v52  ;;  %vm545_vm14 = vcmp.gt.f32.partialorder %v2979_v34, 0.0 }
 0x1d8   :  { %v2903_v41 = vpack.c.bf16 %v471_v36, %v453_v35 }
 0x1d9   :  { %v480_v42 = vpack.c.bf16 %v456_v40, %v456_v40  ;;  %v479_v43 = vpack.c.bf16 %v2901_v39, %v2901_v39  ;;  %v2910_v44 = vsel %vm2857_vm13, %v2901_v39, 0.0  ;;  %v493_v60 = vsel %vm487_vm3, %v2901_v39, 0.0 }
 0x1da   :  { %v495_v62 = vpack.c.bf16 %v493_v60, %v493_v60  ;;  %v804_v16 = vsel %vm2868_vm4, %v2901_v39, 0.0  ;;  %v612_v18 = vpack.c.bf16 %v2910_v44, %v2910_v44  ;;  %vm550_vm13 = vcmask 195584   ;;  %vm1015_vm4 = vmpackc.low %vm2872_vm5, %vm2872_vm5 }
 0x1db   :  { %506 = vrot.lane.b32.xlu1 %v480_v42, %s2580_s4  ;;  %504 = vrot.lane.b32.xlu0 %v479_v43, %s2580_s4  ;;  %v806_v20 = vpack.c.bf16 %v804_v16, %v804_v16  ;;  %vm724_vm3 = vcmask 1043456  }
 0x1dd   :  { %v473_v45 = vpop.f32.mrf.mxu2 }
 0x1de   :  { %v474_v46 = vadd.f32 %v473_v45, %v317_v8  ;;  %v439_v47 = vpop.f32.mrf.mxu0  ;;  %v457_v48 = vpop.f32.mrf.mxu1 }
 0x1e0   :  { %v2912_v49 = vpack.c.bf16 %v474_v46, %v456_v40 }
 0x1e3   :  { %502 = vrot.lane.b32.xlu0 %v478_v50, %s2580_s4 }
 0x1e5   :  { %v475_v51 = vpop.f32.mrf.mxu2 }
 0x1eb   :  { %678 = vrot.lane.b32.xlu0 %v677_v53, %s2582_s3 }
 0x22d   :  { %v501_v58 = vpop.permute.xlu2 %500 }
 0x24d   :  { %v507_v54 = vpop.permute.xlu1 %506  ;;  %v505_v55 = vpop.permute.xlu0 %504 }
 0x24e   :  { %v510_v56 = vsel %vm508_vm7, %v505_v55, %v507_v54 }
 0x24f   :  { %v2920_v57 = vsel %vm201_vm0, %v510_v56, 0 }
 0x250   :  { %529 = vmatpush.bf16.xpose.msrb.mxu2 %v2920_v57  ;;  %2179 = vmatpush.bf16.xpose.msra.mxu3 %v2920_v57 }
 0x255   :  { %v503_v15 = vpop.permute.xlu0 %502 }
 0x256   :  { %v509_v59 = vsel %vm508_vm7, %v501_v58, %v503_v15  ;;  %v871_v58 = vsel %vm870_vm15, 65537, %v2581_v52 }
 0x257   :  { %v2925_v22 = vsel %vm201_vm0, %v509_v59, 0 }
 0x258   :  { %530 = vmatpush.bf16.xpose.msrb.mxu2 %v2925_v22  ;;  %2180 = vmatpush.bf16.xpose.msra.mxu3 %v2925_v22 }
 0x25d   :  { %v679_v61 = vpop.permute.xlu0 %678 }
 0x25e   :  { %v680_v63 = vrot.slane %v679_v61, 4 }
 0x25f   :  { %1897 = vmatmul.msk.bf16.vlgmr.msrb.gmra.mxu2 %vm201_vm0, %v494_v28  ;;  %1898 = vmatmul.msk.bf16.vlgmr.msra.gmra.mxu3 %vm201_vm0, %v495_v62 }
 0x260   :  { %625 = vmatpush.bf16.xpose.msrb.mxu3 %v2920_v57  ;;  %819 = vmatpush.bf16.xpose.msra.mxu2 %v2920_v57  ;;  %v681_v3 = vsel %vm589_vm8, %v680_v63, %v679_v61 }
 0x261   :  { %v682_v23 = vunpack.c.l.b16 %v681_v3  ;;  %v683_v4 = vunpack.c.h.b16 %v681_v3 }
 0x263   :  { %vm686_vm9 = vcmp.ne.s32.totalorder %v682_v23, %v2935_v1  ;;  %vm687_vm10 = vcmp.ne.s32.totalorder %v683_v4, %v2938_v2 }
 0x264   :  { %vm688_vm11 = vmpackc.low %vm687_vm10, %vm686_vm9 }
 0x265   :  { %v2948_v5 = vsel %vm688_vm11, %v2912_v49, 0  ;;  %v689_v6 = vsel %vm688_vm11, %v2876_v19, 0  ;;  %v690_v7 = vsel %vm688_vm11, %v2903_v41, 0 }
 0x266   :  { %v701_v8 = vunpack.c.l.b16 %v2948_v5  ;;  %v697_v9 = vunpack.c.l.b16 %v689_v6  ;;  %v699_v11 = vunpack.c.l.b16 %v690_v7  ;;  %v698_v46 = vunpack.c.h.b16 %v689_v6 }
 0x267   :  { %v700_v47 = vunpack.c.h.b16 %v690_v7  ;;  %v702_v7 = vunpack.c.h.b16 %v2948_v5 }
 0x268   :  { %626 = vmatpush.bf16.xpose.msrb.mxu3 %v2925_v22  ;;  %820 = vmatpush.bf16.xpose.msra.mxu2 %v2925_v22  ;;  %v705_v13 = vpack.c.b16 %v701_v8, %v701_v8  ;;  %v2953_v14 = vpack.c.b16 %v699_v11, %v697_v9 }
 0x269   :  { %v704_v48 = vpack.c.b16 %v700_v47, %v698_v46  ;;  %v706_v8 = vpack.c.b16 %v702_v7, %v702_v7 }
 0x26a   :  { %711 = vrot.lane.b32.xlu1 %v705_v13, %s2582_s3  ;;  %v3013_v13 = vld [vmem:[%s3506_s1 + $0x10] sm:$0xff]  ;;  %s2584_s1 = smov 128  }
 0x26b   :  { %vm546_vm1 = vcmp.gt.f32.partialorder %v3013_v13, 0.0 }
 0x26f   :  { %1899 = vmatmul.msk.bf16.vlgmr.msrb.gmra.mxu3 %vm201_vm0, %v2891_v29  ;;  %1905 = vmatmul.msk.bf16.vlgmr.msra.gmra.mxu2 %vm201_vm0, %v2897_v32 }
 0x27f   :  { %1900 = vmatmul.msk.bf16.gmra.mxu3 %vm201_vm0, %v612_v18  ;;  %1906 = vmatmul.msk.bf16.gmra.mxu2 %vm201_vm0, %v806_v20 }
 0x2dc   :  { %v712_v15 = vpop.permute.xlu1 %711 }
 0x2e2   :  { %v532_v21 = vpop.f32.mrf.mxu2  ;;  %v537_v24 = vpop.f32.mrf.mxu3 }
 0x2e3   :  { %v541_v9 = vmul.f32 0.20412415, %v532_v21  ;;  %v543_v18 = vmul.f32 0.20412415, %v537_v24 }
 0x2e5   :  { %v547_v11 = vsel %vm544_vm12, %v541_v9, -1e+30  ;;  %v3019_v5 = vsel %vm546_vm1, %v543_v18, -1e+30 }
 0x2e6   :  { %v551_v16 = vsel %vm550_vm13, %v547_v11, -inf  ;;  %v557_v20 = vsel %vm550_vm13, %v3019_v5, -inf }
 0x2ea   :  { %v534_v25 = vpop.f32.mrf.mxu2  ;;  %v539_v26 = vpop.f32.mrf.mxu3 }
 0x2eb   :  { %v542_v50 = vmul.f32 0.20412415, %v534_v25 }
 0x2ed   :  { %v548_v51 = vsel %vm545_vm14, %v542_v50, -1e+30 }
 0x2ee   :  { %v554_v53 = vsel %vm550_vm13, %v548_v51, -inf }
 0x2f2   :  { %v628_v28 = vpop.f32.mrf.mxu3  ;;  %v822_v29 = vpop.f32.mrf.mxu2 }
 0x2f3   :  { %v637_v30 = vmul.f32 0.20412415, %v628_v28  ;;  %v831_v54 = vmul.f32 0.20412415, %v822_v29  ;;  %v585_v29 = vsel %vm584_vm2, 65537, %v2581_v52 }
 0x2f5   :  { %v640_v31 = vsel %vm544_vm12, %v637_v30, -1e+30  ;;  %v2993_v55 = vsel %vm544_vm12, %v831_v54, -1e+30  ;;  %v1016_v30 = vsel %vm1015_vm4, 65537, %v2581_v52  ;;  %v949_v54 = vsel %vm2872_vm5, %v2901_v39, 0.0 }
 0x2f6   :  { %v643_v32 = vsel %vm550_vm13, %v640_v31, -inf  ;;  %v837_v56 = vsel %vm550_vm13, %v2993_v55, -inf }
 0x2f7   :  { %644 = vmax.xlane.f32.xlu2 %v643_v32 }
 0x2fa   :  { %v630_v35 = vpop.f32.mrf.mxu3  ;;  %v824_v36 = vpop.f32.mrf.mxu2 }
 0x2fb   :  { %v638_v37 = vmul.f32 0.20412415, %v630_v35  ;;  %v832_v25 = vmul.f32 0.20412415, %v824_v36 }
 0x2fd   :  { %v641_v38 = vsel %vm545_vm14, %v638_v37, -1e+30  ;;  %v3031_v26 = vsel %vm545_vm14, %v832_v25, -1e+30 }
 0x2fe   :  { %v646_v40 = vsel %vm550_vm13, %v641_v38, -inf  ;;  %v840_v28 = vsel %vm550_vm13, %v3031_v26, -inf }
 0x2ff   :  { %647 = vmax.xlane.f32.xlu1 %v646_v40 }
 0x302   :  { %v633_v42 = vpop.f32.mrf.mxu3  ;;  %v2985_v43 = vpop.f32.mrf.mxu2 }
 0x30a   :  { %v635_v44 = vpop.f32.mrf.mxu3  ;;  %v829_v45 = vpop.f32.mrf.mxu2 }
 0x318   :  { %709 = vrot.lane.b32.xlu1 %v704_v48, %s2582_s3 }
 0x342   :  { %555 = vmax.xlane.f32.xlu1 %v554_v53 }
 0x34a   :  { %838 = vmax.xlane.f32.xlu1 %v837_v56  ;;  %v951_v56 = vpack.c.bf16 %v949_v54, %v949_v54 }
 0x363   :  { %872 = vrot.lane.b32.xlu1 %v871_v58, %s2582_s3 }
 0x36a   :  { %v645_v59 = vpop.xlane.xlu2 %644 }
 0x36b   :  { %v652_v60 = vsub.f32 %v640_v31, %v645_v59 }
 0x36d   :  { %v655_v61 = vmul.f32 1.442695, %v652_v60 }
 0x36f   :  { %2216 = vpow2.f32 %v655_v61 }
 0x372   :  { %v648_v62 = vpop.xlane.xlu1 %647 }
 0x373   :  { %v653_v63 = vsub.f32 %v641_v38, %v648_v62 }
 0x375   :  { %v2217_v3 = vpop.eup %2216  ;;  %v657_v23 = vmul.f32 1.442695, %v653_v63 }
 0x376   :  { %v661_v4 = vsel %vm550_vm13, %v2217_v3, 0.0 }
 0x377   :  { %2218 = vpow2.f32 %v657_v23  ;;  %662 = vadd.xlane.f32.xlu0 %v661_v4 }
 0x37d   :  { %v2219_v10 = vpop.eup %2218 }
 0x37e   :  { %v664_v6 = vsel %vm550_vm13, %v2219_v10, 0.0 }
 0x37f   :  { %665 = vadd.xlane.f32.xlu2 %v664_v6 }
 0x38a   :  { %v710_v31 = vpop.permute.xlu1 %709 }
 0x38b   :  { %707 = vrot.lane.b32.xlu0 %v2953_v14, %s2582_s3  ;;  %v639_v14 = vmul.f32 0.20412415, %v633_v42 }
 0x38d   :  { %v3025_v21 = vsel %vm546_vm1, %v639_v14, -1e+30 }
 0x38e   :  { %v649_v24 = vsel %vm550_vm13, %v3025_v21, -inf }
 0x397   :  { %713 = vrot.lane.b32.xlu2 %v706_v8, %s2582_s3 }
 0x3b5   :  { %552 = vmax.xlane.f32.xlu0 %v551_v16  ;;  %v556_v32 = vpop.xlane.xlu1 %555 }
 0x3b6   :  { %v561_v35 = vsub.f32 %v548_v51, %v556_v32 }
 0x3b8   :  { %v565_v0 = vmul.f32 1.442695, %v561_v35  ;;  %v833_v35 = vmul.f32 0.20412415, %v2985_v43 }
 0x3bd   :  { %558 = vmax.xlane.f32.xlu0 %v557_v20 }
 0x3c0   :  { %650 = vmax.xlane.f32.xlu2 %v649_v24 }
 0x3c5   :  { %841 = vmax.xlane.f32.xlu0 %v840_v28 }
 0x3d8   :  { %586 = vrot.lane.b32.xlu2 %v585_v29, %s2582_s3 }
 0x3d9   :  { %1017 = vrot.lane.b32.xlu0 %v1016_v30, %s2582_s3  ;;  %v839_v30 = vpop.xlane.xlu1 %838 }
 0x3da   :  { %v846_v32 = vsub.f32 %v2993_v55, %v839_v30 }
 0x3ea   :  { %v663_v37 = vpop.xlane.xlu0 %662 }
 0x3f2   :  { %v666_v36 = vpop.xlane.xlu2 %665 }
 0x3f3   :  { %2220 = vrcp.f32 %v666_v36 }
 0x3f4   :  { %2222 = vrcp.f32 %v663_v37  ;;  %v849_v37 = vmul.f32 1.442695, %v846_v32 }
 0x3f5   :  { %2224 = vpow2.f32 %v565_v0  ;;  %v873_v0 = vpop.permute.xlu1 %872 }
 0x3f9   :  { %v2221_v40 = vpop.eup %2220 }
 0x3fa   :  { %v714_v38 = vpop.permute.xlu2 %713  ;;  %v2223_v44 = vpop.eup %2222  ;;  %v674_v46 = vmul.f32 %v2221_v40, %v2219_v10 }
 0x3fb   :  { %v716_v42 = vsel %vm589_vm8, %v712_v15, %v714_v38  ;;  %v3047_v47 = vpop.eup %2224  ;;  %v673_v48 = vmul.f32 %v2223_v44, %v2217_v3  ;;  %v874_v38 = vrot.slane %v873_v0, 4 }
 0x3fc   :  { %v726_v52 = vsel %vm724_vm3, %v716_v42, 0  ;;  %v572_v51 = vsel %vm550_vm13, %v3047_v47, 0.0 }
 0x3fd   :  { %v708_v45 = vpop.permute.xlu0 %707  ;;  %734 = vmatpush.bf16.msrb.mxu0 %v726_v52  ;;  %2181 = vmatpush.bf16.msrb.mxu1 %v726_v52  ;;  %v692_v53 = vpack.c.bf16 %v674_v46, %v673_v48  ;;  %v875_v55 = vsel %vm589_vm8, %v874_v38, %v873_v0 }
 0x3fe   :  { %v715_v50 = vsel %vm589_vm8, %v708_v45, %v710_v31  ;;  %v876_v52 = vunpack.c.l.b16 %v875_v55  ;;  %v877_v44 = vunpack.c.h.b16 %v875_v55 }
 0x400   :  { %vm880_vm9 = vcmp.ne.s32.totalorder %v876_v52, %v2935_v1  ;;  %vm881_vm10 = vcmp.ne.s32.totalorder %v877_v44, %v2938_v2 }
 0x401   :  { %735 = vmatpush.bf16.msrb.mxu0 %v715_v50  ;;  %2182 = vmatpush.bf16.msrb.mxu1 %v715_v50  ;;  %vm3102_vm11 = vmpackc.low %vm881_vm10, %vm880_vm9 }
 0x402   :  { %v885_v50 = vsel %vm3102_vm11, %v2912_v49, 0  ;;  %v884_v13 = vsel %vm3102_vm11, %v2903_v41, 0 }
 0x403   :  { %573 = vadd.xlane.f32.xlu0 %v572_v51  ;;  %v894_v52 = vunpack.c.h.b16 %v884_v13 }
 0x404   :  { %1901 = vmatmul.msk.bf16.vlgmr.msrb.gmra.mxu0 %vm550_vm13, %v692_v53  ;;  %v896_v53 = vunpack.c.h.b16 %v885_v50 }
 0x405   :  { %964 = vmatpush.bf16.xpose.msra.mxu0 %v2920_v57 }
 0x406   :  { %v900_v54 = vpack.c.b16 %v896_v53, %v896_v53 }
 0x40d   :  { %965 = vmatpush.bf16.xpose.msra.mxu0 %v2925_v22 }
 0x414   :  { %1909 = vmatmul.msk.bf16.vlgmr.msra.gmra.mxu0 %vm201_vm0, %v2899_v33 }
 0x424   :  { %1910 = vmatmul.msk.bf16.gmra.mxu0 %vm201_vm0, %v951_v56 }
 0x428   :  { %v553_v57 = vpop.xlane.xlu0 %552 }
 0x429   :  { %v560_v58 = vsub.f32 %v547_v11, %v553_v57 }
 0x42b   :  { %v563_v15 = vmul.f32 1.442695, %v560_v58  ;;  %v895_v58 = vunpack.c.l.b16 %v885_v50 }
 0x42d   :  { %2226 = vpow2.f32 %v563_v15 }
 0x430   :  { %v559_v25 = vpop.xlane.xlu0 %558 }
 0x431   :  { %v562_v28 = vsub.f32 %v3019_v5, %v559_v25  ;;  %v3087_v5 = vsel %vm546_vm1, %v833_v35, -1e+30 }
 0x432   :  { %v843_v43 = vsel %vm550_vm13, %v3087_v5, -inf }
 0x433   :  { %v3061_v59 = vpop.eup %2226  ;;  %v651_v60 = vpop.xlane.xlu2 %650  ;;  %v567_v29 = vmul.f32 1.442695, %v562_v28 }
 0x434   :  { %v569_v22 = vsel %vm550_vm13, %v3061_v59, 0.0  ;;  %v654_v20 = vsub.f32 %v3025_v21, %v651_v60 }
 0x435   :  { %570 = vadd.xlane.f32.xlu1 %v569_v22  ;;  %v899_v22 = vpack.c.b16 %v895_v58, %v895_v58 }
 0x436   :  { %v659_v24 = vmul.f32 1.442695, %v654_v20 }
 0x438   :  { %2228 = vpow2.f32 %v659_v24  ;;  %v842_v27 = vpop.xlane.xlu0 %841 }
 0x439   :  { %2230 = vpow2.f32 %v567_v29 }
 0x43a   :  { %2232 = vpow2.f32 %v849_v37 }
 0x43b   :  { %v587_v61 = vpop.permute.xlu2 %586 }
 0x43c   :  { %v588_v33 = vrot.slane %v587_v61, 4 }
 0x43e   :  { %v590_v62 = vsel %vm589_vm8, %v588_v33, %v587_v61  ;;  %v3077_v31 = vpop.eup %2228 }
 0x43f   :  { %v591_v17 = vunpack.c.l.b16 %v590_v62  ;;  %v592_v39 = vunpack.c.h.b16 %v590_v62  ;;  %v667_v36 = vsel %vm550_vm13, %v3077_v31, 0.0  ;;  %v3083_v21 = vpop.eup %2230 }
 0x440   :  { %v575_v40 = vsel %vm550_vm13, %v3083_v21, 0.0  ;;  %v3094_v42 = vpop.eup %2232 }
 0x441   :  { %vm595_vm5 = vcmp.ne.s32.totalorder %v591_v17, %v2935_v1  ;;  %vm596_vm6 = vcmp.ne.s32.totalorder %v592_v39, %v2938_v2  ;;  %v855_v45 = vsel %vm550_vm13, %v3094_v42, 0.0 }
 0x442   :  { %vm597_vm7 = vmpackc.low %vm596_vm6, %vm595_vm5 }
 0x443   :  { %v600_v63 = vsel %vm597_vm7, %v2912_v49, 0  ;;  %v598_v3 = vsel %vm597_vm7, %v2876_v19, 0  ;;  %v599_v23 = vsel %vm597_vm7, %v2903_v41, 0 }
 0x444   :  { %v753_v4 = vunpack.c.l.b16 %v600_v63  ;;  %v750_v10 = vunpack.c.h.b16 %v598_v3  ;;  %v752_v6 = vunpack.c.h.b16 %v599_v23  ;;  %v754_v9 = vunpack.c.h.b16 %v600_v63 }
 0x445   :  { %v749_v11 = vunpack.c.l.b16 %v598_v3  ;;  %v751_v16 = vunpack.c.l.b16 %v599_v23  ;;  %v847_v63 = vsub.f32 %v3031_v26, %v842_v27 }
 0x446   :  { %v757_v7 = vpack.c.b16 %v753_v4, %v753_v4  ;;  %v756_v8 = vpack.c.b16 %v752_v6, %v750_v10  ;;  %v758_v18 = vpack.c.b16 %v754_v9, %v754_v9  ;;  %v883_v4 = vsel %vm3102_vm11, %v2876_v19, 0 }
 0x447   :  { %v755_v14 = vpack.c.b16 %v751_v16, %v749_v11  ;;  %v851_v23 = vmul.f32 1.442695, %v847_v63  ;;  %v891_v6 = vunpack.c.l.b16 %v883_v4  ;;  %v892_v55 = vunpack.c.h.b16 %v883_v4 }
 0x448   :  { %763 = vrot.lane.b32.xlu2 %v757_v7, %s2582_s3  ;;  %761 = vrot.lane.b32.xlu0 %v756_v8, %s2582_s3  ;;  %v893_v7 = vunpack.c.l.b16 %v884_v13 }
 0x449   :  { %2234 = vpow2.f32 %v851_v23 }
 0x44a   :  { %v897_v11 = vpack.c.b16 %v893_v7, %v891_v6 }
 0x44b   :  { %v1018_v10 = vpop.permute.xlu0 %1017 }
 0x44c   :  { %v1019_v16 = vrot.slane %v1018_v10, 4 }
 0x44e   :  { %765 = vrot.lane.b32.xlu1 %v758_v18, %s2582_s3  ;;  %v1020_v25 = vsel %vm589_vm8, %v1019_v16, %v1018_v10 }
 0x44f   :  { %v3132_v8 = vpop.eup %2234  ;;  %v1021_v29 = vunpack.c.l.b16 %v1020_v25  ;;  %v1022_v30 = vunpack.c.h.b16 %v1020_v25 }
 0x450   :  { %759 = vrot.lane.b32.xlu2 %v755_v14, %s2582_s3  ;;  %v858_v18 = vsel %vm550_vm13, %v3132_v8, 0.0 }
 0x451   :  { %vm1026_vm15 = vcmp.ne.s32.totalorder %v1022_v30, %v2938_v2 }
 0x472   :  { %668 = vadd.xlane.f32.xlu0 %v667_v36 }
 0x476   :  { %v574_v14 = vpop.xlane.xlu0 %573 }
 0x478   :  { %576 = vadd.xlane.f32.xlu1 %v575_v40 }
 0x479   :  { %844 = vmax.xlane.f32.xlu2 %v843_v43 }
 0x481   :  { %v3098_v46 = vpop.f32.mrf.mxu0  ;;  %856 = vadd.xlane.f32.xlu2 %v855_v45  ;;  %v898_v45 = vpack.c.b16 %v894_v52, %v892_v55 }
 0x489   :  { %v3109_v51 = vpop.f32.mrf.mxu0 }
 0x491   :  { %v967_v56 = vpop.f32.mrf.mxu0  ;;  %907 = vrot.lane.b32.xlu1 %v900_v54, %s2582_s3 }
 0x492   :  { %v976_v57 = vmul.f32 0.20412415, %v967_v56 }
 0x494   :  { %v3114_v15 = vsel %vm544_vm12, %v976_v57, -1e+30  ;;  %vm1025_vm12 = vcmp.ne.s32.totalorder %v1021_v29, %v2935_v1 }
 0x495   :  { %v982_v60 = vsel %vm550_vm13, %v3114_v15, -inf }
 0x496   :  { %983 = vmax.xlane.f32.xlu0 %v982_v60 }
 0x499   :  { %v969_v61 = vpop.f32.mrf.mxu0  ;;  %905 = vrot.lane.b32.xlu2 %v899_v22, %s2582_s3 }
 0x49a   :  { %v977_v26 = vmul.f32 0.20412415, %v969_v61 }
 0x49c   :  { %v3140_v24 = vsel %vm545_vm14, %v977_v26, -1e+30  ;;  %vm1027_vm14 = vmpackc.low %vm1026_vm15, %vm1025_vm12 }
 0x49d   :  { %v985_v35 = vsel %vm550_vm13, %v3140_v24, -inf  ;;  %v1030_v38 = vsel %vm1027_vm14, %v2912_v49, 0  ;;  %v1028_v2 = vsel %vm1027_vm14, %v2876_v19, 0  ;;  %v1029_v48 = vsel %vm1027_vm14, %v2903_v41, 0 }
 0x49e   :  { %v1040_v40 = vunpack.c.l.b16 %v1030_v38  ;;  %v1041_v44 = vunpack.c.h.b16 %v1030_v38  ;;  %v1036_v50 = vunpack.c.l.b16 %v1028_v2  ;;  %v1038_v53 = vunpack.c.l.b16 %v1029_v48 }
 0x49f   :  { %v1037_v56 = vunpack.c.h.b16 %v1028_v2  ;;  %v1039_v57 = vunpack.c.h.b16 %v1029_v48 }
 0x4a0   :  { %v1044_v43 = vpack.c.b16 %v1040_v40, %v1040_v40  ;;  %v1045_v1 = vpack.c.b16 %v1041_v44, %v1041_v44  ;;  %v1042_v49 = vpack.c.b16 %v1038_v53, %v1036_v50 }
 0x4a1   :  { %v972_v33 = vpop.f32.mrf.mxu0  ;;  %v1043_v58 = vpack.c.b16 %v1039_v57, %v1037_v56 }
 0x4a2   :  { %v978_v62 = vmul.f32 0.20412415, %v972_v33  ;;  %v764_v20 = vpop.permute.xlu2 %763 }
 0x4a4   :  { %v3121_v17 = vsel %vm546_vm1, %v978_v62, -1e+30 }
 0x4a5   :  { %v988_v39 = vsel %vm550_vm13, %v3121_v17, -inf }
 0x4a6   :  { %989 = vmax.xlane.f32.xlu0 %v988_v39 }
 0x4a8   :  { %v571_v9 = vpop.xlane.xlu1 %570 }
 0x4a9   :  { %v974_v3 = vpop.f32.mrf.mxu0 }
 0x4aa   :  { %v760_v34 = vpop.permute.xlu2 %759 }
 0x4ba   :  { %901 = vrot.lane.b32.xlu0 %v897_v11, %s2582_s3  ;;  %v762_v37 = vpop.permute.xlu0 %761 }
 0x4bb   :  { %859 = vadd.xlane.f32.xlu1 %v858_v18  ;;  %v767_v0 = vsel %vm589_vm8, %v760_v34, %v762_v37 }
 0x4c0   :  { %v766_v28 = vpop.permute.xlu1 %765 }
 0x4c1   :  { %v768_v32 = vsel %vm589_vm8, %v764_v20, %v766_v28 }
 0x4c2   :  { %v777_v36 = vsel %vm724_vm3, %v768_v32, 0  ;;  %986 = vmax.xlane.f32.xlu2 %v985_v35 }
 0x4c3   :  { %785 = vmatpush.bf16.msra.mxu1 %v777_v36 }
 0x4c7   :  { %786 = vmatpush.bf16.msra.mxu1 %v767_v0 }
 0x4d4   :  { %1050 = vrot.lane.b32.xlu1 %v1044_v43, %s2582_s3 }
 0x4da   :  { %903 = vrot.lane.b32.xlu2 %v898_v45, %s2582_s3 }
 0x4dc   :  { %1052 = vrot.lane.b32.xlu1 %v1045_v1, %s2582_s3 }
 0x4e4   :  { %1046 = vrot.lane.b32.xlu1 %v1042_v49, %s2582_s3 }
 0x4e5   :  { %v669_v54 = vpop.xlane.xlu0 %668 }
 0x4e6   :  { %2236 = vrcp.f32 %v669_v54 }
 0x4e7   :  { %2238 = vrcp.f32 %v571_v9 }
 0x4e8   :  { %2240 = vrcp.f32 %v574_v14 }
 0x4eb   :  { %v577_v27 = vpop.xlane.xlu1 %576 }
 0x4ec   :  { %v2237_v60 = vpop.eup %2236  ;;  %1048 = vrot.lane.b32.xlu1 %v1043_v58, %s2582_s3  ;;  %v845_v19 = vpop.xlane.xlu2 %844  ;;  %2242 = vrcp.f32 %v577_v27 }
 0x4ed   :  { %v675_v22 = vmul.f32 %v2237_v60, %v3077_v31  ;;  %v2239_v41 = vpop.eup %2238  ;;  %v848_v4 = vsub.f32 %v3087_v5, %v845_v19 }
 0x4ee   :  { %v2241_v62 = vpop.eup %2240  ;;  %v581_v39 = vmul.f32 %v2239_v41, %v3061_v59 }
 0x4ef   :  { %v693_v61 = vpack.c.bf16 %v675_v22, %v675_v22  ;;  %v582_v63 = vmul.f32 %v2241_v62, %v3047_v47  ;;  %v853_v7 = vmul.f32 1.442695, %v848_v4 }
 0x4f1   :  { %1902 = vmatmul.msk.bf16.vlgmr.msrb.gmra.mxu1 %vm550_vm13, %v693_v61  ;;  %v601_v3 = vpack.c.bf16 %v582_v63, %v581_v39  ;;  %2244 = vpow2.f32 %v853_v7  ;;  %v2134_v7 = vld [vmem:[%s3511_s6 + $0x18] sm:$0xff] }
 0x4f2   :  { %v2243_v6 = vpop.eup %2242 }
 0x4f3   :  { %v583_v47 = vmul.f32 %v2243_v6, %v3083_v21 }
 0x4f4   :  { %v857_v33 = vpop.xlane.xlu2 %856 }
 0x4f5   :  { %v602_v16 = vpack.c.bf16 %v583_v47, %v583_v47 }
 0x4f7   :  { %v2245_v26 = vpop.eup %2244 }
 0x4f8   :  { %v861_v18 = vsel %vm550_vm13, %v2245_v26, 0.0 }
 0x4fc   :  { %v906_v23 = vpop.permute.xlu2 %905 }
 0x501   :  { %1903 = vmatmul.msk.bf16.vlgmr.msra.gmra.mxu1 %vm550_vm13, %v601_v3 }
 0x503   :  { %v908_v31 = vpop.permute.xlu1 %907 }
 0x504   :  { %v910_v13 = vsel %vm589_vm8, %v906_v23, %v908_v31 }
 0x505   :  { %v919_v10 = vsel %vm724_vm3, %v910_v13, 0  ;;  %v2136_v13 = vld [vmem:[%s3511_s6 + $0x28] sm:$0xff] }
 0x506   :  { %927 = vmatpush.bf16.msra.mxu3 %v919_v10  ;;  %1149 = vmatpush.bf16.msrb.mxu2 %v2136_v13  ;;  %v2135_v10 = vld [vmem:[%s3511_s6 + $0x20] sm:$0xff] }
 0x509   :  { %v984_v9 = vpop.xlane.xlu0 %983 }
 0x50a   :  { %v991_v59 = vsub.f32 %v3114_v15, %v984_v9  ;;  %1150 = vmatpush.bf16.msrb.mxu2 %v2135_v10  ;;  %v2133_v9 = vld [vmem:[%s3511_s6 + $0x10] sm:$0xff]  ;;  %v2003_v10 = vld [vmem:[%s3516_s11 + $0x84] sm:$0xf0] }
 0x50c   :  { %v994_v11 = vmul.f32 1.442695, %v991_v59 }
 0x50e   :  { %2246 = vpow2.f32 %v994_v11  ;;  %1151 = vmatpush.bf16.msrb.mxu2 %v2134_v7  ;;  %v2132_v11 = vld [vmem:[%s3511_s6 + $0x8] sm:$0xff] }
 0x50f   :  { %v2154_v7 = vld [vmem:[%s3516_s11 + $0x88] sm:$0xf0] }
 0x511   :  { %1904 = vmatmul.msk.bf16.gmra.mxu1 %vm550_vm13, %v602_v16 }
 0x512   :  { %1152 = vmatpush.bf16.msrb.mxu2 %v2133_v9 }
 0x514   :  { %v2247_v5 = vpop.eup %2246 }
 0x515   :  { %v1000_v14 = vsel %vm550_vm13, %v2247_v5, 0.0 }
 0x516   :  { %862 = vadd.xlane.f32.xlu1 %v861_v18  ;;  %1001 = vadd.xlane.f32.xlu0 %v1000_v14 }
 0x517   :  { %1153 = vmatpush.bf16.msrb.mxu2 %v2132_v11  ;;  %v2150_v11 = vld [vmem:[%s3516_s11 + $0x68] sm:$0xf0] }
 0x519   :  { %v990_v15 = vpop.xlane.xlu0 %989 }
 0x51a   :  { %v993_v28 = vsub.f32 %v3121_v17, %v990_v15 }
 0x51c   :  { %v998_v35 = vmul.f32 1.442695, %v993_v28 }
 0x52c   :  { %v902_v37 = vpop.permute.xlu0 %901 }
 0x52e   :  { %v860_v20 = vpop.xlane.xlu1 %859 }
 0x52f   :  { %2248 = vrcp.f32 %v860_v20 }
 0x530   :  { %2250 = vrcp.f32 %v857_v33 }
 0x535   :  { %v987_v25 = vpop.xlane.xlu2 %986  ;;  %v2249_v30 = vpop.eup %2248 }
 0x536   :  { %v992_v21 = vsub.f32 %v3140_v24, %v987_v25  ;;  %v2251_v32 = vpop.eup %2250  ;;  %v868_v36 = vmul.f32 %v2249_v30, %v3132_v8 }
 0x537   :  { %v867_v0 = vmul.f32 %v2251_v32, %v3094_v42 }
 0x538   :  { %v996_v29 = vmul.f32 1.442695, %v992_v21 }
 0x539   :  { %v886_v43 = vpack.c.bf16 %v868_v36, %v867_v0  ;;  %v2203_v0 = vld [vmem:[#allocation10] ss:$0 sm:$0xff] }
 0x53a   :  { %2252 = vpow2.f32 %v996_v29 }
 0x53b   :  { %2254 = vpow2.f32 %v998_v35 }
 0x53d   :  { %v904_v34 = vpop.permute.xlu2 %903 }
 0x53e   :  { %v909_v38 = vsel %vm589_vm8, %v902_v37, %v904_v34  ;;  %v2202_v34 = vld [vmem:[#allocation8] ss:$0 sm:$0xff] }
 0x53f   :  { %928 = vmatpush.bf16.msra.mxu3 %v909_v38 }
 0x540   :  { %v2253_v40 = vpop.eup %2252 }
 0x541   :  { %v1003_v24 = vsel %vm550_vm13, %v2253_v40, 0.0  ;;  %v2255_v17 = vpop.eup %2254 }
 0x542   :  { %1004 = vadd.xlane.f32.xlu2 %v1003_v24  ;;  %1907 = vmatmul.msk.bf16.vlgmr.msra.gmra.mxu3 %vm550_vm13, %v886_v43  ;;  %v1006_v52 = vsel %vm550_vm13, %v2255_v17, 0.0 }
 0x546   :  { %v1051_v55 = vpop.permute.xlu1 %1050 }
 0x54a   :  { %1007 = vadd.xlane.f32.xlu2 %v1006_v52 }
 0x54e   :  { %v1053_v8 = vpop.permute.xlu1 %1052 }
 0x54f   :  { %v1055_v44 = vsel %vm589_vm8, %v1051_v55, %v1053_v8  ;;  %v2289_v8 = vld [vmem:[%s3524_s12 + $0x8] sm:$0xff] }
 0x550   :  { %v1064_v42 = vsel %vm724_vm3, %v1055_v44, 0 }
 0x551   :  { %1072 = vmatpush.bf16.msrb.mxu1 %v1064_v42 }
 0x556   :  { %v1047_v45 = vpop.permute.xlu1 %1046 }
 0x55e   :  { %v1049_v1 = vpop.permute.xlu1 %1048 }
 0x55f   :  { %v1054_v2 = vsel %vm589_vm8, %v1047_v45, %v1049_v1 }
 0x560   :  { %1073 = vmatpush.bf16.msrb.mxu1 %v1054_v2 }
 0x56e   :  { %v742_v48 = vpop.f32.mrf.mxu1 }
 0x576   :  { %v744_v50 = vpop.f32.mrf.mxu1 }
 0x57e   :  { %v788_v53 = vpop.f32.mrf.mxu1 }
 0x57f   :  { %v789_v18 = vadd.f32 %v788_v53, %v3098_v46 }
 0x586   :  { %v790_v49 = vpop.f32.mrf.mxu1 }
 0x587   :  { %v791_v14 = vadd.f32 %v790_v49, %v3109_v51 }
 0x589   :  { %v863_v54 = vpop.xlane.xlu1 %862  ;;  %v1002_v61 = vpop.xlane.xlu0 %1001 }
 0x58a   :  { %2256 = vrcp.f32 %v863_v54 }
 0x58b   :  { %2258 = vrcp.f32 %v1002_v61 }
 0x58e   :  { %v793_v56 = vpop.f32.mrf.mxu1 }
 0x58f   :  { %v794_v57 = vadd.f32 %v793_v56, %v742_v48  ;;  %v2290_v48 = vld [vmem:[%s3524_s12 + $0x10] sm:$0xff] }
 0x590   :  { %v2257_v58 = vpop.eup %2256 }
 0x591   :  { %v869_v60 = vmul.f32 %v2257_v58, %v2245_v26  ;;  %v2259_v33 = vpop.eup %2258  ;;  %v2131_v26 = vld [vmem:[%s3511_s6] sm:$0xff] }
 0x592   :  { %v1012_v39 = vmul.f32 %v2259_v33, %v2247_v5  ;;  %1154 = vmatpush.bf16.msrb.mxu2 %v2131_v26 }
 0x593   :  { %v887_v22 = vpack.c.bf16 %v869_v60, %v869_v60 }
 0x595   :  { %1908 = vmatmul.msk.bf16.gmra.mxu3 %vm550_vm13, %v887_v22 }
 0x596   :  { %v795_v19 = vpop.f32.mrf.mxu1 }
 0x5b5   :  { %v1005_v41 = vpop.xlane.xlu2 %1004 }
 0x5b6   :  { %2260 = vrcp.f32 %v1005_v41 }
 0x5bc   :  { %v2261_v62 = vpop.eup %2260 }
 0x5bd   :  { %v1013_v27 = vmul.f32 %v2261_v62, %v2253_v40  ;;  %v1008_v3 = vpop.xlane.xlu2 %1007  ;;  %v2288_v40 = vld [vmem:[%s3524_s12] sm:$0xff] }
 0x5be   :  { %2262 = vrcp.f32 %v1008_v3 }
 0x5bf   :  { %v1031_v63 = vpack.c.bf16 %v1013_v27, %v1012_v39 }
 0x5c1   :  { %1911 = vmatmul.msk.bf16.vlgmr.msrb.gmra.mxu1 %vm550_vm13, %v1031_v63 }
 0x5c4   :  { %v2263_v23 = vpop.eup %2262 }
 0x5c5   :  { %v1014_v31 = vmul.f32 %v2263_v23, %v2255_v17  ;;  %v930_v6 = vpop.f32.mrf.mxu3  ;;  %v2001_v23 = vld [vmem:[%s3516_s11 + $0x78] sm:$0xf] }
 0x5c6   :  { %v939_v20 = vadd.f32 %v930_v6, %v789_v18  ;;  %v2009_v6 = vld [vmem:[%s3516_s11 + $0x80] sm:$0xf]  ;;  %v1997_v18 = vld [vmem:[%s3516_s11 + $0x68] sm:$0xf] }
 0x5c7   :  { %v1032_v4 = vpack.c.bf16 %v1014_v31, %v1014_v31  ;;  %v2153_v31 = vld [vmem:[%s3516_s11 + $0x80] sm:$0xf0] }
 0x5c8   :  { %v2002_v13 = vor.u32 %v2153_v31, %v2001_v23 }
 0x5ca   :  { %1393 = vmatpush.bf16.msrb.mxu3 %v2002_v13 }
 0x5cd   :  { %v932_v59 = vpop.f32.mrf.mxu3 }
 0x5ce   :  { %v940_v15 = vadd.f32 %v932_v59, %v791_v14  ;;  %v2010_v59 = vor.u32 %v2154_v7, %v2009_v6  ;;  %v2151_v14 = vld [vmem:[%s3516_s11 + $0x70] sm:$0xf0] }
 0x5d0   :  { %1429 = vmatpush.bf16.msra.mxu1 %v2010_v59 }
 0x5d1   :  { %1912 = vmatmul.msk.bf16.gmra.mxu1 %vm550_vm13, %v1032_v4  ;;  %v2152_v4 = vld [vmem:[%s3516_s11 + $0x7c] sm:$0xf] }
 0x5d2   :  { %v2006_v9 = vor.u32 %v2152_v4, %v2003_v10 }
 0x5d4   :  { %1411 = vmatpush.bf16.msrb.mxu0 %v2006_v9 }
 0x618   :  { %v935_v47 = vpop.f32.mrf.mxu3 }
 0x619   :  { %v941_v32 = vadd.f32 %v935_v47, %v794_v57  ;;  %v1989_v47 = vld [vmem:[%s3516_s11 + $0x60] sm:$0xf] }
 0x61a   :  { %v1990_v26 = vor.u32 %v2150_v11, %v1989_v47 }
 0x61c   :  { %1394 = vmatpush.bf16.msrb.mxu3 %v1990_v26 }
 0x620   :  { %v937_v16 = vpop.f32.mrf.mxu3 }
 0x621   :  { %v2149_v16 = vld [vmem:[%s3516_s11 + $0x64] sm:$0xf] }
 0x63e   :  { %v1075_v5 = vpop.f32.mrf.mxu1 }
 0x63f   :  { %v1084_v21 = vadd.f32 %v1075_v5, %v939_v20  ;;  %v1991_v5 = vld [vmem:[%s3516_s11 + $0x6c] sm:$0xf0] }
 0x640   :  { %v1994_v20 = vor.u32 %v2149_v16, %v1991_v5 }
 0x642   :  { %1412 = vmatpush.bf16.msrb.mxu0 %v1994_v20 }
 0x646   :  { %v1077_v25 = vpop.f32.mrf.mxu1 }
 0x647   :  { %v1085_v28 = vadd.f32 %v1077_v25, %v940_v15  ;;  %v1998_v15 = vor.u32 %v2151_v14, %v1997_v18  ;;  %v1977_v25 = vld [vmem:[%s3516_s11 + $0x48] sm:$0xf] }
 0x649   :  { %v1099_v29 = vpack.c.bf16 %v1085_v28, %v1084_v21  ;;  %v2147_v21 = vld [vmem:[%s3516_s11 + $0x50] sm:$0xf0]  ;;  %1430 = vmatpush.bf16.msra.mxu1 %v1998_v15  ;;  %v2146_v28 = vld [vmem:[%s3516_s11 + $0x4c] sm:$0xf] }
 0x64b   :  { %1937 = vmatmul.msk.bf16.vlgmr.msrb.gmra.mxu2 %vm201_vm0, %v1099_v29  ;;  %v1978_v29 = vor.u32 %v2147_v21, %v1977_v25  ;;  %v2204_v21 = vld [vmem:[#allocation11] ss:$0 sm:$0xff] }
 0x64d   :  { %1395 = vmatpush.bf16.msrb.mxu3 %v1978_v29 }
 0x64e   :  { %v1080_v30 = vpop.f32.mrf.mxu1 }
 0x64f   :  { %v1086_v35 = vadd.f32 %v1080_v30, %v941_v32  ;;  %v1979_v30 = vld [vmem:[%s3516_s11 + $0x54] sm:$0xf0]  ;;  %v1985_v32 = vld [vmem:[%s3516_s11 + $0x50] sm:$0xf] }
 0x651   :  { %v1100_v37 = vpack.c.bf16 %v1086_v35, %v1086_v35  ;;  %v2148_v35 = vld [vmem:[%s3516_s11 + $0x58] sm:$0xf0] }
 0x656   :  { %v1082_v36 = vpop.f32.mrf.mxu1 }
 0x657   :  { %v1982_v36 = vor.u32 %v2146_v28, %v1979_v30 }
 0x659   :  { %1413 = vmatpush.bf16.msrb.mxu0 %v1982_v36 }
 0x65b   :  { %1938 = vmatmul.msk.bf16.gmra.mxu2 %vm201_vm0, %v1100_v37  ;;  %v1986_v37 = vor.u32 %v2148_v35, %v1985_v32  ;;  %v2205_v35 = vld [vmem:[#allocation13] ss:$0 sm:$0xff] }
 0x65d   :  { %1431 = vmatpush.bf16.msra.mxu1 %v1986_v37 }
 0x6ce   :  { %v1156_v46 = vpop.f32.mrf.mxu2 }
 0x6cf   :  { %v1157_v38 = vadd.f32 %v2202_v34, %v1156_v46  ;;  %v2143_v46 = vld [vmem:[%s3516_s11 + $0x34] sm:$0xf] }
 0x6d1   :  { %v1169_v51 = vmul.f32 %v2203_v0, %v1157_v38 }
 0x6d3   :  { %v3209_v43 = vadd.f32 %v2288_v40, %v1169_v51  ;;  %v1967_v51 = vld [vmem:[%s3516_s11 + $0x3c] sm:$0xf0]  ;;  %v1973_v40 = vld [vmem:[%s3516_s11 + $0x38] sm:$0xf] }
 0x6d5   :  { %v1177_v24 = vsel %vm201_vm0, %v3209_v43, 0.0 }
 0x6d6   :  { %v1158_v17 = vpop.f32.mrf.mxu2  ;;  %1178 = vadd.xlane.f32.xlu0 %v1177_v24  ;;  %v2145_v24 = vld [vmem:[%s3516_s11 + $0x40] sm:$0xf0] }
 0x6d7   :  { %v1159_v55 = vadd.f32 %v2202_v34, %v1158_v17  ;;  %v1970_v17 = vor.u32 %v2143_v46, %v1967_v51 }
 0x6d9   :  { %v1170_v52 = vmul.f32 %v2203_v0, %v1159_v55  ;;  %v1974_v55 = vor.u32 %v2145_v24, %v1973_v40  ;;  %1414 = vmatpush.bf16.msrb.mxu0 %v1970_v17 }
 0x6db   :  { %v3216_v44 = vadd.f32 %v2289_v8, %v1170_v52  ;;  %1432 = vmatpush.bf16.msra.mxu1 %v1974_v55  ;;  %v1953_v52 = vld [vmem:[%s3516_s11 + $0x18] sm:$0xf]  ;;  %v2141_v8 = vld [vmem:[%s3516_s11 + $0x20] sm:$0xf0] }
 0x6dd   :  { %v1180_v42 = vsel %vm201_vm0, %v3216_v44, 0.0 }
 0x6de   :  { %1181 = vadd.xlane.f32.xlu2 %v1180_v42  ;;  %v1161_v45 = vpop.f32.mrf.mxu2  ;;  %v2140_v42 = vld [vmem:[%s3516_s11 + $0x1c] sm:$0xf] }
 0x6df   :  { %v1162_v1 = vadd.f32 %v2202_v34, %v1161_v45  ;;  %v1965_v34 = vld [vmem:[%s3516_s11 + $0x30] sm:$0xf]  ;;  %v1954_v45 = vor.u32 %v2141_v8, %v1953_v52  ;;  %v2170_v8 = vld [vmem:[%s3518_s13 + $0x78] sm:$0xff] }
 0x6e1   :  { %v1171_v2 = vmul.f32 %v2203_v0, %v1162_v1  ;;  %v2144_v0 = vld [vmem:[%s3516_s11 + $0x38] sm:$0xf0]  ;;  %v1955_v1 = vld [vmem:[%s3516_s11 + $0x24] sm:$0xf0] }
 0x6e2   :  { %v1966_v38 = vor.u32 %v2144_v0, %v1965_v34 }
 0x6e3   :  { %v3223_v50 = vadd.f32 %v2290_v48, %v1171_v2  ;;  %v1961_v2 = vld [vmem:[%s3516_s11 + $0x20] sm:$0xf]  ;;  %v2142_v48 = vld [vmem:[%s3516_s11 + $0x28] sm:$0xf0] }
 0x6e4   :  { %1396 = vmatpush.bf16.msrb.mxu3 %v1966_v38 }
 0x6e5   :  { %v1183_v53 = vsel %vm201_vm0, %v3223_v50, 0.0 }
 0x6e6   :  { %v1163_v49 = vpop.f32.mrf.mxu2  ;;  %1184 = vadd.xlane.f32.xlu0 %v1183_v53 }
 0x6e7   :  { %v1958_v49 = vor.u32 %v2140_v42, %v1955_v1  ;;  %v2178_v42 = vld [vmem:[%s3518_s13 + $0xb8] sm:$0xff] }
 0x6e8   :  { %1397 = vmatpush.bf16.msrb.mxu3 %v1954_v45  ;;  %v2177_v45 = vld [vmem:[%s3518_s13 + $0xb0] sm:$0xff]  ;;  %v2162_v1 = vld [vmem:[%s3518_s13 + $0x38] sm:$0xff] }
 0x6e9   :  { %1415 = vmatpush.bf16.msrb.mxu0 %v1958_v49  ;;  %1728 = vmatpush.bf16.msra.mxu2 %v2162_v1  ;;  %v2167_v49 = vld [vmem:[%s3518_s13 + $0x60] sm:$0xff] }
 0x749   :  { %v1179_v54 = vpop.xlane.xlu0 %1178 }
 0x74a   :  { %v1186_v56 = vmul.f32 %v1179_v54, %v2713_v12  ;;  %v1962_v54 = vor.u32 %v2142_v48, %v1961_v2  ;;  %v2168_v2 = vld [vmem:[%s3518_s13 + $0x68] sm:$0xff] }
 0x74b   :  { %v2176_v48 = vld [vmem:[%s3518_s13 + $0xa8] sm:$0xff] }
 0x74c   :  { %v3229_v57 = vsub.f32 %v3209_v43, %v1186_v56  ;;  %1433 = vmatpush.bf16.msra.mxu1 %v1962_v54  ;;  %v2175_v54 = vld [vmem:[%s3518_s13 + $0xa0] sm:$0xff] }
 0x74e   :  { %v1192_v58 = vmul.f32 %v3229_v57, %v3229_v57 }
 0x750   :  { %v1195_v60 = vsel %vm201_vm0, %v1192_v58, 0.0  ;;  %v1941_v58 = vld [vmem:[%s3516_s11] sm:$0xf] }
 0x751   :  { %v1182_v22 = vpop.xlane.xlu2 %1181  ;;  %1196 = vadd.xlane.f32.xlu2 %v1195_v60  ;;  %v2138_v60 = vld [vmem:[%s3516_s11 + $0x8] sm:$0xf0] }
 0x752   :  { %v1187_v19 = vmul.f32 %v1182_v22, %v2713_v12  ;;  %v2137_v22 = vld [vmem:[%s3516_s11 + $0x4] sm:$0xf] }
 0x754   :  { %v3236_v61 = vsub.f32 %v3216_v44, %v1187_v19 }
 0x756   :  { %v1193_v41 = vmul.f32 %v3236_v61, %v3236_v61 }
 0x758   :  { %v1198_v33 = vsel %vm201_vm0, %v1193_v41, 0.0  ;;  %v1942_v41 = vor.u32 %v2138_v60, %v1941_v58  ;;  %v2166_v58 = vld [vmem:[%s3518_s13 + $0x58] sm:$0xff] }
 0x759   :  { %1199 = vadd.xlane.f32.xlu0 %v1198_v33  ;;  %v1185_v62 = vpop.xlane.xlu0 %1184  ;;  %v1943_v33 = vld [vmem:[%s3516_s11 + $0xc] sm:$0xf0]  ;;  %v2174_v60 = vld [vmem:[%s3518_s13 + $0x98] sm:$0xff] }
 0x75a   :  { %v1188_v39 = vmul.f32 %v1185_v62, %v2713_v12  ;;  %v1949_v62 = vld [vmem:[%s3516_s11 + $0x8] sm:$0xf]  ;;  %1398 = vmatpush.bf16.msrb.mxu3 %v1942_v41  ;;  %v2173_v41 = vld [vmem:[%s3518_s13 + $0x90] sm:$0xff] }
 0x75c   :  { %v3243_v27 = vsub.f32 %v3223_v50, %v1188_v39  ;;  %v1946_v39 = vor.u32 %v2137_v22, %v1943_v33  ;;  %v2159_v22 = vld [vmem:[%s3518_s13 + $0x20] sm:$0xff]  ;;  %v1281_v33 = vld [vmem:[#allocation14] sm:$0x7] }
 0x75e   :  { %v1194_v63 = vmul.f32 %v3243_v27, %v3243_v27  ;;  %1416 = vmatpush.bf16.msrb.mxu0 %v1946_v39  ;;  %1746 = vmatpush.bf16.msra.mxu3 %v2170_v8  ;;  %v2164_v39 = vld [vmem:[%s3518_s13 + $0x48] sm:$0xff] }
 0x760   :  { %v1201_v3 = vsel %vm201_vm0, %v1194_v63, 0.0  ;;  %v2139_v63 = vld [vmem:[%s3516_s11 + $0x10] sm:$0xf0] }
 0x761   :  { %1202 = vadd.xlane.f32.xlu2 %v1201_v3  ;;  %v1950_v3 = vor.u32 %v2139_v63, %v1949_v62  ;;  %v2158_v62 = vld [vmem:[%s3518_s13 + $0x18] sm:$0xff]  ;;  %v2172_v63 = vld [vmem:[%s3518_s13 + $0x88] sm:$0xff] }
 0x762   :  { %1764 = vmatpush.bf16.msra.mxu0 %v2178_v42 }
 0x763   :  { %1434 = vmatpush.bf16.msra.mxu1 %v1950_v3  ;;  %v1284_v3 = vperm.slane %v1281_v33, 1 }
 0x766   :  { %1765 = vmatpush.bf16.msra.mxu0 %v2177_v45 }
 0x76a   :  { %1766 = vmatpush.bf16.msra.mxu0 %v2176_v48 }
 0x76e   :  { %1767 = vmatpush.bf16.msra.mxu0 %v2175_v54 }
 0x772   :  { %1768 = vmatpush.bf16.msra.mxu0 %v2174_v60 }
 0x776   :  { %1769 = vmatpush.bf16.msra.mxu0 %v2173_v41 }
 0x77a   :  { %1770 = vmatpush.bf16.msra.mxu0 %v2172_v63 }
 0x7c4   :  { %v1197_v53 = vpop.xlane.xlu2 %1196 }
 0x7c5   :  { %v1204_v56 = vmul.f32 %v1197_v53, %v2713_v12  ;;  %v2161_v53 = vld [vmem:[%s3518_s13 + $0x30] sm:$0xff] }
 0x7c6   :  { %1729 = vmatpush.bf16.msra.mxu2 %v2161_v53 }
 0x7c7   :  { %v1207_v19 = vadd.f32 1e-06, %v1204_v56  ;;  %v2160_v56 = vld [vmem:[%s3518_s13 + $0x28] sm:$0xff] }
 0x7c9   :  { %2264 = vrsqrt.f32 %v1207_v19  ;;  %vm1216_vm13 = vweird.f32 %v1207_v19 }
 0x7ca   :  { %1730 = vmatpush.bf16.msra.mxu2 %v2160_v56 }
 0x7cc   :  { %v1200_v23 = vpop.xlane.xlu0 %1199 }
 0x7cd   :  { %v1205_v31 = vmul.f32 %v1200_v23, %v2713_v12  ;;  %v1285_v23 = vperm.slane %v1281_v33, 2 }
 0x7ce   :  { %1731 = vmatpush.bf16.msra.mxu2 %v2159_v22 }
 0x7cf   :  { %v2265_v4 = vpop.eup %2264  ;;  %v1208_v13 = vadd.f32 1e-06, %v1205_v31  ;;  %v2157_v31 = vld [vmem:[%s3518_s13 + $0x10] sm:$0xff] }
 0x7d0   :  { %v1211_v10 = vmul.f32 %v2265_v4, %v1207_v19  ;;  %vm1217_vm8 = vweird.f32 %v2265_v4  ;;  %v2165_v19 = vld [vmem:[%s3518_s13 + $0x50] sm:$0xff] }
 0x7d1   :  { %2266 = vrsqrt.f32 %v1208_v13  ;;  %vm1218_vm1 = vmor %vm1216_vm13, %vm1217_vm8  ;;  %vm1226_vm4 = vweird.f32 %v1208_v13 }
 0x7d2   :  { %v1212_v6 = vmul.f32 %v2265_v4, %v1211_v10  ;;  %1732 = vmatpush.bf16.msra.mxu2 %v2158_v62  ;;  %v2171_v10 = vld [vmem:[%s3518_s13 + $0x80] sm:$0xff] }
 0x7d3   :  { %1771 = vmatpush.bf16.msra.mxu0 %v2171_v10 }
 0x7d4   :  { %v1213_v7 = vmul.f32 0.5, %v1212_v6  ;;  %v1203_v9 = vpop.xlane.xlu2 %1202 }
 0x7d5   :  { %v1206_v59 = vmul.f32 %v1203_v9, %v2713_v12 }
 0x7d6   :  { %v1214_v47 = vsub.f32 1.5, %v1213_v7  ;;  %1733 = vmatpush.bf16.msra.mxu2 %v2157_v31 }
 0x7d7   :  { %v2267_v11 = vpop.eup %2266  ;;  %v1209_v16 = vadd.f32 1e-06, %v1206_v59  ;;  %v2156_v59 = vld [vmem:[%s3518_s13 + $0x8] sm:$0xff] }
 0x7d8   :  { %v1215_v26 = vmul.f32 %v2265_v4, %v1214_v47  ;;  %v1221_v5 = vmul.f32 %v2267_v11, %v1208_v13  ;;  %vm1227_vm2 = vweird.f32 %v2267_v11  ;;  %v2163_v13 = vld [vmem:[%s3518_s13 + $0x40] sm:$0xff] }
 0x7d9   :  { %2268 = vrsqrt.f32 %v1209_v16  ;;  %vm1228_vm3 = vmor %vm1226_vm4, %vm1227_vm2  ;;  %vm1236_vm6 = vweird.f32 %v1209_v16 }
 0x7da   :  { %v1222_v18 = vmul.f32 %v2267_v11, %v1221_v5  ;;  %v1219_v14 = vsel %vm1218_vm1, %v2265_v4, %v1215_v26  ;;  %1734 = vmatpush.bf16.msra.mxu2 %v2156_v59 }
 0x7db   :  { %v1240_v28 = vmul.f32 %v1219_v14, %v3229_v57  ;;  %v2155_v14 = vld [vmem:[%s3518_s13] sm:$0xff] }
 0x7dc   :  { %v1223_v20 = vmul.f32 0.5, %v1222_v18 }
 0x7dd   :  { %v1246_v36 = vmul.f32 %v2204_v21, %v1240_v28 }
 0x7de   :  { %v1224_v15 = vsub.f32 1.5, %v1223_v20  ;;  %1735 = vmatpush.bf16.msra.mxu2 %v2155_v14 }
 0x7df   :  { %v2269_v25 = vpop.eup %2268  ;;  %v1252_v38 = vadd.f32 %v2205_v35, %v1246_v36 }
 0x7e0   :  { %v1225_v29 = vmul.f32 %v2267_v11, %v1224_v15  ;;  %v1231_v12 = vmul.f32 %v2269_v25, %v1209_v16  ;;  %vm1237_vm5 = vweird.f32 %v2269_v25 }
 0x7e1   :  { %vm1238_vm7 = vmor %vm1236_vm6, %vm1237_vm5 }
 0x7e2   :  { %v1229_v30 = vsel %vm1228_vm3, %v2267_v11, %v1225_v29  ;;  %v1232_v32 = vmul.f32 %v2269_v25, %v1231_v12  ;;  %v1283_v11 = vperm.slane %v1281_v33, 0 }
 0x7e3   :  { %v1241_v37 = vmul.f32 %v1229_v30, %v3236_v61 }
 0x7e4   :  { %v1233_v34 = vmul.f32 0.5, %v1232_v32 }
 0x7e5   :  { %v1247_v0 = vmul.f32 %v2204_v21, %v1241_v37 }
 0x7e6   :  { %v1234_v46 = vsub.f32 1.5, %v1233_v34 }
 0x7e7   :  { %v1253_v51 = vadd.f32 %v2205_v35, %v1247_v0 }
 0x7e8   :  { %v1235_v40 = vmul.f32 %v2269_v25, %v1234_v46 }
 0x7e9   :  { %v1279_v57 = vpack.c.bf16 %v1253_v51, %v1252_v38 }
 0x7ea   :  { %v1239_v24 = vsel %vm1238_vm7, %v2269_v25, %v1235_v40 }
 0x7eb   :  { %2011 = vmatmul.msk.bf16.vlgmr.msrb.gmra.mxu3 %vm201_vm0, %v1279_v57  ;;  %2013 = vmatmul.msk.bf16.vlgmr.msrb.gmra.mxu0 %vm201_vm0, %v1279_v57  ;;  %v1242_v17 = vmul.f32 %v1239_v24, %v3243_v27  ;;  %v2169_v27 = vld [vmem:[%s3518_s13 + $0x70] sm:$0xff]  ;;  %s2583_s13 = smov [#allocation19]  }
 0x7ec   :  { %2015 = vmatmul.msk.bf16.vlgmr.msra.gmra.mxu1 %vm201_vm0, %v1279_v57  ;;  %1747 = vmatpush.bf16.msra.mxu3 %v2169_v27  ;;  %s1799_s20 = sshll.u32 %s2583_s13, 4  ;;  %s1800_s20 = int_to_ptr.vmem [resolvable:$true] %s1799_s20 }
 0x7ed   :  { %v1248_v61 = vmul.f32 %v2204_v21, %v1242_v17 }
 0x7ef   :  { %v1254_v55 = vadd.f32 %v2205_v35, %v1248_v61 }
 0x7f0   :  { %1748 = vmatpush.bf16.msra.mxu3 %v2168_v2 }
 0x7f1   :  { %v1280_v52 = vpack.c.bf16 %v1254_v55, %v1254_v55 }
 0x7f4   :  { %1749 = vmatpush.bf16.msra.mxu3 %v2167_v49 }
 0x7f8   :  { %1750 = vmatpush.bf16.msra.mxu3 %v2166_v58 }
 0x7fb   :  { %2012 = vmatmul.msk.bf16.gmra.mxu3 %vm201_vm0, %v1280_v52  ;;  %2014 = vmatmul.msk.bf16.gmra.mxu0 %vm201_vm0, %v1280_v52 }
 0x7fc   :  { %2016 = vmatmul.msk.bf16.gmra.mxu1 %vm201_vm0, %v1280_v52  ;;  %1751 = vmatpush.bf16.msra.mxu3 %v2165_v19 }
 0x800   :  { %1752 = vmatpush.bf16.msra.mxu3 %v2164_v39 }
 0x804   :  { %1753 = vmatpush.bf16.msra.mxu3 %v2163_v13 }
 0x868   :  { %v1418_v4 = vpop.f32.mrf.mxu0 }
 0x869   :  { %v3434_v6 = vadd.f32 %v1418_v4, %v1284_v3  ;;  %v1436_v7 = vpop.f32.mrf.mxu1 }
 0x86a   :  { %v3436_v9 = vadd.f32 %v1436_v7, %v1285_v23 }
 0x86b   :  { %v1446_v47 = vmul.f32 %v3434_v6, %v3434_v6 }
 0x86c   :  { %v1447_v16 = vmul.f32 %v3436_v9, %v3436_v9 }
 0x86d   :  { %v1455_v26 = vmul.f32 %v1446_v47, %v3434_v6 }
 0x86e   :  { %v1456_v5 = vmul.f32 %v1447_v16, %v3436_v9  ;;  %v1400_v18 = vpop.f32.mrf.mxu3 }
 0x86f   :  { %v1464_v20 = vmul.f32 0.044715, %v1455_v26  ;;  %v3450_v15 = vadd.f32 %v1400_v18, %v1283_v11 }
 0x870   :  { %v1465_v25 = vmul.f32 0.044715, %v1456_v5  ;;  %v1420_v21 = vpop.f32.mrf.mxu0 }
 0x871   :  { %v1473_v28 = vadd.f32 %v1464_v20, %v3434_v6  ;;  %v1445_v29 = vmul.f32 %v3450_v15, %v3450_v15  ;;  %v3455_v12 = vadd.f32 %v1420_v21, %v1284_v3  ;;  %v1438_v30 = vpop.f32.mrf.mxu1 }
 0x872   :  { %v1474_v32 = vadd.f32 %v1465_v25, %v3436_v9  ;;  %v3458_v35 = vadd.f32 %v1438_v30, %v1285_v23 }
 0x873   :  { %v1482_v36 = vmul.f32 0.7978846, %v1473_v28  ;;  %v1454_v37 = vmul.f32 %v1445_v29, %v3450_v15  ;;  %v1449_v34 = vmul.f32 %v3455_v12, %v3455_v12 }
 0x874   :  { %v1483_v0 = vmul.f32 0.7978846, %v1474_v32  ;;  %v1450_v46 = vmul.f32 %v3458_v35, %v3458_v35 }
 0x875   :  { %v1463_v38 = vmul.f32 0.044715, %v1454_v37  ;;  %v1458_v51 = vmul.f32 %v1449_v34, %v3455_v12  ;;  %2270 = vtanh.f32 %v1482_v36 }
 0x876   :  { %v1459_v40 = vmul.f32 %v1450_v46, %v3458_v35  ;;  %v1402_v57 = vpop.f32.mrf.mxu3  ;;  %2272 = vtanh.f32 %v1483_v0 }
 0x877   :  { %v1472_v24 = vadd.f32 %v1463_v38, %v3450_v15  ;;  %v1467_v17 = vmul.f32 0.044715, %v1458_v51  ;;  %v3468_v61 = vadd.f32 %v1402_v57, %v1283_v11 }
 0x878   :  { %v1468_v55 = vmul.f32 0.044715, %v1459_v40  ;;  %v1423_v52 = vpop.f32.mrf.mxu0 }
 0x879   :  { %v1481_v8 = vmul.f32 0.7978846, %v1472_v24  ;;  %v1476_v42 = vadd.f32 %v1467_v17, %v3455_v12  ;;  %v1448_v27 = vmul.f32 %v3468_v61, %v3468_v61  ;;  %v3473_v45 = vadd.f32 %v1423_v52, %v1284_v3  ;;  %v1441_v1 = vpop.f32.mrf.mxu1 }
 0x87a   :  { %v1477_v2 = vadd.f32 %v1468_v55, %v3458_v35  ;;  %v3476_v48 = vadd.f32 %v1441_v1, %v1285_v23 }
 0x87b   :  { %v1485_v53 = vmul.f32 0.7978846, %v1476_v42  ;;  %v1457_v49 = vmul.f32 %v1448_v27, %v3468_v61  ;;  %v1452_v54 = vmul.f32 %v3473_v45, %v3473_v45  ;;  %2274 = vtanh.f32 %v1481_v8  ;;  %v2271_v60 = vpop.eup %2270 }
 0x87c   :  { %v1486_v56 = vmul.f32 0.7978846, %v1477_v2  ;;  %v1453_v58 = vmul.f32 %v3476_v48, %v3476_v48  ;;  %v2273_v41 = vpop.eup %2272  ;;  %v1500_v23 = vadd.f32 1.0, %v2271_v60 }
 0x87d   :  { %2276 = vtanh.f32 %v1485_v53  ;;  %v1466_v22 = vmul.f32 0.044715, %v1457_v49  ;;  %v1461_v19 = vmul.f32 %v1452_v54, %v3473_v45  ;;  %v1501_v13 = vadd.f32 1.0, %v2273_v41 }
 0x87e   :  { %2278 = vtanh.f32 %v1486_v56  ;;  %v1462_v33 = vmul.f32 %v1453_v58, %v3476_v48  ;;  %v1405_v62 = vpop.f32.mrf.mxu3  ;;  %v1509_v25 = vmul.f32 0.5, %v1500_v23 }
 0x87f   :  { %v1475_v39 = vadd.f32 %v1466_v22, %v3468_v61  ;;  %v1470_v63 = vmul.f32 0.044715, %v1461_v19  ;;  %v1406_v3 = vadd.f32 %v1405_v62, %v1283_v11  ;;  %v1510_v28 = vmul.f32 0.5, %v1501_v13 }
 0x880   :  { %v1471_v31 = vmul.f32 0.044715, %v1462_v33  ;;  %v1425_v4 = vpop.f32.mrf.mxu0  ;;  %v1518_v46 = vmul.f32 %v1509_v25, %v3434_v6 }
 0x881   :  { %v1484_v10 = vmul.f32 0.7978846, %v1475_v39  ;;  %v1451_v7 = vmul.f32 %v1406_v3, %v1406_v3  ;;  %v1443_v59 = vpop.f32.mrf.mxu1  ;;  %v1479_v47 = vadd.f32 %v1470_v63, %v3473_v45  ;;  %v2275_v16 = vpop.eup %2274  ;;  %v1519_v40 = vmul.f32 %v1510_v28, %v3436_v9  ;;  %v2206_v63 = vld [vmem:[#allocation16] ss:$0 sm:$0xff] }
 0x882   :  { %v1480_v26 = vadd.f32 %v1471_v31, %v3476_v48  ;;  %v1499_v32 = vadd.f32 1.0, %v2275_v16 }
 0x883   :  { %v2277_v5 = vpop.eup %2276  ;;  %2280 = vtanh.f32 %v1484_v10  ;;  %v1460_v18 = vmul.f32 %v1451_v7, %v1406_v3  ;;  %v1488_v14 = vmul.f32 0.7978846, %v1479_v47  ;;  %v2207_v10 = vld [vmem:[#allocation17] ss:$0 sm:$0xff] }
 0x884   :  { %v2279_v20 = vpop.eup %2278  ;;  %v1503_v21 = vadd.f32 1.0, %v2277_v5  ;;  %v1489_v11 = vmul.f32 0.7978846, %v1480_v26  ;;  %v1508_v17 = vmul.f32 0.5, %v1499_v32 }
 0x885   :  { %v1504_v29 = vadd.f32 1.0, %v2279_v20  ;;  %v1469_v30 = vmul.f32 0.044715, %v1460_v18  ;;  %2282 = vtanh.f32 %v1488_v14 }
 0x886   :  { %v1512_v36 = vmul.f32 0.5, %v1503_v21  ;;  %v1407_v37 = vpop.f32.mrf.mxu3  ;;  %2284 = vtanh.f32 %v1489_v11  ;;  %v1517_v6 = vmul.f32 %v1508_v17, %v3450_v15 }
 0x887   :  { %v1513_v34 = vmul.f32 0.5, %v1504_v29  ;;  %v1478_v0 = vadd.f32 %v1469_v30, %v1406_v3 }
 0x888   :  { %v1521_v38 = vmul.f32 %v1512_v36, %v3455_v12 }
 0x889   :  { %v2281_v51 = vpop.eup %2280  ;;  %v1522_v57 = vmul.f32 %v1513_v34, %v3458_v35  ;;  %v1487_v24 = vmul.f32 0.7978846, %v1478_v0 }
 0x88a   :  { %v1502_v55 = vadd.f32 1.0, %v2281_v51  ;;  %v1575_v52 = vpack.c.bf16 %v1521_v38, %v1518_v46 }
 0x88b   :  { %v2283_v8 = vpop.eup %2282  ;;  %v1576_v42 = vpack.c.bf16 %v1522_v57, %v1519_v40  ;;  %2286 = vtanh.f32 %v1487_v24 }
 0x88c   :  { %v2285_v27 = vpop.eup %2284  ;;  %v1511_v1 = vmul.f32 0.5, %v1502_v55  ;;  %1754 = vmatmul.bf16.vlgmr.msra.gmra.mxu3 %v1575_v52  ;;  %v1506_v2 = vadd.f32 1.0, %v2283_v8 }
 0x88d   :  { %1772 = vmatmul.bf16.vlgmr.msra.gmra.mxu0 %v1576_v42  ;;  %v1507_v53 = vadd.f32 1.0, %v2285_v27 }
 0x88e   :  { %v1520_v12 = vmul.f32 %v1511_v1, %v3468_v61  ;;  %v1515_v35 = vmul.f32 0.5, %v1506_v2 }
 0x88f   :  { %v1516_v54 = vmul.f32 0.5, %v1507_v53 }
 0x890   :  { %v1574_v9 = vpack.c.bf16 %v1520_v12, %v1517_v6  ;;  %v1524_v58 = vmul.f32 %v1515_v35, %v3473_v45 }
 0x891   :  { %v2287_v49 = vpop.eup %2286  ;;  %v1525_v60 = vmul.f32 %v1516_v54, %v3476_v48 }
 0x892   :  { %1736 = vmatmul.bf16.vlgmr.msra.gmra.mxu2 %v1574_v9  ;;  %v1505_v56 = vadd.f32 1.0, %v2287_v49  ;;  %v1578_v19 = vpack.c.bf16 %v1524_v58, %v1524_v58 }
 0x893   :  { %v1579_v41 = vpack.c.bf16 %v1525_v60, %v1525_v60 }
 0x894   :  { %v1514_v22 = vmul.f32 0.5, %v1505_v56 }
 0x896   :  { %v1523_v33 = vmul.f32 %v1514_v22, %v1406_v3 }
 0x898   :  { %v1577_v15 = vpack.c.bf16 %v1523_v33, %v1523_v33 }
 0x89c   :  { %1759 = vmatmul.bf16.gmra.mxu3 %v1578_v19 }
 0x89d   :  { %1777 = vmatmul.bf16.gmra.mxu0 %v1579_v41 }
 0x8a2   :  { %1741 = vmatmul.bf16.gmra.mxu2 %v1577_v15 }
 0x90a   :  { %v1773_v61 = vpop.f32.mrf.mxu0 }
 0x90f   :  { %v1755_v62 = vpop.f32.mrf.mxu3 }
 0x912   :  { %v1775_v39 = vpop.f32.mrf.mxu0 }
 0x915   :  { %v1737_v23 = vpop.f32.mrf.mxu2 }
 0x916   :  { %v1738_v31 = vadd.f32 %v2206_v63, %v1737_v23 }
 0x917   :  { %v1757_v4 = vpop.f32.mrf.mxu3 }
 0x918   :  { %v1756_v13 = vadd.f32 %v1755_v62, %v1738_v31 }
 0x91a   :  { %v1774_v45 = vadd.f32 %v1773_v61, %v1756_v13  ;;  %v1778_v7 = vpop.f32.mrf.mxu0 }
 0x91c   :  { %v1786_v48 = vmul.f32 %v2207_v10, %v1774_v45 }
 0x91d   :  { %v1739_v59 = vpop.f32.mrf.mxu2 }
 0x91e   :  { %v1789_v47 = vadd.f32 %v1786_v48, %v3209_v43  ;;  %v1740_v16 = vadd.f32 %v2206_v63, %v1739_v59 }
 0x91f   :  { %v1760_v3 = vpop.f32.mrf.mxu3 }
 0x920   :  { %1792 = vst.msk [vmem:[#allocation19] sm:$0xff] %vm201_vm0, %v1789_v47  ;;  %v1758_v26 = vadd.f32 %v1757_v4, %v1740_v16 }
 0x922   :  { %v1776_v5 = vadd.f32 %v1775_v39, %v1758_v26  ;;  %v1780_v18 = vpop.f32.mrf.mxu0 }
 0x924   :  { %v1787_v14 = vmul.f32 %v2207_v10, %v1776_v5 }
 0x925   :  { %v1742_v20 = vpop.f32.mrf.mxu2 }
 0x926   :  { %v1790_v25 = vadd.f32 %v1787_v14, %v3216_v44  ;;  %v1743_v21 = vadd.f32 %v2206_v63, %v1742_v20 }
 0x927   :  { %v1762_v11 = vpop.f32.mrf.mxu3 }
 0x928   :  { %1793 = vst.msk [vmem:[#allocation19 + $0x8] sm:$0xff] %vm201_vm0, %v1790_v25  ;;  %v1761_v28 = vadd.f32 %v1760_v3, %v1743_v21 }
 0x92a   :  { %v1779_v29 = vadd.f32 %v1778_v7, %v1761_v28 }
 0x92c   :  { %v1788_v43 = vmul.f32 %v2207_v10, %v1779_v29 }
 0x92d   :  { %v1744_v30 = vpop.f32.mrf.mxu2 }
 0x92e   :  { %v1791_v32 = vadd.f32 %v1788_v43, %v3223_v50 }
 0x930   :  { %1794 = vst.msk [vmem:[#allocation19 + $0x10] sm:$0xff] %vm201_vm0, %v1791_v32 }
 0x931   :  { %1807 = dma.vmem_to_hbm [thread:$0]  %s1800_s20, 384, %s1802_s22, [#allocation4], %s2584_s1, %s2584_s1, %s2585_s7  }
 0x932   :  { %2567 = dma.done.wait [#allocation4], 384  }
 0x933   :  { %2568 = vsyncadd [#allocation4], 4294966912 }
 0x934   :  { %1812 = vsyncpa [#allocation3], 1 }
 0x935   :  { %1813 = vsyncpa [#allocation6], 1 }
 0x936   :  { %1814 = vsyncpa [#allocation9], 1 }
 0x937   :  { %1815 = vsyncpa [#allocation12], 1 }
 0x938   :  { %1816 = vsyncpa [#allocation15], 1 }
 0x939   :  { %1817 = vsyncpa [#allocation18], 1 }
 0x93a   :  { %1818 = vsyncpa [#allocation4], 1 }

</bundles_post_ra>
